<compile_context>
chip_gen: v7x
topology: tpu7x:2x2x1
jax: 0.10.0
libtpu: 0.0.40
codegen_flags: <defaults>
</compile_context>

<pallas_src>
import functools
import math

import jax
import jax.numpy as jnp
from jax.experimental import pallas as pl
from jax.experimental.pallas import tpu as pltpu

MAX_REL_POS = 4
N_BUCKETS = 2 * MAX_REL_POS + 1


# -------------------------- in-kernel helpers ------------------------------

def _layer_norm(y, g, b):
    mu = jnp.mean(y, axis=-1, keepdims=True)
    var = jnp.mean((y - mu) ** 2, axis=-1, keepdims=True)
    return (y - mu) * jax.lax.rsqrt(var + 1e-5) * g + b


def _rel_bucket_masks(q_len, k_len):
    i_idx = jax.lax.broadcasted_iota(jnp.int32, (q_len, k_len), 0)
    j_idx = jax.lax.broadcasted_iota(jnp.int32, (q_len, k_len), 1)
    bucket = jnp.clip(i_idx - j_idx, -MAX_REL_POS, MAX_REL_POS) + MAX_REL_POS
    return [bucket == r for r in range(N_BUCKETS)]


def _mha_block(x_q, x_kv, mask, wq, bq, wkv, bkv, wo, bo, rel,
               n_heads, inv_scale, need_attv):
    """Multi-head attention with relative-position embeddings.

    x_q: [q, H], x_kv: [k, H], mask: [q, k], wkv: [H, 2H] (K | V concat),
    rel: [2*MAX_REL_POS+1, hd].  Returns (fc_o output [q, H], list of per-head
    attention@V [q, hd] for the "attention" return value).
    """
    q_len, H = x_q.shape
    k_len = x_kv.shape[0]
    hd = H // n_heads

    Q = jnp.dot(x_q, wq, preferred_element_type=jnp.float32) + bq       # [q, H]
    KV = jnp.dot(x_kv, wkv, preferred_element_type=jnp.float32) + bkv   # [k, 2H]

    bucket_masks = _rel_bucket_masks(q_len, k_len)
    mask_zero = (mask == 0)

    proj = jnp.zeros((q_len, H), jnp.float32)
    attv_heads = []
    for h in range(n_heads):
        Qh = Q[:, h * hd:(h + 1) * hd] * inv_scale     # 1/scale folded into Q
        Kh = KV[:, h * hd:(h + 1) * hd]
        Vh = KV[:, H + h * hd:H + (h + 1) * hd]

        # energy1 = Q K^T
        e1 = jax.lax.dot_general(Qh, Kh, (((1,), (1,)), ((), ())),
                                 preferred_element_type=jnp.float32)    # [q, k]
        # energy2 via 9 relative buckets: (Q @ rel^T) then bucket select
        e2b = jax.lax.dot_general(Qh, rel, (((1,), (1,)), ((), ())),
                                  preferred_element_type=jnp.float32)   # [q, 9]
        e2 = jnp.zeros((q_len, k_len), jnp.float32)
        for r in range(N_BUCKETS):
            e2 = e2 + jnp.where(bucket_masks[r], e2b[:, r:r + 1], 0.0)

        energy = e1 + e2
        energy = jnp.where(mask_zero, jnp.float32(-1e10), energy)
        energy = energy - jnp.max(energy, axis=-1, keepdims=True)
        p = jnp.exp(energy)
        att = p * pl.reciprocal(jnp.sum(p, axis=-1, keepdims=True), approx=True)

        attv_h = jnp.dot(att, Vh, preferred_element_type=jnp.float32)   # [q, hd]

        # value-side relative term through the same 9 buckets
        rel_t = jnp.zeros((q_len, hd), jnp.float32)
        for r in range(N_BUCKETS):
            ab_r = jnp.sum(jnp.where(bucket_masks[r], att, 0.0),
                           axis=-1, keepdims=True)                      # [q, 1]
            rel_t = rel_t + ab_r * rel[r:r + 1, :]

        ctx_h = attv_h + rel_t
        # output projection folded per head: x @ Wo = sum_h ctx_h @ Wo[h*hd:(h+1)*hd]
        proj = proj + jnp.dot(ctx_h, wo[h * hd:(h + 1) * hd, :],
                              preferred_element_type=jnp.float32)
        if need_attv:
            attv_heads.append(attv_h)

    return proj + bo, attv_heads


# -------------------------- fused decoder-layer kernel ----------------------

def _decoder_layer_kernel(
        trg_ref, enc_ref, tmask_ref, smask_ref,
        wq_s, bq_s, wkv_s, bkv_s, wo_s, bo_s, rel_s, ln1_g, ln1_b,
        wq_e, bq_e, wkv_e, bkv_e, wo_e, bo_e, rel_e, ln2_g, ln2_b,
        w1, b1, w2, b2, ln3_g, ln3_b,
        out_ref, attv_ref, *, n_heads, inv_scale):
    trg = trg_ref[0]        # [q, H]
    enc = enc_ref[0]        # [k, H]
    tmask = tmask_ref[0]    # [q, q]
    smask = smask_ref[0]    # [q, k]

    # ---- self attention + residual + LayerNorm ----
    sa, _ = _mha_block(trg, trg, tmask,
                       wq_s[...], bq_s[...], wkv_s[...], bkv_s[...],
                       wo_s[...], bo_s[...], rel_s[...],
                       n_heads, inv_scale, need_attv=False)
    x = _layer_norm(sa + trg, ln1_g[...], ln1_b[...])

    # ---- encoder attention + residual + LayerNorm ----
    ea, attv_heads = _mha_block(x, enc, smask,
                                wq_e[...], bq_e[...], wkv_e[...], bkv_e[...],
                                wo_e[...], bo_e[...], rel_e[...],
                                n_heads, inv_scale, need_attv=True)
    # lane-dense [q, H] layout: head h occupies lanes [h*hd, (h+1)*hd)
    attv_ref[0] = jnp.concatenate(attv_heads, axis=1)
    x = _layer_norm(ea + x, ln2_g[...], ln2_b[...])

    # ---- position-wise feed-forward + residual + LayerNorm ----
    h = jnp.maximum(
        jnp.dot(x, w1[...], preferred_element_type=jnp.float32) + b1[...], 0.0)
    y = jnp.dot(h, w2[...], preferred_element_type=jnp.float32) + b2[...]
    out_ref[0] = _layer_norm(y + x, ln3_g[...], ln3_b[...])


# -------------------------- wrapper (single pallas_call) --------------------

def decoder_layer(params, trg, enc_src, trg_mask, src_mask, n_heads):
    B, Q, H = trg.shape
    K = enc_src.shape[1]
    hd = H // n_heads
    P = params["ffn"]["W1"].shape[1]
    inv_scale = 1.0 / math.sqrt(hd)

    def prep_attn(p):
        wkv = jnp.concatenate([p["Wk"], p["Wv"]], axis=1)           # [H, 2H]
        bkv = jnp.concatenate([p["bk"], p["bv"]], axis=0).reshape(1, 2 * H)
        return (p["Wq"], p["bq"].reshape(1, H), wkv, bkv,
                p["Wo"], p["bo"].reshape(1, H), p["rel_emb"])

    sa = prep_attn(params["self_attn"])
    ea = prep_attn(params["enc_attn"])

    # masks kept at [B, q, k] -- no n_heads broadcast in HBM
    tmask = jnp.broadcast_to(trg_mask[:, 0], (B, Q, Q)).astype(jnp.float32)
    smask = jnp.broadcast_to(src_mask[:, 0], (B, Q, K)).astype(jnp.float32)

    def rep(shape):  # grid-invariant block: stays resident in VMEM
        return pl.BlockSpec(shape, lambda b, _n=len(shape): (0,) * _n)

    in_specs = [
        pl.BlockSpec((1, Q, H), lambda b: (b, 0, 0)),   # trg
        pl.BlockSpec((1, K, H), lambda b: (b, 0, 0)),   # enc_src
        pl.BlockSpec((1, Q, Q), lambda b: (b, 0, 0)),   # trg mask
        pl.BlockSpec((1, Q, K), lambda b: (b, 0, 0)),   # src mask
        # self-attention params + LN1
        rep((H, H)), rep((1, H)), rep((H, 2 * H)), rep((1, 2 * H)),
        rep((H, H)), rep((1, H)), rep((N_BUCKETS, hd)),
        rep((1, H)), rep((1, H)),
        # encoder-attention params + LN2
        rep((H, H)), rep((1, H)), rep((H, 2 * H)), rep((1, 2 * H)),
        rep((H, H)), rep((1, H)), rep((N_BUCKETS, hd)),
        rep((1, H)), rep((1, H)),
        # FFN params + LN3
        rep((H, P)), rep((1, P)), rep((P, H)), rep((1, H)),
        rep((1, H)), rep((1, H)),
    ]

    kernel = functools.partial(_decoder_layer_kernel,
                               n_heads=n_heads, inv_scale=inv_scale)

    out, attv = pl.pallas_call(
        kernel,
        out_shape=(jax.ShapeDtypeStruct((B, Q, H), jnp.float32),
                   jax.ShapeDtypeStruct((B, Q, H), jnp.float32)),
        grid=(B,),
        in_specs=in_specs,
        out_specs=(pl.BlockSpec((1, Q, H), lambda b: (b, 0, 0)),
                   pl.BlockSpec((1, Q, H), lambda b: (b, 0, 0))),
        compiler_params=pltpu.CompilerParams(
            dimension_semantics=("parallel",)),
    )(trg, enc_src, tmask, smask,
      *sa, params["ln1_g"].reshape(1, H), params["ln1_b"].reshape(1, H),
      *ea, params["ln2_g"].reshape(1, H), params["ln2_b"].reshape(1, H),
      params["ffn"]["W1"], params["ffn"]["b1"].reshape(1, P),
      params["ffn"]["W2"], params["ffn"]["b2"].reshape(1, H),
      params["ln3_g"].reshape(1, H), params["ln3_b"].reshape(1, H))

    # kernel writes attention@V in [B, q, nH*hd] (lane-dense); reorder to the
    # PyTorch [B, nH, q, hd] layout with a cheap host-side transpose.
    attention = attv.reshape(B, Q, n_heads, hd).transpose(0, 2, 1, 3)
    return out, attention


# -------------------------- pure-JAX reference -----------------------------

def rel_pos_table(q_len, k_len, emb):
    pos = jnp.arange(q_len)[:, None] - jnp.arange(k_len)[None, :]
    pos = jnp.clip(pos, -MAX_REL_POS, MAX_REL_POS) + MAX_REL_POS
    return emb[pos]  # [q_len, k_len, head_dim]


def ref_mha(p, query, key_, value, mask, n_heads):
    B, q_len, H = query.shape
    k_len = key_.shape[1]
    hd = H // n_heads
    lin = lambda x, W, b: x @ W + b
    Q = lin(query, p["Wq"], p["bq"]).reshape(B, q_len, n_heads, hd).transpose(0, 2, 1, 3)
    K = lin(key_, p["Wk"], p["bk"]).reshape(B, k_len, n_heads, hd).transpose(0, 2, 1, 3)
    V = lin(value, p["Wv"], p["bv"]).reshape(B, k_len, n_heads, hd).transpose(0, 2, 1, 3)
    rel = rel_pos_table(q_len, k_len, p["rel_emb"])
    scale = math.sqrt(hd)
    e1 = jnp.einsum("bhqd,bhkd->bhqk", Q, K)
    e2 = jnp.einsum("bhqd,qkd->bhqk", Q, rel)
    energy = (e1 + e2) / scale
    energy = jnp.where(jnp.broadcast_to(mask, energy.shape) == 0, -1e10, energy)
    att = jax.nn.softmax(energy, axis=-1)
    attv = jnp.einsum("bhqk,bhkd->bhqd", att, V)
    rel_t = jnp.einsum("bhqk,qkd->bhqd", att, rel)
    x = (attv + rel_t).transpose(0, 2, 1, 3).reshape(B, q_len, H)
    return lin(x, p["Wo"], p["bo"]), attv


def ref_add_ln(x, res, g, b):
    y = x + res
    mu = jnp.mean(y, axis=-1, keepdims=True)
    var = jnp.mean((y - mu) ** 2, axis=-1, keepdims=True)
    return (y - mu) * jax.lax.rsqrt(var + 1e-5) * g + b


def ref_decoder_layer(params, trg, enc_src, trg_mask, src_mask, n_heads):
    _trg, _ = ref_mha(params["self_attn"], trg, trg, trg, trg_mask, n_heads)
    trg = ref_add_ln(_trg, trg, params["ln1_g"], params["ln1_b"])
    _trg, attention = ref_mha(params["enc_attn"], trg, enc_src, enc_src, src_mask, n_heads)
    trg = ref_add_ln(_trg, trg, params["ln2_g"], params["ln2_b"])
    h = jnp.maximum(trg @ params["ffn"]["W1"] + params["ffn"]["b1"], 0.0)
    _trg = h @ params["ffn"]["W2"] + params["ffn"]["b2"]
    trg = ref_add_ln(_trg, trg, params["ln3_g"], params["ln3_b"])
    return trg, attention


# -------------------------- params & main -----------------------------------

def init_params(key, hid_dim, n_heads, pf_dim):
    head_dim = hid_dim // n_heads

    def lin_init(k, fi, fo):
        k1, k2 = jax.random.split(k)
        bound = 1.0 / math.sqrt(fi)
        return (jax.random.uniform(k1, (fi, fo), jnp.float32, -bound, bound),
                jax.random.uniform(k2, (fo,), jnp.float32, -bound, bound))

    def mha_init(k):
        ks = jax.random.split(k, 5)
        Wq, bq = lin_init(ks[0], hid_dim, hid_dim)
        Wk, bk = lin_init(ks[1], hid_dim, hid_dim)
        Wv, bv = lin_init(ks[2], hid_dim, hid_dim)
        Wo, bo = lin_init(ks[3], hid_dim, hid_dim)
        rel = jax.random.normal(ks[4], (N_BUCKETS, head_dim), jnp.float32)
        return dict(Wq=Wq, bq=bq, Wk=Wk, bk=bk, Wv=Wv, bv=bv, Wo=Wo, bo=bo,
                    rel_emb=rel)

    keys = jax.random.split(key, 4)
    W1, b1 = lin_init(keys[0], hid_dim, pf_dim)
    W2, b2 = lin_init(keys[1], pf_dim, hid_dim)
    return dict(
        self_attn=mha_init(keys[2]),
        enc_attn=mha_init(keys[3]),
        ffn=dict(W1=W1, b1=b1, W2=W2, b2=b2),
        ln1_g=jnp.ones(hid_dim, jnp.float32), ln1_b=jnp.zeros(hid_dim, jnp.float32),
        ln2_g=jnp.ones(hid_dim, jnp.float32), ln2_b=jnp.zeros(hid_dim, jnp.float32),
        ln3_g=jnp.ones(hid_dim, jnp.float32), ln3_b=jnp.zeros(hid_dim, jnp.float32),
    )


if __name__ == "__main__":
    B, TRG_LEN, SRC_LEN = 2, 8, 8
    HID_DIM, N_HEADS, PF_DIM = 32, 4, 64

    root = jax.random.PRNGKey(0)
    kp, kt, ke = jax.random.split(root, 3)
    params = init_params(kp, HID_DIM, N_HEADS, PF_DIM)

    trg = jax.random.normal(kt, (B, TRG_LEN, HID_DIM), jnp.float32)
    enc_src = jax.random.normal(ke, (B, SRC_LEN, HID_DIM), jnp.float32)
    trg_mask = jnp.tril(jnp.ones((TRG_LEN, TRG_LEN), jnp.float32))[None, None]
    trg_mask = jnp.broadcast_to(trg_mask, (B, 1, TRG_LEN, TRG_LEN))
    src_mask = jnp.ones((B, 1, 1, SRC_LEN), jnp.float32)

    fwd = jax.jit(functools.partial(decoder_layer, n_heads=N_HEADS))
    out, attention = fwd(params, trg, enc_src, trg_mask, src_mask)
    jax.block_until_ready(out)
    jax.block_until_ready(attention)

    ref_out, ref_att = ref_decoder_layer(params, trg, enc_src, trg_mask,
                                         src_mask, N_HEADS)
    assert out.shape == (B, TRG_LEN, HID_DIM)
    assert attention.shape == (B, N_HEADS, TRG_LEN, HID_DIM // N_HEADS)
    assert jnp.allclose(out, ref_out, atol=1e-2, rtol=1e-2)
    assert jnp.allclose(attention, ref_att, atol=1e-2, rtol=1e-2)

    print("KERNEL_OK")
</pallas_src>

<mosaic_0001>
module attributes {stable_mosaic.version = 11 : i64} {
  func.func @_decoder_layer_kernel(%arg0: i32, %arg1: memref<1x8x32xf32, #tpu.memory_space<vmem>>, %arg2: memref<1x8x32xf32, #tpu.memory_space<vmem>>, %arg3: memref<1x8x8xf32, #tpu.memory_space<vmem>>, %arg4: memref<1x8x8xf32, #tpu.memory_space<vmem>>, %arg5: memref<32x32xf32, #tpu.memory_space<vmem>>, %arg6: memref<1x32xf32, #tpu.memory_space<vmem>>, %arg7: memref<32x64xf32, #tpu.memory_space<vmem>>, %arg8: memref<1x64xf32, #tpu.memory_space<vmem>>, %arg9: memref<32x32xf32, #tpu.memory_space<vmem>>, %arg10: memref<1x32xf32, #tpu.memory_space<vmem>>, %arg11: memref<9x8xf32, #tpu.memory_space<vmem>>, %arg12: memref<1x32xf32, #tpu.memory_space<vmem>>, %arg13: memref<1x32xf32, #tpu.memory_space<vmem>>, %arg14: memref<32x32xf32, #tpu.memory_space<vmem>>, %arg15: memref<1x32xf32, #tpu.memory_space<vmem>>, %arg16: memref<32x64xf32, #tpu.memory_space<vmem>>, %arg17: memref<1x64xf32, #tpu.memory_space<vmem>>, %arg18: memref<32x32xf32, #tpu.memory_space<vmem>>, %arg19: memref<1x32xf32, #tpu.memory_space<vmem>>, %arg20: memref<9x8xf32, #tpu.memory_space<vmem>>, %arg21: memref<1x32xf32, #tpu.memory_space<vmem>>, %arg22: memref<1x32xf32, #tpu.memory_space<vmem>>, %arg23: memref<32x64xf32, #tpu.memory_space<vmem>>, %arg24: memref<1x64xf32, #tpu.memory_space<vmem>>, %arg25: memref<64x32xf32, #tpu.memory_space<vmem>>, %arg26: memref<1x32xf32, #tpu.memory_space<vmem>>, %arg27: memref<1x32xf32, #tpu.memory_space<vmem>>, %arg28: memref<1x32xf32, #tpu.memory_space<vmem>>, %arg29: memref<1x8x32xf32, #tpu.memory_space<vmem>>, %arg30: memref<1x8x32xf32, #tpu.memory_space<vmem>>) attributes {dimension_semantics = [#tpu.dimension_semantics<parallel>], iteration_bounds = array<i64: 2>, scalar_prefetch = 0 : i64, scratch_operands = 0 : i64, tpu.core_type = #tpu.core_type<tc>, window_params = [{transform_indices = @transform_0, window_bounds = array<i64: 1, 8, 32>}, {transform_indices = @transform_1, window_bounds = array<i64: 1, 8, 32>}, {transform_indices = @transform_2, window_bounds = array<i64: 1, 8, 8>}, {transform_indices = @transform_3, window_bounds = array<i64: 1, 8, 8>}, {pipeline_mode = #tpu.pipeline_mode<synchronous>, transform_indices = @transform_4, window_bounds = array<i64: 32, 32>}, {pipeline_mode = #tpu.pipeline_mode<synchronous>, transform_indices = @transform_5, window_bounds = array<i64: 1, 32>}, {pipeline_mode = #tpu.pipeline_mode<synchronous>, transform_indices = @transform_6, window_bounds = array<i64: 32, 64>}, {pipeline_mode = #tpu.pipeline_mode<synchronous>, transform_indices = @transform_7, window_bounds = array<i64: 1, 64>}, {pipeline_mode = #tpu.pipeline_mode<synchronous>, transform_indices = @transform_8, window_bounds = array<i64: 32, 32>}, {pipeline_mode = #tpu.pipeline_mode<synchronous>, transform_indices = @transform_9, window_bounds = array<i64: 1, 32>}, {pipeline_mode = #tpu.pipeline_mode<synchronous>, transform_indices = @transform_10, window_bounds = array<i64: 9, 8>}, {pipeline_mode = #tpu.pipeline_mode<synchronous>, transform_indices = @transform_11, window_bounds = array<i64: 1, 32>}, {pipeline_mode = #tpu.pipeline_mode<synchronous>, transform_indices = @transform_12, window_bounds = array<i64: 1, 32>}, {pipeline_mode = #tpu.pipeline_mode<synchronous>, transform_indices = @transform_13, window_bounds = array<i64: 32, 32>}, {pipeline_mode = #tpu.pipeline_mode<synchronous>, transform_indices = @transform_14, window_bounds = array<i64: 1, 32>}, {pipeline_mode = #tpu.pipeline_mode<synchronous>, transform_indices = @transform_15, window_bounds = array<i64: 32, 64>}, {pipeline_mode = #tpu.pipeline_mode<synchronous>, transform_indices = @transform_16, window_bounds = array<i64: 1, 64>}, {pipeline_mode = #tpu.pipeline_mode<synchronous>, transform_indices = @transform_17, window_bounds = array<i64: 32, 32>}, {pipeline_mode = #tpu.pipeline_mode<synchronous>, transform_indices = @transform_18, window_bounds = array<i64: 1, 32>}, {pipeline_mode = #tpu.pipeline_mode<synchronous>, transform_indices = @transform_19, window_bounds = array<i64: 9, 8>}, {pipeline_mode = #tpu.pipeline_mode<synchronous>, transform_indices = @transform_20, window_bounds = array<i64: 1, 32>}, {pipeline_mode = #tpu.pipeline_mode<synchronous>, transform_indices = @transform_21, window_bounds = array<i64: 1, 32>}, {pipeline_mode = #tpu.pipeline_mode<synchronous>, transform_indices = @transform_22, window_bounds = array<i64: 32, 64>}, {pipeline_mode = #tpu.pipeline_mode<synchronous>, transform_indices = @transform_23, window_bounds = array<i64: 1, 64>}, {pipeline_mode = #tpu.pipeline_mode<synchronous>, transform_indices = @transform_24, window_bounds = array<i64: 64, 32>}, {pipeline_mode = #tpu.pipeline_mode<synchronous>, transform_indices = @transform_25, window_bounds = array<i64: 1, 32>}, {pipeline_mode = #tpu.pipeline_mode<synchronous>, transform_indices = @transform_26, window_bounds = array<i64: 1, 32>}, {pipeline_mode = #tpu.pipeline_mode<synchronous>, transform_indices = @transform_27, window_bounds = array<i64: 1, 32>}, {transform_indices = @transform_28, window_bounds = array<i64: 1, 8, 32>}, {transform_indices = @transform_29, window_bounds = array<i64: 1, 8, 32>}]} {
    %c0 = arith.constant 0 : index
    %c0_0 = arith.constant 0 : index
    %c0_1 = arith.constant 0 : index
    %0 = vector.load %arg1[%c0, %c0_0, %c0_1] : memref<1x8x32xf32, #tpu.memory_space<vmem>>, vector<1x8x32xf32>
    %1 = vector.shape_cast %0 : vector<1x8x32xf32> to vector<8x32xf32>
    %c0_2 = arith.constant 0 : index
    %c0_3 = arith.constant 0 : index
    %c0_4 = arith.constant 0 : index
    %2 = vector.load %arg2[%c0_2, %c0_3, %c0_4] : memref<1x8x32xf32, #tpu.memory_space<vmem>>, vector<1x8x32xf32>
    %3 = vector.shape_cast %2 : vector<1x8x32xf32> to vector<8x32xf32>
    %c0_5 = arith.constant 0 : index
    %c0_6 = arith.constant 0 : index
    %c0_7 = arith.constant 0 : index
    %4 = vector.load %arg3[%c0_5, %c0_6, %c0_7] : memref<1x8x8xf32, #tpu.memory_space<vmem>>, vector<1x8x8xf32>
    %5 = vector.shape_cast %4 : vector<1x8x8xf32> to vector<8x8xf32>
    %c0_8 = arith.constant 0 : index
    %c0_9 = arith.constant 0 : index
    %c0_10 = arith.constant 0 : index
    %6 = vector.load %arg4[%c0_8, %c0_9, %c0_10] : memref<1x8x8xf32, #tpu.memory_space<vmem>>, vector<1x8x8xf32>
    %7 = vector.shape_cast %6 : vector<1x8x8xf32> to vector<8x8xf32>
    %c0_11 = arith.constant 0 : index
    %c0_12 = arith.constant 0 : index
    %8 = vector.load %arg5[%c0_11, %c0_12] : memref<32x32xf32, #tpu.memory_space<vmem>>, vector<32x32xf32>
    %c0_13 = arith.constant 0 : index
    %c0_14 = arith.constant 0 : index
    %9 = vector.load %arg6[%c0_13, %c0_14] : memref<1x32xf32, #tpu.memory_space<vmem>>, vector<1x32xf32>
    %c0_15 = arith.constant 0 : index
    %c0_16 = arith.constant 0 : index
    %10 = vector.load %arg7[%c0_15, %c0_16] : memref<32x64xf32, #tpu.memory_space<vmem>>, vector<32x64xf32>
    %c0_17 = arith.constant 0 : index
    %c0_18 = arith.constant 0 : index
    %11 = vector.load %arg8[%c0_17, %c0_18] : memref<1x64xf32, #tpu.memory_space<vmem>>, vector<1x64xf32>
    %c0_19 = arith.constant 0 : index
    %c0_20 = arith.constant 0 : index
    %12 = vector.load %arg9[%c0_19, %c0_20] : memref<32x32xf32, #tpu.memory_space<vmem>>, vector<32x32xf32>
    %c0_21 = arith.constant 0 : index
    %c0_22 = arith.constant 0 : index
    %13 = vector.load %arg10[%c0_21, %c0_22] : memref<1x32xf32, #tpu.memory_space<vmem>>, vector<1x32xf32>
    %c0_23 = arith.constant 0 : index
    %c0_24 = arith.constant 0 : index
    %14 = vector.load %arg11[%c0_23, %c0_24] : memref<9x8xf32, #tpu.memory_space<vmem>>, vector<9x8xf32>
    %cst = arith.constant dense<0.000000e+00> : vector<8x32xf32>
    %15 = tpu.matmul %1, %8, %cst {dimension_numbers = #tpu.dot_dimension_numbers<[1], [0], [0], [1], [0, 0, 1, 1], [], []>} : vector<8x32xf32>, vector<32x32xf32>, vector<8x32xf32> -> vector<8x32xf32>
    %16 = vector.broadcast %9 : vector<1x32xf32> to vector<8x32xf32>
    %17 = arith.addf %15, %16 : vector<8x32xf32>
    %cst_25 = arith.constant dense<0.000000e+00> : vector<8x64xf32>
    %18 = tpu.matmul %1, %10, %cst_25 {dimension_numbers = #tpu.dot_dimension_numbers<[1], [0], [0], [1], [0, 0, 1, 1], [], []>} : vector<8x32xf32>, vector<32x64xf32>, vector<8x64xf32> -> vector<8x64xf32>
    %19 = vector.broadcast %11 : vector<1x64xf32> to vector<8x64xf32>
    %20 = arith.addf %18, %19 : vector<8x64xf32>
    %21 = tpu.iota {dimensions = array<i32: 0>} : vector<8x8xi32>
    %22 = tpu.iota {dimensions = array<i32: 1>} : vector<8x8xi32>
    %23 = arith.subi %21, %22 : vector<8x8xi32>
    %c-4_i32 = arith.constant -4 : i32
    %c4_i32 = arith.constant 4 : i32
    %24 = vector.broadcast %c-4_i32 : i32 to vector<8x8xi32>
    %25 = arith.maxsi %24, %23 : vector<8x8xi32>
    %26 = vector.broadcast %c4_i32 : i32 to vector<8x8xi32>
    %27 = arith.minsi %26, %25 : vector<8x8xi32>
    %c4_i32_26 = arith.constant 4 : i32
    %28 = vector.broadcast %c4_i32_26 : i32 to vector<8x8xi32>
    %29 = arith.addi %27, %28 : vector<8x8xi32>
    %c0_i32 = arith.constant 0 : i32
    %30 = vector.broadcast %c0_i32 : i32 to vector<8x8xi32>
    %31 = arith.cmpi eq, %29, %30 : vector<8x8xi32>
    %c1_i32 = arith.constant 1 : i32
    %32 = vector.broadcast %c1_i32 : i32 to vector<8x8xi32>
    %33 = arith.cmpi eq, %29, %32 : vector<8x8xi32>
    %c2_i32 = arith.constant 2 : i32
    %34 = vector.broadcast %c2_i32 : i32 to vector<8x8xi32>
    %35 = arith.cmpi eq, %29, %34 : vector<8x8xi32>
    %c3_i32 = arith.constant 3 : i32
    %36 = vector.broadcast %c3_i32 : i32 to vector<8x8xi32>
    %37 = arith.cmpi eq, %29, %36 : vector<8x8xi32>
    %c4_i32_27 = arith.constant 4 : i32
    %38 = vector.broadcast %c4_i32_27 : i32 to vector<8x8xi32>
    %39 = arith.cmpi eq, %29, %38 : vector<8x8xi32>
    %c5_i32 = arith.constant 5 : i32
    %40 = vector.broadcast %c5_i32 : i32 to vector<8x8xi32>
    %41 = arith.cmpi eq, %29, %40 : vector<8x8xi32>
    %c6_i32 = arith.constant 6 : i32
    %42 = vector.broadcast %c6_i32 : i32 to vector<8x8xi32>
    %43 = arith.cmpi eq, %29, %42 : vector<8x8xi32>
    %c7_i32 = arith.constant 7 : i32
    %44 = vector.broadcast %c7_i32 : i32 to vector<8x8xi32>
    %45 = arith.cmpi eq, %29, %44 : vector<8x8xi32>
    %c8_i32 = arith.constant 8 : i32
    %46 = vector.broadcast %c8_i32 : i32 to vector<8x8xi32>
    %47 = arith.cmpi eq, %29, %46 : vector<8x8xi32>
    %cst_28 = arith.constant 0.000000e+00 : f32
    %48 = vector.broadcast %cst_28 : f32 to vector<8x8xf32>
    %49 = arith.cmpf oeq, %5, %48 : vector<8x8xf32>
    %cst_29 = arith.constant 0.000000e+00 : f32
    %50 = vector.broadcast %cst_29 : f32 to vector<8x32xf32>
    %51 = vector.extract_strided_slice %17 {offsets = [0, 0], sizes = [8, 8], strides = [1, 1]} : vector<8x32xf32> to vector<8x8xf32>
    %cst_30 = arith.constant 0.353553385 : f32
    %52 = vector.broadcast %cst_30 : f32 to vector<8x8xf32>
    %53 = arith.mulf %51, %52 : vector<8x8xf32>
    %54 = vector.extract_strided_slice %20 {offsets = [0, 0], sizes = [8, 8], strides = [1, 1]} : vector<8x64xf32> to vector<8x8xf32>
    %55 = vector.extract_strided_slice %20 {offsets = [0, 32], sizes = [8, 8], strides = [1, 1]} : vector<8x64xf32> to vector<8x8xf32>
    %cst_31 = arith.constant dense<0.000000e+00> : vector<8x8xf32>
    %56 = tpu.matmul %53, %54, %cst_31 {dimension_numbers = #tpu.dot_dimension_numbers<[1], [1], [0], [0], [0, 0, 1, 0], [], []>} : vector<8x8xf32>, vector<8x8xf32>, vector<8x8xf32> -> vector<8x8xf32>
    %cst_32 = arith.constant dense<0.000000e+00> : vector<8x9xf32>
    %57 = tpu.matmul %53, %14, %cst_32 {dimension_numbers = #tpu.dot_dimension_numbers<[1], [1], [0], [0], [0, 0, 1, 0], [], []>} : vector<8x8xf32>, vector<9x8xf32>, vector<8x9xf32> -> vector<8x9xf32>
    %cst_33 = arith.constant 0.000000e+00 : f32
    %58 = vector.broadcast %cst_33 : f32 to vector<8x8xf32>
    %59 = vector.extract_strided_slice %57 {offsets = [0, 0], sizes = [8, 1], strides = [1, 1]} : vector<8x9xf32> to vector<8x1xf32>
    %cst_34 = arith.constant 0.000000e+00 : f32
    %60 = vector.shape_cast %59 : vector<8x1xf32> to vector<8x1xf32>
    %61 = vector.broadcast %60 : vector<8x1xf32> to vector<8x8xf32>
    %62 = vector.broadcast %cst_34 : f32 to vector<8x8xf32>
    %63 = arith.select %31, %61, %62 : vector<8x8xi1>, vector<8x8xf32>
    %64 = arith.addf %58, %63 : vector<8x8xf32>
    %65 = vector.extract_strided_slice %57 {offsets = [0, 1], sizes = [8, 1], strides = [1, 1]} : vector<8x9xf32> to vector<8x1xf32>
    %cst_35 = arith.constant 0.000000e+00 : f32
    %66 = vector.shape_cast %65 : vector<8x1xf32> to vector<8x1xf32>
    %67 = vector.broadcast %66 : vector<8x1xf32> to vector<8x8xf32>
    %68 = vector.broadcast %cst_35 : f32 to vector<8x8xf32>
    %69 = arith.select %33, %67, %68 : vector<8x8xi1>, vector<8x8xf32>
    %70 = arith.addf %64, %69 : vector<8x8xf32>
    %71 = vector.extract_strided_slice %57 {offsets = [0, 2], sizes = [8, 1], strides = [1, 1]} : vector<8x9xf32> to vector<8x1xf32>
    %cst_36 = arith.constant 0.000000e+00 : f32
    %72 = vector.shape_cast %71 : vector<8x1xf32> to vector<8x1xf32>
    %73 = vector.broadcast %72 : vector<8x1xf32> to vector<8x8xf32>
    %74 = vector.broadcast %cst_36 : f32 to vector<8x8xf32>
    %75 = arith.select %35, %73, %74 : vector<8x8xi1>, vector<8x8xf32>
    %76 = arith.addf %70, %75 : vector<8x8xf32>
    %77 = vector.extract_strided_slice %57 {offsets = [0, 3], sizes = [8, 1], strides = [1, 1]} : vector<8x9xf32> to vector<8x1xf32>
    %cst_37 = arith.constant 0.000000e+00 : f32
    %78 = vector.shape_cast %77 : vector<8x1xf32> to vector<8x1xf32>
    %79 = vector.broadcast %78 : vector<8x1xf32> to vector<8x8xf32>
    %80 = vector.broadcast %cst_37 : f32 to vector<8x8xf32>
    %81 = arith.select %37, %79, %80 : vector<8x8xi1>, vector<8x8xf32>
    %82 = arith.addf %76, %81 : vector<8x8xf32>
    %83 = vector.extract_strided_slice %57 {offsets = [0, 4], sizes = [8, 1], strides = [1, 1]} : vector<8x9xf32> to vector<8x1xf32>
    %cst_38 = arith.constant 0.000000e+00 : f32
    %84 = vector.shape_cast %83 : vector<8x1xf32> to vector<8x1xf32>
    %85 = vector.broadcast %84 : vector<8x1xf32> to vector<8x8xf32>
    %86 = vector.broadcast %cst_38 : f32 to vector<8x8xf32>
    %87 = arith.select %39, %85, %86 : vector<8x8xi1>, vector<8x8xf32>
    %88 = arith.addf %82, %87 : vector<8x8xf32>
    %89 = vector.extract_strided_slice %57 {offsets = [0, 5], sizes = [8, 1], strides = [1, 1]} : vector<8x9xf32> to vector<8x1xf32>
    %cst_39 = arith.constant 0.000000e+00 : f32
    %90 = vector.shape_cast %89 : vector<8x1xf32> to vector<8x1xf32>
    %91 = vector.broadcast %90 : vector<8x1xf32> to vector<8x8xf32>
    %92 = vector.broadcast %cst_39 : f32 to vector<8x8xf32>
    %93 = arith.select %41, %91, %92 : vector<8x8xi1>, vector<8x8xf32>
    %94 = arith.addf %88, %93 : vector<8x8xf32>
    %95 = vector.extract_strided_slice %57 {offsets = [0, 6], sizes = [8, 1], strides = [1, 1]} : vector<8x9xf32> to vector<8x1xf32>
    %cst_40 = arith.constant 0.000000e+00 : f32
    %96 = vector.shape_cast %95 : vector<8x1xf32> to vector<8x1xf32>
    %97 = vector.broadcast %96 : vector<8x1xf32> to vector<8x8xf32>
    %98 = vector.broadcast %cst_40 : f32 to vector<8x8xf32>
    %99 = arith.select %43, %97, %98 : vector<8x8xi1>, vector<8x8xf32>
    %100 = arith.addf %94, %99 : vector<8x8xf32>
    %101 = vector.extract_strided_slice %57 {offsets = [0, 7], sizes = [8, 1], strides = [1, 1]} : vector<8x9xf32> to vector<8x1xf32>
    %cst_41 = arith.constant 0.000000e+00 : f32
    %102 = vector.shape_cast %101 : vector<8x1xf32> to vector<8x1xf32>
    %103 = vector.broadcast %102 : vector<8x1xf32> to vector<8x8xf32>
    %104 = vector.broadcast %cst_41 : f32 to vector<8x8xf32>
    %105 = arith.select %45, %103, %104 : vector<8x8xi1>, vector<8x8xf32>
    %106 = arith.addf %100, %105 : vector<8x8xf32>
    %107 = vector.extract_strided_slice %57 {offsets = [0, 8], sizes = [8, 1], strides = [1, 1]} : vector<8x9xf32> to vector<8x1xf32>
    %cst_42 = arith.constant 0.000000e+00 : f32
    %108 = vector.shape_cast %107 : vector<8x1xf32> to vector<8x1xf32>
    %109 = vector.broadcast %108 : vector<8x1xf32> to vector<8x8xf32>
    %110 = vector.broadcast %cst_42 : f32 to vector<8x8xf32>
    %111 = arith.select %47, %109, %110 : vector<8x8xi1>, vector<8x8xf32>
    %112 = arith.addf %106, %111 : vector<8x8xf32>
    %113 = arith.addf %56, %112 : vector<8x8xf32>
    %cst_43 = arith.constant -1.000000e+10 : f32
    %114 = vector.broadcast %cst_43 : f32 to vector<8x8xf32>
    %115 = arith.select %49, %114, %113 : vector<8x8xi1>, vector<8x8xf32>
    %cst_44 = arith.constant dense<0xFF800000> : vector<8xf32>
    %116 = vector.multi_reduction <maximumf>, %115, %cst_44 [1] : vector<8x8xf32> to vector<8xf32>
    %117 = vector.shape_cast %116 : vector<8xf32> to vector<8x1xf32>
    %118 = vector.broadcast %117 : vector<8x1xf32> to vector<8x8xf32>
    %119 = arith.subf %115, %118 : vector<8x8xf32>
    %120 = math.exp %119 : vector<8x8xf32>
    %cst_45 = arith.constant dense<0.000000e+00> : vector<8xf32>
    %121 = vector.multi_reduction <add>, %120, %cst_45 [1] : vector<8x8xf32> to vector<8xf32>
    %122 = vector.shape_cast %121 : vector<8xf32> to vector<8x1xf32>
    %123 = tpu.reciprocal %122 {approx = true} : vector<8x1xf32> -> vector<8x1xf32>
    %124 = vector.broadcast %123 : vector<8x1xf32> to vector<8x8xf32>
    %125 = arith.mulf %120, %124 : vector<8x8xf32>
    %cst_46 = arith.constant dense<0.000000e+00> : vector<8x8xf32>
    %126 = tpu.matmul %125, %55, %cst_46 {dimension_numbers = #tpu.dot_dimension_numbers<[1], [0], [0], [1], [0, 0, 1, 1], [], []>} : vector<8x8xf32>, vector<8x8xf32>, vector<8x8xf32> -> vector<8x8xf32>
    %cst_47 = arith.constant 0.000000e+00 : f32
    %127 = vector.broadcast %cst_47 : f32 to vector<8x8xf32>
    %cst_48 = arith.constant 0.000000e+00 : f32
    %128 = vector.broadcast %cst_48 : f32 to vector<8x8xf32>
    %129 = arith.select %31, %125, %128 : vector<8x8xi1>, vector<8x8xf32>
    %cst_49 = arith.constant dense<0.000000e+00> : vector<8xf32>
    %130 = vector.multi_reduction <add>, %129, %cst_49 [1] : vector<8x8xf32> to vector<8xf32>
    %131 = vector.shape_cast %130 : vector<8xf32> to vector<8x1xf32>
    %132 = vector.extract_strided_slice %14 {offsets = [0, 0], sizes = [1, 8], strides = [1, 1]} : vector<9x8xf32> to vector<1x8xf32>
    %133 = vector.broadcast %131 : vector<8x1xf32> to vector<8x8xf32>
    %134 = vector.broadcast %132 : vector<1x8xf32> to vector<8x8xf32>
    %135 = arith.mulf %133, %134 : vector<8x8xf32>
    %136 = arith.addf %127, %135 : vector<8x8xf32>
    %cst_50 = arith.constant 0.000000e+00 : f32
    %137 = vector.broadcast %cst_50 : f32 to vector<8x8xf32>
    %138 = arith.select %33, %125, %137 : vector<8x8xi1>, vector<8x8xf32>
    %cst_51 = arith.constant dense<0.000000e+00> : vector<8xf32>
    %139 = vector.multi_reduction <add>, %138, %cst_51 [1] : vector<8x8xf32> to vector<8xf32>
    %140 = vector.shape_cast %139 : vector<8xf32> to vector<8x1xf32>
    %141 = vector.extract_strided_slice %14 {offsets = [1, 0], sizes = [1, 8], strides = [1, 1]} : vector<9x8xf32> to vector<1x8xf32>
    %142 = vector.broadcast %140 : vector<8x1xf32> to vector<8x8xf32>
    %143 = vector.broadcast %141 : vector<1x8xf32> to vector<8x8xf32>
    %144 = arith.mulf %142, %143 : vector<8x8xf32>
    %145 = arith.addf %136, %144 : vector<8x8xf32>
    %cst_52 = arith.constant 0.000000e+00 : f32
    %146 = vector.broadcast %cst_52 : f32 to vector<8x8xf32>
    %147 = arith.select %35, %125, %146 : vector<8x8xi1>, vector<8x8xf32>
    %cst_53 = arith.constant dense<0.000000e+00> : vector<8xf32>
    %148 = vector.multi_reduction <add>, %147, %cst_53 [1] : vector<8x8xf32> to vector<8xf32>
    %149 = vector.shape_cast %148 : vector<8xf32> to vector<8x1xf32>
    %150 = vector.extract_strided_slice %14 {offsets = [2, 0], sizes = [1, 8], strides = [1, 1]} : vector<9x8xf32> to vector<1x8xf32>
    %151 = vector.broadcast %149 : vector<8x1xf32> to vector<8x8xf32>
    %152 = vector.broadcast %150 : vector<1x8xf32> to vector<8x8xf32>
    %153 = arith.mulf %151, %152 : vector<8x8xf32>
    %154 = arith.addf %145, %153 : vector<8x8xf32>
    %cst_54 = arith.constant 0.000000e+00 : f32
    %155 = vector.broadcast %cst_54 : f32 to vector<8x8xf32>
    %156 = arith.select %37, %125, %155 : vector<8x8xi1>, vector<8x8xf32>
    %cst_55 = arith.constant dense<0.000000e+00> : vector<8xf32>
    %157 = vector.multi_reduction <add>, %156, %cst_55 [1] : vector<8x8xf32> to vector<8xf32>
    %158 = vector.shape_cast %157 : vector<8xf32> to vector<8x1xf32>
    %159 = vector.extract_strided_slice %14 {offsets = [3, 0], sizes = [1, 8], strides = [1, 1]} : vector<9x8xf32> to vector<1x8xf32>
    %160 = vector.broadcast %158 : vector<8x1xf32> to vector<8x8xf32>
    %161 = vector.broadcast %159 : vector<1x8xf32> to vector<8x8xf32>
    %162 = arith.mulf %160, %161 : vector<8x8xf32>
    %163 = arith.addf %154, %162 : vector<8x8xf32>
    %cst_56 = arith.constant 0.000000e+00 : f32
    %164 = vector.broadcast %cst_56 : f32 to vector<8x8xf32>
    %165 = arith.select %39, %125, %164 : vector<8x8xi1>, vector<8x8xf32>
    %cst_57 = arith.constant dense<0.000000e+00> : vector<8xf32>
    %166 = vector.multi_reduction <add>, %165, %cst_57 [1] : vector<8x8xf32> to vector<8xf32>
    %167 = vector.shape_cast %166 : vector<8xf32> to vector<8x1xf32>
    %168 = vector.extract_strided_slice %14 {offsets = [4, 0], sizes = [1, 8], strides = [1, 1]} : vector<9x8xf32> to vector<1x8xf32>
    %169 = vector.broadcast %167 : vector<8x1xf32> to vector<8x8xf32>
    %170 = vector.broadcast %168 : vector<1x8xf32> to vector<8x8xf32>
    %171 = arith.mulf %169, %170 : vector<8x8xf32>
    %172 = arith.addf %163, %171 : vector<8x8xf32>
    %cst_58 = arith.constant 0.000000e+00 : f32
    %173 = vector.broadcast %cst_58 : f32 to vector<8x8xf32>
    %174 = arith.select %41, %125, %173 : vector<8x8xi1>, vector<8x8xf32>
    %cst_59 = arith.constant dense<0.000000e+00> : vector<8xf32>
    %175 = vector.multi_reduction <add>, %174, %cst_59 [1] : vector<8x8xf32> to vector<8xf32>
    %176 = vector.shape_cast %175 : vector<8xf32> to vector<8x1xf32>
    %177 = vector.extract_strided_slice %14 {offsets = [5, 0], sizes = [1, 8], strides = [1, 1]} : vector<9x8xf32> to vector<1x8xf32>
    %178 = vector.broadcast %176 : vector<8x1xf32> to vector<8x8xf32>
    %179 = vector.broadcast %177 : vector<1x8xf32> to vector<8x8xf32>
    %180 = arith.mulf %178, %179 : vector<8x8xf32>
    %181 = arith.addf %172, %180 : vector<8x8xf32>
    %cst_60 = arith.constant 0.000000e+00 : f32
    %182 = vector.broadcast %cst_60 : f32 to vector<8x8xf32>
    %183 = arith.select %43, %125, %182 : vector<8x8xi1>, vector<8x8xf32>
    %cst_61 = arith.constant dense<0.000000e+00> : vector<8xf32>
    %184 = vector.multi_reduction <add>, %183, %cst_61 [1] : vector<8x8xf32> to vector<8xf32>
    %185 = vector.shape_cast %184 : vector<8xf32> to vector<8x1xf32>
    %186 = vector.extract_strided_slice %14 {offsets = [6, 0], sizes = [1, 8], strides = [1, 1]} : vector<9x8xf32> to vector<1x8xf32>
    %187 = vector.broadcast %185 : vector<8x1xf32> to vector<8x8xf32>
    %188 = vector.broadcast %186 : vector<1x8xf32> to vector<8x8xf32>
    %189 = arith.mulf %187, %188 : vector<8x8xf32>
    %190 = arith.addf %181, %189 : vector<8x8xf32>
    %cst_62 = arith.constant 0.000000e+00 : f32
    %191 = vector.broadcast %cst_62 : f32 to vector<8x8xf32>
    %192 = arith.select %45, %125, %191 : vector<8x8xi1>, vector<8x8xf32>
    %cst_63 = arith.constant dense<0.000000e+00> : vector<8xf32>
    %193 = vector.multi_reduction <add>, %192, %cst_63 [1] : vector<8x8xf32> to vector<8xf32>
    %194 = vector.shape_cast %193 : vector<8xf32> to vector<8x1xf32>
    %195 = vector.extract_strided_slice %14 {offsets = [7, 0], sizes = [1, 8], strides = [1, 1]} : vector<9x8xf32> to vector<1x8xf32>
    %196 = vector.broadcast %194 : vector<8x1xf32> to vector<8x8xf32>
    %197 = vector.broadcast %195 : vector<1x8xf32> to vector<8x8xf32>
    %198 = arith.mulf %196, %197 : vector<8x8xf32>
    %199 = arith.addf %190, %198 : vector<8x8xf32>
    %cst_64 = arith.constant 0.000000e+00 : f32
    %200 = vector.broadcast %cst_64 : f32 to vector<8x8xf32>
    %201 = arith.select %47, %125, %200 : vector<8x8xi1>, vector<8x8xf32>
    %cst_65 = arith.constant dense<0.000000e+00> : vector<8xf32>
    %202 = vector.multi_reduction <add>, %201, %cst_65 [1] : vector<8x8xf32> to vector<8xf32>
    %203 = vector.shape_cast %202 : vector<8xf32> to vector<8x1xf32>
    %204 = vector.extract_strided_slice %14 {offsets = [8, 0], sizes = [1, 8], strides = [1, 1]} : vector<9x8xf32> to vector<1x8xf32>
    %205 = vector.broadcast %203 : vector<8x1xf32> to vector<8x8xf32>
    %206 = vector.broadcast %204 : vector<1x8xf32> to vector<8x8xf32>
    %207 = arith.mulf %205, %206 : vector<8x8xf32>
    %208 = arith.addf %199, %207 : vector<8x8xf32>
    %209 = arith.addf %126, %208 : vector<8x8xf32>
    %210 = vector.extract_strided_slice %12 {offsets = [0, 0], sizes = [8, 32], strides = [1, 1]} : vector<32x32xf32> to vector<8x32xf32>
    %cst_66 = arith.constant dense<0.000000e+00> : vector<8x32xf32>
    %211 = tpu.matmul %209, %210, %cst_66 {dimension_numbers = #tpu.dot_dimension_numbers<[1], [0], [0], [1], [0, 0, 1, 1], [], []>} : vector<8x8xf32>, vector<8x32xf32>, vector<8x32xf32> -> vector<8x32xf32>
    %212 = arith.addf %50, %211 : vector<8x32xf32>
    %213 = vector.extract_strided_slice %17 {offsets = [0, 8], sizes = [8, 8], strides = [1, 1]} : vector<8x32xf32> to vector<8x8xf32>
    %cst_67 = arith.constant 0.353553385 : f32
    %214 = vector.broadcast %cst_67 : f32 to vector<8x8xf32>
    %215 = arith.mulf %213, %214 : vector<8x8xf32>
    %216 = vector.extract_strided_slice %20 {offsets = [0, 8], sizes = [8, 8], strides = [1, 1]} : vector<8x64xf32> to vector<8x8xf32>
    %217 = vector.extract_strided_slice %20 {offsets = [0, 40], sizes = [8, 8], strides = [1, 1]} : vector<8x64xf32> to vector<8x8xf32>
    %cst_68 = arith.constant dense<0.000000e+00> : vector<8x8xf32>
    %218 = tpu.matmul %215, %216, %cst_68 {dimension_numbers = #tpu.dot_dimension_numbers<[1], [1], [0], [0], [0, 0, 1, 0], [], []>} : vector<8x8xf32>, vector<8x8xf32>, vector<8x8xf32> -> vector<8x8xf32>
    %cst_69 = arith.constant dense<0.000000e+00> : vector<8x9xf32>
    %219 = tpu.matmul %215, %14, %cst_69 {dimension_numbers = #tpu.dot_dimension_numbers<[1], [1], [0], [0], [0, 0, 1, 0], [], []>} : vector<8x8xf32>, vector<9x8xf32>, vector<8x9xf32> -> vector<8x9xf32>
    %cst_70 = arith.constant 0.000000e+00 : f32
    %220 = vector.broadcast %cst_70 : f32 to vector<8x8xf32>
    %221 = vector.extract_strided_slice %219 {offsets = [0, 0], sizes = [8, 1], strides = [1, 1]} : vector<8x9xf32> to vector<8x1xf32>
    %cst_71 = arith.constant 0.000000e+00 : f32
    %222 = vector.shape_cast %221 : vector<8x1xf32> to vector<8x1xf32>
    %223 = vector.broadcast %222 : vector<8x1xf32> to vector<8x8xf32>
    %224 = vector.broadcast %cst_71 : f32 to vector<8x8xf32>
    %225 = arith.select %31, %223, %224 : vector<8x8xi1>, vector<8x8xf32>
    %226 = arith.addf %220, %225 : vector<8x8xf32>
    %227 = vector.extract_strided_slice %219 {offsets = [0, 1], sizes = [8, 1], strides = [1, 1]} : vector<8x9xf32> to vector<8x1xf32>
    %cst_72 = arith.constant 0.000000e+00 : f32
    %228 = vector.shape_cast %227 : vector<8x1xf32> to vector<8x1xf32>
    %229 = vector.broadcast %228 : vector<8x1xf32> to vector<8x8xf32>
    %230 = vector.broadcast %cst_72 : f32 to vector<8x8xf32>
    %231 = arith.select %33, %229, %230 : vector<8x8xi1>, vector<8x8xf32>
    %232 = arith.addf %226, %231 : vector<8x8xf32>
    %233 = vector.extract_strided_slice %219 {offsets = [0, 2], sizes = [8, 1], strides = [1, 1]} : vector<8x9xf32> to vector<8x1xf32>
    %cst_73 = arith.constant 0.000000e+00 : f32
    %234 = vector.shape_cast %233 : vector<8x1xf32> to vector<8x1xf32>
    %235 = vector.broadcast %234 : vector<8x1xf32> to vector<8x8xf32>
    %236 = vector.broadcast %cst_73 : f32 to vector<8x8xf32>
    %237 = arith.select %35, %235, %236 : vector<8x8xi1>, vector<8x8xf32>
    %238 = arith.addf %232, %237 : vector<8x8xf32>
    %239 = vector.extract_strided_slice %219 {offsets = [0, 3], sizes = [8, 1], strides = [1, 1]} : vector<8x9xf32> to vector<8x1xf32>
    %cst_74 = arith.constant 0.000000e+00 : f32
    %240 = vector.shape_cast %239 : vector<8x1xf32> to vector<8x1xf32>
    %241 = vector.broadcast %240 : vector<8x1xf32> to vector<8x8xf32>
    %242 = vector.broadcast %cst_74 : f32 to vector<8x8xf32>
    %243 = arith.select %37, %241, %242 : vector<8x8xi1>, vector<8x8xf32>
    %244 = arith.addf %238, %243 : vector<8x8xf32>
    %245 = vector.extract_strided_slice %219 {offsets = [0, 4], sizes = [8, 1], strides = [1, 1]} : vector<8x9xf32> to vector<8x1xf32>
    %cst_75 = arith.constant 0.000000e+00 : f32
    %246 = vector.shape_cast %245 : vector<8x1xf32> to vector<8x1xf32>
    %247 = vector.broadcast %246 : vector<8x1xf32> to vector<8x8xf32>
    %248 = vector.broadcast %cst_75 : f32 to vector<8x8xf32>
    %249 = arith.select %39, %247, %248 : vector<8x8xi1>, vector<8x8xf32>
    %250 = arith.addf %244, %249 : vector<8x8xf32>
    %251 = vector.extract_strided_slice %219 {offsets = [0, 5], sizes = [8, 1], strides = [1, 1]} : vector<8x9xf32> to vector<8x1xf32>
    %cst_76 = arith.constant 0.000000e+00 : f32
    %252 = vector.shape_cast %251 : vector<8x1xf32> to vector<8x1xf32>
    %253 = vector.broadcast %252 : vector<8x1xf32> to vector<8x8xf32>
    %254 = vector.broadcast %cst_76 : f32 to vector<8x8xf32>
    %255 = arith.select %41, %253, %254 : vector<8x8xi1>, vector<8x8xf32>
    %256 = arith.addf %250, %255 : vector<8x8xf32>
    %257 = vector.extract_strided_slice %219 {offsets = [0, 6], sizes = [8, 1], strides = [1, 1]} : vector<8x9xf32> to vector<8x1xf32>
    %cst_77 = arith.constant 0.000000e+00 : f32
    %258 = vector.shape_cast %257 : vector<8x1xf32> to vector<8x1xf32>
    %259 = vector.broadcast %258 : vector<8x1xf32> to vector<8x8xf32>
    %260 = vector.broadcast %cst_77 : f32 to vector<8x8xf32>
    %261 = arith.select %43, %259, %260 : vector<8x8xi1>, vector<8x8xf32>
    %262 = arith.addf %256, %261 : vector<8x8xf32>
    %263 = vector.extract_strided_slice %219 {offsets = [0, 7], sizes = [8, 1], strides = [1, 1]} : vector<8x9xf32> to vector<8x1xf32>
    %cst_78 = arith.constant 0.000000e+00 : f32
    %264 = vector.shape_cast %263 : vector<8x1xf32> to vector<8x1xf32>
    %265 = vector.broadcast %264 : vector<8x1xf32> to vector<8x8xf32>
    %266 = vector.broadcast %cst_78 : f32 to vector<8x8xf32>
    %267 = arith.select %45, %265, %266 : vector<8x8xi1>, vector<8x8xf32>
    %268 = arith.addf %262, %267 : vector<8x8xf32>
    %269 = vector.extract_strided_slice %219 {offsets = [0, 8], sizes = [8, 1], strides = [1, 1]} : vector<8x9xf32> to vector<8x1xf32>
    %cst_79 = arith.constant 0.000000e+00 : f32
    %270 = vector.shape_cast %269 : vector<8x1xf32> to vector<8x1xf32>
    %271 = vector.broadcast %270 : vector<8x1xf32> to vector<8x8xf32>
    %272 = vector.broadcast %cst_79 : f32 to vector<8x8xf32>
    %273 = arith.select %47, %271, %272 : vector<8x8xi1>, vector<8x8xf32>
    %274 = arith.addf %268, %273 : vector<8x8xf32>
    %275 = arith.addf %218, %274 : vector<8x8xf32>
    %cst_80 = arith.constant -1.000000e+10 : f32
    %276 = vector.broadcast %cst_80 : f32 to vector<8x8xf32>
    %277 = arith.select %49, %276, %275 : vector<8x8xi1>, vector<8x8xf32>
    %cst_81 = arith.constant dense<0xFF800000> : vector<8xf32>
    %278 = vector.multi_reduction <maximumf>, %277, %cst_81 [1] : vector<8x8xf32> to vector<8xf32>
    %279 = vector.shape_cast %278 : vector<8xf32> to vector<8x1xf32>
    %280 = vector.broadcast %279 : vector<8x1xf32> to vector<8x8xf32>
    %281 = arith.subf %277, %280 : vector<8x8xf32>
    %282 = math.exp %281 : vector<8x8xf32>
    %cst_82 = arith.constant dense<0.000000e+00> : vector<8xf32>
    %283 = vector.multi_reduction <add>, %282, %cst_82 [1] : vector<8x8xf32> to vector<8xf32>
    %284 = vector.shape_cast %283 : vector<8xf32> to vector<8x1xf32>
    %285 = tpu.reciprocal %284 {approx = true} : vector<8x1xf32> -> vector<8x1xf32>
    %286 = vector.broadcast %285 : vector<8x1xf32> to vector<8x8xf32>
    %287 = arith.mulf %282, %286 : vector<8x8xf32>
    %cst_83 = arith.constant dense<0.000000e+00> : vector<8x8xf32>
    %288 = tpu.matmul %287, %217, %cst_83 {dimension_numbers = #tpu.dot_dimension_numbers<[1], [0], [0], [1], [0, 0, 1, 1], [], []>} : vector<8x8xf32>, vector<8x8xf32>, vector<8x8xf32> -> vector<8x8xf32>
    %cst_84 = arith.constant 0.000000e+00 : f32
    %289 = vector.broadcast %cst_84 : f32 to vector<8x8xf32>
    %cst_85 = arith.constant 0.000000e+00 : f32
    %290 = vector.broadcast %cst_85 : f32 to vector<8x8xf32>
    %291 = arith.select %31, %287, %290 : vector<8x8xi1>, vector<8x8xf32>
    %cst_86 = arith.constant dense<0.000000e+00> : vector<8xf32>
    %292 = vector.multi_reduction <add>, %291, %cst_86 [1] : vector<8x8xf32> to vector<8xf32>
    %293 = vector.shape_cast %292 : vector<8xf32> to vector<8x1xf32>
    %294 = vector.extract_strided_slice %14 {offsets = [0, 0], sizes = [1, 8], strides = [1, 1]} : vector<9x8xf32> to vector<1x8xf32>
    %295 = vector.broadcast %293 : vector<8x1xf32> to vector<8x8xf32>
    %296 = vector.broadcast %294 : vector<1x8xf32> to vector<8x8xf32>
    %297 = arith.mulf %295, %296 : vector<8x8xf32>
    %298 = arith.addf %289, %297 : vector<8x8xf32>
    %cst_87 = arith.constant 0.000000e+00 : f32
    %299 = vector.broadcast %cst_87 : f32 to vector<8x8xf32>
    %300 = arith.select %33, %287, %299 : vector<8x8xi1>, vector<8x8xf32>
    %cst_88 = arith.constant dense<0.000000e+00> : vector<8xf32>
    %301 = vector.multi_reduction <add>, %300, %cst_88 [1] : vector<8x8xf32> to vector<8xf32>
    %302 = vector.shape_cast %301 : vector<8xf32> to vector<8x1xf32>
    %303 = vector.extract_strided_slice %14 {offsets = [1, 0], sizes = [1, 8], strides = [1, 1]} : vector<9x8xf32> to vector<1x8xf32>
    %304 = vector.broadcast %302 : vector<8x1xf32> to vector<8x8xf32>
    %305 = vector.broadcast %303 : vector<1x8xf32> to vector<8x8xf32>
    %306 = arith.mulf %304, %305 : vector<8x8xf32>
    %307 = arith.addf %298, %306 : vector<8x8xf32>
    %cst_89 = arith.constant 0.000000e+00 : f32
    %308 = vector.broadcast %cst_89 : f32 to vector<8x8xf32>
    %309 = arith.select %35, %287, %308 : vector<8x8xi1>, vector<8x8xf32>
    %cst_90 = arith.constant dense<0.000000e+00> : vector<8xf32>
    %310 = vector.multi_reduction <add>, %309, %cst_90 [1] : vector<8x8xf32> to vector<8xf32>
    %311 = vector.shape_cast %310 : vector<8xf32> to vector<8x1xf32>
    %312 = vector.extract_strided_slice %14 {offsets = [2, 0], sizes = [1, 8], strides = [1, 1]} : vector<9x8xf32> to vector<1x8xf32>
    %313 = vector.broadcast %311 : vector<8x1xf32> to vector<8x8xf32>
    %314 = vector.broadcast %312 : vector<1x8xf32> to vector<8x8xf32>
    %315 = arith.mulf %313, %314 : vector<8x8xf32>
    %316 = arith.addf %307, %315 : vector<8x8xf32>
    %cst_91 = arith.constant 0.000000e+00 : f32
    %317 = vector.broadcast %cst_91 : f32 to vector<8x8xf32>
    %318 = arith.select %37, %287, %317 : vector<8x8xi1>, vector<8x8xf32>
    %cst_92 = arith.constant dense<0.000000e+00> : vector<8xf32>
    %319 = vector.multi_reduction <add>, %318, %cst_92 [1] : vector<8x8xf32> to vector<8xf32>
    %320 = vector.shape_cast %319 : vector<8xf32> to vector<8x1xf32>
    %321 = vector.extract_strided_slice %14 {offsets = [3, 0], sizes = [1, 8], strides = [1, 1]} : vector<9x8xf32> to vector<1x8xf32>
    %322 = vector.broadcast %320 : vector<8x1xf32> to vector<8x8xf32>
    %323 = vector.broadcast %321 : vector<1x8xf32> to vector<8x8xf32>
    %324 = arith.mulf %322, %323 : vector<8x8xf32>
    %325 = arith.addf %316, %324 : vector<8x8xf32>
    %cst_93 = arith.constant 0.000000e+00 : f32
    %326 = vector.broadcast %cst_93 : f32 to vector<8x8xf32>
    %327 = arith.select %39, %287, %326 : vector<8x8xi1>, vector<8x8xf32>
    %cst_94 = arith.constant dense<0.000000e+00> : vector<8xf32>
    %328 = vector.multi_reduction <add>, %327, %cst_94 [1] : vector<8x8xf32> to vector<8xf32>
    %329 = vector.shape_cast %328 : vector<8xf32> to vector<8x1xf32>
    %330 = vector.extract_strided_slice %14 {offsets = [4, 0], sizes = [1, 8], strides = [1, 1]} : vector<9x8xf32> to vector<1x8xf32>
    %331 = vector.broadcast %329 : vector<8x1xf32> to vector<8x8xf32>
    %332 = vector.broadcast %330 : vector<1x8xf32> to vector<8x8xf32>
    %333 = arith.mulf %331, %332 : vector<8x8xf32>
    %334 = arith.addf %325, %333 : vector<8x8xf32>
    %cst_95 = arith.constant 0.000000e+00 : f32
    %335 = vector.broadcast %cst_95 : f32 to vector<8x8xf32>
    %336 = arith.select %41, %287, %335 : vector<8x8xi1>, vector<8x8xf32>
    %cst_96 = arith.constant dense<0.000000e+00> : vector<8xf32>
    %337 = vector.multi_reduction <add>, %336, %cst_96 [1] : vector<8x8xf32> to vector<8xf32>
    %338 = vector.shape_cast %337 : vector<8xf32> to vector<8x1xf32>
    %339 = vector.extract_strided_slice %14 {offsets = [5, 0], sizes = [1, 8], strides = [1, 1]} : vector<9x8xf32> to vector<1x8xf32>
    %340 = vector.broadcast %338 : vector<8x1xf32> to vector<8x8xf32>
    %341 = vector.broadcast %339 : vector<1x8xf32> to vector<8x8xf32>
    %342 = arith.mulf %340, %341 : vector<8x8xf32>
    %343 = arith.addf %334, %342 : vector<8x8xf32>
    %cst_97 = arith.constant 0.000000e+00 : f32
    %344 = vector.broadcast %cst_97 : f32 to vector<8x8xf32>
    %345 = arith.select %43, %287, %344 : vector<8x8xi1>, vector<8x8xf32>
    %cst_98 = arith.constant dense<0.000000e+00> : vector<8xf32>
    %346 = vector.multi_reduction <add>, %345, %cst_98 [1] : vector<8x8xf32> to vector<8xf32>
    %347 = vector.shape_cast %346 : vector<8xf32> to vector<8x1xf32>
    %348 = vector.extract_strided_slice %14 {offsets = [6, 0], sizes = [1, 8], strides = [1, 1]} : vector<9x8xf32> to vector<1x8xf32>
    %349 = vector.broadcast %347 : vector<8x1xf32> to vector<8x8xf32>
    %350 = vector.broadcast %348 : vector<1x8xf32> to vector<8x8xf32>
    %351 = arith.mulf %349, %350 : vector<8x8xf32>
    %352 = arith.addf %343, %351 : vector<8x8xf32>
    %cst_99 = arith.constant 0.000000e+00 : f32
    %353 = vector.broadcast %cst_99 : f32 to vector<8x8xf32>
    %354 = arith.select %45, %287, %353 : vector<8x8xi1>, vector<8x8xf32>
    %cst_100 = arith.constant dense<0.000000e+00> : vector<8xf32>
    %355 = vector.multi_reduction <add>, %354, %cst_100 [1] : vector<8x8xf32> to vector<8xf32>
    %356 = vector.shape_cast %355 : vector<8xf32> to vector<8x1xf32>
    %357 = vector.extract_strided_slice %14 {offsets = [7, 0], sizes = [1, 8], strides = [1, 1]} : vector<9x8xf32> to vector<1x8xf32>
    %358 = vector.broadcast %356 : vector<8x1xf32> to vector<8x8xf32>
    %359 = vector.broadcast %357 : vector<1x8xf32> to vector<8x8xf32>
    %360 = arith.mulf %358, %359 : vector<8x8xf32>
    %361 = arith.addf %352, %360 : vector<8x8xf32>
    %cst_101 = arith.constant 0.000000e+00 : f32
    %362 = vector.broadcast %cst_101 : f32 to vector<8x8xf32>
    %363 = arith.select %47, %287, %362 : vector<8x8xi1>, vector<8x8xf32>
    %cst_102 = arith.constant dense<0.000000e+00> : vector<8xf32>
    %364 = vector.multi_reduction <add>, %363, %cst_102 [1] : vector<8x8xf32> to vector<8xf32>
    %365 = vector.shape_cast %364 : vector<8xf32> to vector<8x1xf32>
    %366 = vector.extract_strided_slice %14 {offsets = [8, 0], sizes = [1, 8], strides = [1, 1]} : vector<9x8xf32> to vector<1x8xf32>
    %367 = vector.broadcast %365 : vector<8x1xf32> to vector<8x8xf32>
    %368 = vector.broadcast %366 : vector<1x8xf32> to vector<8x8xf32>
    %369 = arith.mulf %367, %368 : vector<8x8xf32>
    %370 = arith.addf %361, %369 : vector<8x8xf32>
    %371 = arith.addf %288, %370 : vector<8x8xf32>
    %372 = vector.extract_strided_slice %12 {offsets = [8, 0], sizes = [8, 32], strides = [1, 1]} : vector<32x32xf32> to vector<8x32xf32>
    %cst_103 = arith.constant dense<0.000000e+00> : vector<8x32xf32>
    %373 = tpu.matmul %371, %372, %cst_103 {dimension_numbers = #tpu.dot_dimension_numbers<[1], [0], [0], [1], [0, 0, 1, 1], [], []>} : vector<8x8xf32>, vector<8x32xf32>, vector<8x32xf32> -> vector<8x32xf32>
    %374 = arith.addf %212, %373 : vector<8x32xf32>
    %375 = vector.extract_strided_slice %17 {offsets = [0, 16], sizes = [8, 8], strides = [1, 1]} : vector<8x32xf32> to vector<8x8xf32>
    %cst_104 = arith.constant 0.353553385 : f32
    %376 = vector.broadcast %cst_104 : f32 to vector<8x8xf32>
    %377 = arith.mulf %375, %376 : vector<8x8xf32>
    %378 = vector.extract_strided_slice %20 {offsets = [0, 16], sizes = [8, 8], strides = [1, 1]} : vector<8x64xf32> to vector<8x8xf32>
    %379 = vector.extract_strided_slice %20 {offsets = [0, 48], sizes = [8, 8], strides = [1, 1]} : vector<8x64xf32> to vector<8x8xf32>
    %cst_105 = arith.constant dense<0.000000e+00> : vector<8x8xf32>
    %380 = tpu.matmul %377, %378, %cst_105 {dimension_numbers = #tpu.dot_dimension_numbers<[1], [1], [0], [0], [0, 0, 1, 0], [], []>} : vector<8x8xf32>, vector<8x8xf32>, vector<8x8xf32> -> vector<8x8xf32>
    %cst_106 = arith.constant dense<0.000000e+00> : vector<8x9xf32>
    %381 = tpu.matmul %377, %14, %cst_106 {dimension_numbers = #tpu.dot_dimension_numbers<[1], [1], [0], [0], [0, 0, 1, 0], [], []>} : vector<8x8xf32>, vector<9x8xf32>, vector<8x9xf32> -> vector<8x9xf32>
    %cst_107 = arith.constant 0.000000e+00 : f32
    %382 = vector.broadcast %cst_107 : f32 to vector<8x8xf32>
    %383 = vector.extract_strided_slice %381 {offsets = [0, 0], sizes = [8, 1], strides = [1, 1]} : vector<8x9xf32> to vector<8x1xf32>
    %cst_108 = arith.constant 0.000000e+00 : f32
    %384 = vector.shape_cast %383 : vector<8x1xf32> to vector<8x1xf32>
    %385 = vector.broadcast %384 : vector<8x1xf32> to vector<8x8xf32>
    %386 = vector.broadcast %cst_108 : f32 to vector<8x8xf32>
    %387 = arith.select %31, %385, %386 : vector<8x8xi1>, vector<8x8xf32>
    %388 = arith.addf %382, %387 : vector<8x8xf32>
    %389 = vector.extract_strided_slice %381 {offsets = [0, 1], sizes = [8, 1], strides = [1, 1]} : vector<8x9xf32> to vector<8x1xf32>
    %cst_109 = arith.constant 0.000000e+00 : f32
    %390 = vector.shape_cast %389 : vector<8x1xf32> to vector<8x1xf32>
    %391 = vector.broadcast %390 : vector<8x1xf32> to vector<8x8xf32>
    %392 = vector.broadcast %cst_109 : f32 to vector<8x8xf32>
    %393 = arith.select %33, %391, %392 : vector<8x8xi1>, vector<8x8xf32>
    %394 = arith.addf %388, %393 : vector<8x8xf32>
    %395 = vector.extract_strided_slice %381 {offsets = [0, 2], sizes = [8, 1], strides = [1, 1]} : vector<8x9xf32> to vector<8x1xf32>
    %cst_110 = arith.constant 0.000000e+00 : f32
    %396 = vector.shape_cast %395 : vector<8x1xf32> to vector<8x1xf32>
    %397 = vector.broadcast %396 : vector<8x1xf32> to vector<8x8xf32>
    %398 = vector.broadcast %cst_110 : f32 to vector<8x8xf32>
    %399 = arith.select %35, %397, %398 : vector<8x8xi1>, vector<8x8xf32>
    %400 = arith.addf %394, %399 : vector<8x8xf32>
    %401 = vector.extract_strided_slice %381 {offsets = [0, 3], sizes = [8, 1], strides = [1, 1]} : vector<8x9xf32> to vector<8x1xf32>
    %cst_111 = arith.constant 0.000000e+00 : f32
    %402 = vector.shape_cast %401 : vector<8x1xf32> to vector<8x1xf32>
    %403 = vector.broadcast %402 : vector<8x1xf32> to vector<8x8xf32>
    %404 = vector.broadcast %cst_111 : f32 to vector<8x8xf32>
    %405 = arith.select %37, %403, %404 : vector<8x8xi1>, vector<8x8xf32>
    %406 = arith.addf %400, %405 : vector<8x8xf32>
    %407 = vector.extract_strided_slice %381 {offsets = [0, 4], sizes = [8, 1], strides = [1, 1]} : vector<8x9xf32> to vector<8x1xf32>
    %cst_112 = arith.constant 0.000000e+00 : f32
    %408 = vector.shape_cast %407 : vector<8x1xf32> to vector<8x1xf32>
    %409 = vector.broadcast %408 : vector<8x1xf32> to vector<8x8xf32>
    %410 = vector.broadcast %cst_112 : f32 to vector<8x8xf32>
    %411 = arith.select %39, %409, %410 : vector<8x8xi1>, vector<8x8xf32>
    %412 = arith.addf %406, %411 : vector<8x8xf32>
    %413 = vector.extract_strided_slice %381 {offsets = [0, 5], sizes = [8, 1], strides = [1, 1]} : vector<8x9xf32> to vector<8x1xf32>
    %cst_113 = arith.constant 0.000000e+00 : f32
    %414 = vector.shape_cast %413 : vector<8x1xf32> to vector<8x1xf32>
    %415 = vector.broadcast %414 : vector<8x1xf32> to vector<8x8xf32>
    %416 = vector.broadcast %cst_113 : f32 to vector<8x8xf32>
    %417 = arith.select %41, %415, %416 : vector<8x8xi1>, vector<8x8xf32>
    %418 = arith.addf %412, %417 : vector<8x8xf32>
    %419 = vector.extract_strided_slice %381 {offsets = [0, 6], sizes = [8, 1], strides = [1, 1]} : vector<8x9xf32> to vector<8x1xf32>
    %cst_114 = arith.constant 0.000000e+00 : f32
    %420 = vector.shape_cast %419 : vector<8x1xf32> to vector<8x1xf32>
    %421 = vector.broadcast %420 : vector<8x1xf32> to vector<8x8xf32>
    %422 = vector.broadcast %cst_114 : f32 to vector<8x8xf32>
    %423 = arith.select %43, %421, %422 : vector<8x8xi1>, vector<8x8xf32>
    %424 = arith.addf %418, %423 : vector<8x8xf32>
    %425 = vector.extract_strided_slice %381 {offsets = [0, 7], sizes = [8, 1], strides = [1, 1]} : vector<8x9xf32> to vector<8x1xf32>
    %cst_115 = arith.constant 0.000000e+00 : f32
    %426 = vector.shape_cast %425 : vector<8x1xf32> to vector<8x1xf32>
    %427 = vector.broadcast %426 : vector<8x1xf32> to vector<8x8xf32>
    %428 = vector.broadcast %cst_115 : f32 to vector<8x8xf32>
    %429 = arith.select %45, %427, %428 : vector<8x8xi1>, vector<8x8xf32>
    %430 = arith.addf %424, %429 : vector<8x8xf32>
    %431 = vector.extract_strided_slice %381 {offsets = [0, 8], sizes = [8, 1], strides = [1, 1]} : vector<8x9xf32> to vector<8x1xf32>
    %cst_116 = arith.constant 0.000000e+00 : f32
    %432 = vector.shape_cast %431 : vector<8x1xf32> to vector<8x1xf32>
    %433 = vector.broadcast %432 : vector<8x1xf32> to vector<8x8xf32>
    %434 = vector.broadcast %cst_116 : f32 to vector<8x8xf32>
    %435 = arith.select %47, %433, %434 : vector<8x8xi1>, vector<8x8xf32>
    %436 = arith.addf %430, %435 : vector<8x8xf32>
    %437 = arith.addf %380, %436 : vector<8x8xf32>
    %cst_117 = arith.constant -1.000000e+10 : f32
    %438 = vector.broadcast %cst_117 : f32 to vector<8x8xf32>
    %439 = arith.select %49, %438, %437 : vector<8x8xi1>, vector<8x8xf32>
    %cst_118 = arith.constant dense<0xFF800000> : vector<8xf32>
    %440 = vector.multi_reduction <maximumf>, %439, %cst_118 [1] : vector<8x8xf32> to vector<8xf32>
    %441 = vector.shape_cast %440 : vector<8xf32> to vector<8x1xf32>
    %442 = vector.broadcast %441 : vector<8x1xf32> to vector<8x8xf32>
    %443 = arith.subf %439, %442 : vector<8x8xf32>
    %444 = math.exp %443 : vector<8x8xf32>
    %cst_119 = arith.constant dense<0.000000e+00> : vector<8xf32>
    %445 = vector.multi_reduction <add>, %444, %cst_119 [1] : vector<8x8xf32> to vector<8xf32>
    %446 = vector.shape_cast %445 : vector<8xf32> to vector<8x1xf32>
    %447 = tpu.reciprocal %446 {approx = true} : vector<8x1xf32> -> vector<8x1xf32>
    %448 = vector.broadcast %447 : vector<8x1xf32> to vector<8x8xf32>
    %449 = arith.mulf %444, %448 : vector<8x8xf32>
    %cst_120 = arith.constant dense<0.000000e+00> : vector<8x8xf32>
    %450 = tpu.matmul %449, %379, %cst_120 {dimension_numbers = #tpu.dot_dimension_numbers<[1], [0], [0], [1], [0, 0, 1, 1], [], []>} : vector<8x8xf32>, vector<8x8xf32>, vector<8x8xf32> -> vector<8x8xf32>
    %cst_121 = arith.constant 0.000000e+00 : f32
    %451 = vector.broadcast %cst_121 : f32 to vector<8x8xf32>
    %cst_122 = arith.constant 0.000000e+00 : f32
    %452 = vector.broadcast %cst_122 : f32 to vector<8x8xf32>
    %453 = arith.select %31, %449, %452 : vector<8x8xi1>, vector<8x8xf32>
    %cst_123 = arith.constant dense<0.000000e+00> : vector<8xf32>
    %454 = vector.multi_reduction <add>, %453, %cst_123 [1] : vector<8x8xf32> to vector<8xf32>
    %455 = vector.shape_cast %454 : vector<8xf32> to vector<8x1xf32>
    %456 = vector.extract_strided_slice %14 {offsets = [0, 0], sizes = [1, 8], strides = [1, 1]} : vector<9x8xf32> to vector<1x8xf32>
    %457 = vector.broadcast %455 : vector<8x1xf32> to vector<8x8xf32>
    %458 = vector.broadcast %456 : vector<1x8xf32> to vector<8x8xf32>
    %459 = arith.mulf %457, %458 : vector<8x8xf32>
    %460 = arith.addf %451, %459 : vector<8x8xf32>
    %cst_124 = arith.constant 0.000000e+00 : f32
    %461 = vector.broadcast %cst_124 : f32 to vector<8x8xf32>
    %462 = arith.select %33, %449, %461 : vector<8x8xi1>, vector<8x8xf32>
    %cst_125 = arith.constant dense<0.000000e+00> : vector<8xf32>
    %463 = vector.multi_reduction <add>, %462, %cst_125 [1] : vector<8x8xf32> to vector<8xf32>
    %464 = vector.shape_cast %463 : vector<8xf32> to vector<8x1xf32>
    %465 = vector.extract_strided_slice %14 {offsets = [1, 0], sizes = [1, 8], strides = [1, 1]} : vector<9x8xf32> to vector<1x8xf32>
    %466 = vector.broadcast %464 : vector<8x1xf32> to vector<8x8xf32>
    %467 = vector.broadcast %465 : vector<1x8xf32> to vector<8x8xf32>
    %468 = arith.mulf %466, %467 : vector<8x8xf32>
    %469 = arith.addf %460, %468 : vector<8x8xf32>
    %cst_126 = arith.constant 0.000000e+00 : f32
    %470 = vector.broadcast %cst_126 : f32 to vector<8x8xf32>
    %471 = arith.select %35, %449, %470 : vector<8x8xi1>, vector<8x8xf32>
    %cst_127 = arith.constant dense<0.000000e+00> : vector<8xf32>
    %472 = vector.multi_reduction <add>, %471, %cst_127 [1] : vector<8x8xf32> to vector<8xf32>
    %473 = vector.shape_cast %472 : vector<8xf32> to vector<8x1xf32>
    %474 = vector.extract_strided_slice %14 {offsets = [2, 0], sizes = [1, 8], strides = [1, 1]} : vector<9x8xf32> to vector<1x8xf32>
    %475 = vector.broadcast %473 : vector<8x1xf32> to vector<8x8xf32>
    %476 = vector.broadcast %474 : vector<1x8xf32> to vector<8x8xf32>
    %477 = arith.mulf %475, %476 : vector<8x8xf32>
    %478 = arith.addf %469, %477 : vector<8x8xf32>
    %cst_128 = arith.constant 0.000000e+00 : f32
    %479 = vector.broadcast %cst_128 : f32 to vector<8x8xf32>
    %480 = arith.select %37, %449, %479 : vector<8x8xi1>, vector<8x8xf32>
    %cst_129 = arith.constant dense<0.000000e+00> : vector<8xf32>
    %481 = vector.multi_reduction <add>, %480, %cst_129 [1] : vector<8x8xf32> to vector<8xf32>
    %482 = vector.shape_cast %481 : vector<8xf32> to vector<8x1xf32>
    %483 = vector.extract_strided_slice %14 {offsets = [3, 0], sizes = [1, 8], strides = [1, 1]} : vector<9x8xf32> to vector<1x8xf32>
    %484 = vector.broadcast %482 : vector<8x1xf32> to vector<8x8xf32>
    %485 = vector.broadcast %483 : vector<1x8xf32> to vector<8x8xf32>
    %486 = arith.mulf %484, %485 : vector<8x8xf32>
    %487 = arith.addf %478, %486 : vector<8x8xf32>
    %cst_130 = arith.constant 0.000000e+00 : f32
    %488 = vector.broadcast %cst_130 : f32 to vector<8x8xf32>
    %489 = arith.select %39, %449, %488 : vector<8x8xi1>, vector<8x8xf32>
    %cst_131 = arith.constant dense<0.000000e+00> : vector<8xf32>
    %490 = vector.multi_reduction <add>, %489, %cst_131 [1] : vector<8x8xf32> to vector<8xf32>
    %491 = vector.shape_cast %490 : vector<8xf32> to vector<8x1xf32>
    %492 = vector.extract_strided_slice %14 {offsets = [4, 0], sizes = [1, 8], strides = [1, 1]} : vector<9x8xf32> to vector<1x8xf32>
    %493 = vector.broadcast %491 : vector<8x1xf32> to vector<8x8xf32>
    %494 = vector.broadcast %492 : vector<1x8xf32> to vector<8x8xf32>
    %495 = arith.mulf %493, %494 : vector<8x8xf32>
    %496 = arith.addf %487, %495 : vector<8x8xf32>
    %cst_132 = arith.constant 0.000000e+00 : f32
    %497 = vector.broadcast %cst_132 : f32 to vector<8x8xf32>
    %498 = arith.select %41, %449, %497 : vector<8x8xi1>, vector<8x8xf32>
    %cst_133 = arith.constant dense<0.000000e+00> : vector<8xf32>
    %499 = vector.multi_reduction <add>, %498, %cst_133 [1] : vector<8x8xf32> to vector<8xf32>
    %500 = vector.shape_cast %499 : vector<8xf32> to vector<8x1xf32>
    %501 = vector.extract_strided_slice %14 {offsets = [5, 0], sizes = [1, 8], strides = [1, 1]} : vector<9x8xf32> to vector<1x8xf32>
    %502 = vector.broadcast %500 : vector<8x1xf32> to vector<8x8xf32>
    %503 = vector.broadcast %501 : vector<1x8xf32> to vector<8x8xf32>
    %504 = arith.mulf %502, %503 : vector<8x8xf32>
    %505 = arith.addf %496, %504 : vector<8x8xf32>
    %cst_134 = arith.constant 0.000000e+00 : f32
    %506 = vector.broadcast %cst_134 : f32 to vector<8x8xf32>
    %507 = arith.select %43, %449, %506 : vector<8x8xi1>, vector<8x8xf32>
    %cst_135 = arith.constant dense<0.000000e+00> : vector<8xf32>
    %508 = vector.multi_reduction <add>, %507, %cst_135 [1] : vector<8x8xf32> to vector<8xf32>
    %509 = vector.shape_cast %508 : vector<8xf32> to vector<8x1xf32>
    %510 = vector.extract_strided_slice %14 {offsets = [6, 0], sizes = [1, 8], strides = [1, 1]} : vector<9x8xf32> to vector<1x8xf32>
    %511 = vector.broadcast %509 : vector<8x1xf32> to vector<8x8xf32>
    %512 = vector.broadcast %510 : vector<1x8xf32> to vector<8x8xf32>
    %513 = arith.mulf %511, %512 : vector<8x8xf32>
    %514 = arith.addf %505, %513 : vector<8x8xf32>
    %cst_136 = arith.constant 0.000000e+00 : f32
    %515 = vector.broadcast %cst_136 : f32 to vector<8x8xf32>
    %516 = arith.select %45, %449, %515 : vector<8x8xi1>, vector<8x8xf32>
    %cst_137 = arith.constant dense<0.000000e+00> : vector<8xf32>
    %517 = vector.multi_reduction <add>, %516, %cst_137 [1] : vector<8x8xf32> to vector<8xf32>
    %518 = vector.shape_cast %517 : vector<8xf32> to vector<8x1xf32>
    %519 = vector.extract_strided_slice %14 {offsets = [7, 0], sizes = [1, 8], strides = [1, 1]} : vector<9x8xf32> to vector<1x8xf32>
    %520 = vector.broadcast %518 : vector<8x1xf32> to vector<8x8xf32>
    %521 = vector.broadcast %519 : vector<1x8xf32> to vector<8x8xf32>
    %522 = arith.mulf %520, %521 : vector<8x8xf32>
    %523 = arith.addf %514, %522 : vector<8x8xf32>
    %cst_138 = arith.constant 0.000000e+00 : f32
    %524 = vector.broadcast %cst_138 : f32 to vector<8x8xf32>
    %525 = arith.select %47, %449, %524 : vector<8x8xi1>, vector<8x8xf32>
    %cst_139 = arith.constant dense<0.000000e+00> : vector<8xf32>
    %526 = vector.multi_reduction <add>, %525, %cst_139 [1] : vector<8x8xf32> to vector<8xf32>
    %527 = vector.shape_cast %526 : vector<8xf32> to vector<8x1xf32>
    %528 = vector.extract_strided_slice %14 {offsets = [8, 0], sizes = [1, 8], strides = [1, 1]} : vector<9x8xf32> to vector<1x8xf32>
    %529 = vector.broadcast %527 : vector<8x1xf32> to vector<8x8xf32>
    %530 = vector.broadcast %528 : vector<1x8xf32> to vector<8x8xf32>
    %531 = arith.mulf %529, %530 : vector<8x8xf32>
    %532 = arith.addf %523, %531 : vector<8x8xf32>
    %533 = arith.addf %450, %532 : vector<8x8xf32>
    %534 = vector.extract_strided_slice %12 {offsets = [16, 0], sizes = [8, 32], strides = [1, 1]} : vector<32x32xf32> to vector<8x32xf32>
    %cst_140 = arith.constant dense<0.000000e+00> : vector<8x32xf32>
    %535 = tpu.matmul %533, %534, %cst_140 {dimension_numbers = #tpu.dot_dimension_numbers<[1], [0], [0], [1], [0, 0, 1, 1], [], []>} : vector<8x8xf32>, vector<8x32xf32>, vector<8x32xf32> -> vector<8x32xf32>
    %536 = arith.addf %374, %535 : vector<8x32xf32>
    %537 = vector.extract_strided_slice %17 {offsets = [0, 24], sizes = [8, 8], strides = [1, 1]} : vector<8x32xf32> to vector<8x8xf32>
    %cst_141 = arith.constant 0.353553385 : f32
    %538 = vector.broadcast %cst_141 : f32 to vector<8x8xf32>
    %539 = arith.mulf %537, %538 : vector<8x8xf32>
    %540 = vector.extract_strided_slice %20 {offsets = [0, 24], sizes = [8, 8], strides = [1, 1]} : vector<8x64xf32> to vector<8x8xf32>
    %541 = vector.extract_strided_slice %20 {offsets = [0, 56], sizes = [8, 8], strides = [1, 1]} : vector<8x64xf32> to vector<8x8xf32>
    %cst_142 = arith.constant dense<0.000000e+00> : vector<8x8xf32>
    %542 = tpu.matmul %539, %540, %cst_142 {dimension_numbers = #tpu.dot_dimension_numbers<[1], [1], [0], [0], [0, 0, 1, 0], [], []>} : vector<8x8xf32>, vector<8x8xf32>, vector<8x8xf32> -> vector<8x8xf32>
    %cst_143 = arith.constant dense<0.000000e+00> : vector<8x9xf32>
    %543 = tpu.matmul %539, %14, %cst_143 {dimension_numbers = #tpu.dot_dimension_numbers<[1], [1], [0], [0], [0, 0, 1, 0], [], []>} : vector<8x8xf32>, vector<9x8xf32>, vector<8x9xf32> -> vector<8x9xf32>
    %cst_144 = arith.constant 0.000000e+00 : f32
    %544 = vector.broadcast %cst_144 : f32 to vector<8x8xf32>
    %545 = vector.extract_strided_slice %543 {offsets = [0, 0], sizes = [8, 1], strides = [1, 1]} : vector<8x9xf32> to vector<8x1xf32>
    %cst_145 = arith.constant 0.000000e+00 : f32
    %546 = vector.shape_cast %545 : vector<8x1xf32> to vector<8x1xf32>
    %547 = vector.broadcast %546 : vector<8x1xf32> to vector<8x8xf32>
    %548 = vector.broadcast %cst_145 : f32 to vector<8x8xf32>
    %549 = arith.select %31, %547, %548 : vector<8x8xi1>, vector<8x8xf32>
    %550 = arith.addf %544, %549 : vector<8x8xf32>
    %551 = vector.extract_strided_slice %543 {offsets = [0, 1], sizes = [8, 1], strides = [1, 1]} : vector<8x9xf32> to vector<8x1xf32>
    %cst_146 = arith.constant 0.000000e+00 : f32
    %552 = vector.shape_cast %551 : vector<8x1xf32> to vector<8x1xf32>
    %553 = vector.broadcast %552 : vector<8x1xf32> to vector<8x8xf32>
    %554 = vector.broadcast %cst_146 : f32 to vector<8x8xf32>
    %555 = arith.select %33, %553, %554 : vector<8x8xi1>, vector<8x8xf32>
    %556 = arith.addf %550, %555 : vector<8x8xf32>
    %557 = vector.extract_strided_slice %543 {offsets = [0, 2], sizes = [8, 1], strides = [1, 1]} : vector<8x9xf32> to vector<8x1xf32>
    %cst_147 = arith.constant 0.000000e+00 : f32
    %558 = vector.shape_cast %557 : vector<8x1xf32> to vector<8x1xf32>
    %559 = vector.broadcast %558 : vector<8x1xf32> to vector<8x8xf32>
    %560 = vector.broadcast %cst_147 : f32 to vector<8x8xf32>
    %561 = arith.select %35, %559, %560 : vector<8x8xi1>, vector<8x8xf32>
    %562 = arith.addf %556, %561 : vector<8x8xf32>
    %563 = vector.extract_strided_slice %543 {offsets = [0, 3], sizes = [8, 1], strides = [1, 1]} : vector<8x9xf32> to vector<8x1xf32>
    %cst_148 = arith.constant 0.000000e+00 : f32
    %564 = vector.shape_cast %563 : vector<8x1xf32> to vector<8x1xf32>
    %565 = vector.broadcast %564 : vector<8x1xf32> to vector<8x8xf32>
    %566 = vector.broadcast %cst_148 : f32 to vector<8x8xf32>
    %567 = arith.select %37, %565, %566 : vector<8x8xi1>, vector<8x8xf32>
    %568 = arith.addf %562, %567 : vector<8x8xf32>
    %569 = vector.extract_strided_slice %543 {offsets = [0, 4], sizes = [8, 1], strides = [1, 1]} : vector<8x9xf32> to vector<8x1xf32>
    %cst_149 = arith.constant 0.000000e+00 : f32
    %570 = vector.shape_cast %569 : vector<8x1xf32> to vector<8x1xf32>
    %571 = vector.broadcast %570 : vector<8x1xf32> to vector<8x8xf32>
    %572 = vector.broadcast %cst_149 : f32 to vector<8x8xf32>
    %573 = arith.select %39, %571, %572 : vector<8x8xi1>, vector<8x8xf32>
    %574 = arith.addf %568, %573 : vector<8x8xf32>
    %575 = vector.extract_strided_slice %543 {offsets = [0, 5], sizes = [8, 1], strides = [1, 1]} : vector<8x9xf32> to vector<8x1xf32>
    %cst_150 = arith.constant 0.000000e+00 : f32
    %576 = vector.shape_cast %575 : vector<8x1xf32> to vector<8x1xf32>
    %577 = vector.broadcast %576 : vector<8x1xf32> to vector<8x8xf32>
    %578 = vector.broadcast %cst_150 : f32 to vector<8x8xf32>
    %579 = arith.select %41, %577, %578 : vector<8x8xi1>, vector<8x8xf32>
    %580 = arith.addf %574, %579 : vector<8x8xf32>
    %581 = vector.extract_strided_slice %543 {offsets = [0, 6], sizes = [8, 1], strides = [1, 1]} : vector<8x9xf32> to vector<8x1xf32>
    %cst_151 = arith.constant 0.000000e+00 : f32
    %582 = vector.shape_cast %581 : vector<8x1xf32> to vector<8x1xf32>
    %583 = vector.broadcast %582 : vector<8x1xf32> to vector<8x8xf32>
    %584 = vector.broadcast %cst_151 : f32 to vector<8x8xf32>
    %585 = arith.select %43, %583, %584 : vector<8x8xi1>, vector<8x8xf32>
    %586 = arith.addf %580, %585 : vector<8x8xf32>
    %587 = vector.extract_strided_slice %543 {offsets = [0, 7], sizes = [8, 1], strides = [1, 1]} : vector<8x9xf32> to vector<8x1xf32>
    %cst_152 = arith.constant 0.000000e+00 : f32
    %588 = vector.shape_cast %587 : vector<8x1xf32> to vector<8x1xf32>
    %589 = vector.broadcast %588 : vector<8x1xf32> to vector<8x8xf32>
    %590 = vector.broadcast %cst_152 : f32 to vector<8x8xf32>
    %591 = arith.select %45, %589, %590 : vector<8x8xi1>, vector<8x8xf32>
    %592 = arith.addf %586, %591 : vector<8x8xf32>
    %593 = vector.extract_strided_slice %543 {offsets = [0, 8], sizes = [8, 1], strides = [1, 1]} : vector<8x9xf32> to vector<8x1xf32>
    %cst_153 = arith.constant 0.000000e+00 : f32
    %594 = vector.shape_cast %593 : vector<8x1xf32> to vector<8x1xf32>
    %595 = vector.broadcast %594 : vector<8x1xf32> to vector<8x8xf32>
    %596 = vector.broadcast %cst_153 : f32 to vector<8x8xf32>
    %597 = arith.select %47, %595, %596 : vector<8x8xi1>, vector<8x8xf32>
    %598 = arith.addf %592, %597 : vector<8x8xf32>
    %599 = arith.addf %542, %598 : vector<8x8xf32>
    %cst_154 = arith.constant -1.000000e+10 : f32
    %600 = vector.broadcast %cst_154 : f32 to vector<8x8xf32>
    %601 = arith.select %49, %600, %599 : vector<8x8xi1>, vector<8x8xf32>
    %cst_155 = arith.constant dense<0xFF800000> : vector<8xf32>
    %602 = vector.multi_reduction <maximumf>, %601, %cst_155 [1] : vector<8x8xf32> to vector<8xf32>
    %603 = vector.shape_cast %602 : vector<8xf32> to vector<8x1xf32>
    %604 = vector.broadcast %603 : vector<8x1xf32> to vector<8x8xf32>
    %605 = arith.subf %601, %604 : vector<8x8xf32>
    %606 = math.exp %605 : vector<8x8xf32>
    %cst_156 = arith.constant dense<0.000000e+00> : vector<8xf32>
    %607 = vector.multi_reduction <add>, %606, %cst_156 [1] : vector<8x8xf32> to vector<8xf32>
    %608 = vector.shape_cast %607 : vector<8xf32> to vector<8x1xf32>
    %609 = tpu.reciprocal %608 {approx = true} : vector<8x1xf32> -> vector<8x1xf32>
    %610 = vector.broadcast %609 : vector<8x1xf32> to vector<8x8xf32>
    %611 = arith.mulf %606, %610 : vector<8x8xf32>
    %cst_157 = arith.constant dense<0.000000e+00> : vector<8x8xf32>
    %612 = tpu.matmul %611, %541, %cst_157 {dimension_numbers = #tpu.dot_dimension_numbers<[1], [0], [0], [1], [0, 0, 1, 1], [], []>} : vector<8x8xf32>, vector<8x8xf32>, vector<8x8xf32> -> vector<8x8xf32>
    %cst_158 = arith.constant 0.000000e+00 : f32
    %613 = vector.broadcast %cst_158 : f32 to vector<8x8xf32>
    %cst_159 = arith.constant 0.000000e+00 : f32
    %614 = vector.broadcast %cst_159 : f32 to vector<8x8xf32>
    %615 = arith.select %31, %611, %614 : vector<8x8xi1>, vector<8x8xf32>
    %cst_160 = arith.constant dense<0.000000e+00> : vector<8xf32>
    %616 = vector.multi_reduction <add>, %615, %cst_160 [1] : vector<8x8xf32> to vector<8xf32>
    %617 = vector.shape_cast %616 : vector<8xf32> to vector<8x1xf32>
    %618 = vector.extract_strided_slice %14 {offsets = [0, 0], sizes = [1, 8], strides = [1, 1]} : vector<9x8xf32> to vector<1x8xf32>
    %619 = vector.broadcast %617 : vector<8x1xf32> to vector<8x8xf32>
    %620 = vector.broadcast %618 : vector<1x8xf32> to vector<8x8xf32>
    %621 = arith.mulf %619, %620 : vector<8x8xf32>
    %622 = arith.addf %613, %621 : vector<8x8xf32>
    %cst_161 = arith.constant 0.000000e+00 : f32
    %623 = vector.broadcast %cst_161 : f32 to vector<8x8xf32>
    %624 = arith.select %33, %611, %623 : vector<8x8xi1>, vector<8x8xf32>
    %cst_162 = arith.constant dense<0.000000e+00> : vector<8xf32>
    %625 = vector.multi_reduction <add>, %624, %cst_162 [1] : vector<8x8xf32> to vector<8xf32>
    %626 = vector.shape_cast %625 : vector<8xf32> to vector<8x1xf32>
    %627 = vector.extract_strided_slice %14 {offsets = [1, 0], sizes = [1, 8], strides = [1, 1]} : vector<9x8xf32> to vector<1x8xf32>
    %628 = vector.broadcast %626 : vector<8x1xf32> to vector<8x8xf32>
    %629 = vector.broadcast %627 : vector<1x8xf32> to vector<8x8xf32>
    %630 = arith.mulf %628, %629 : vector<8x8xf32>
    %631 = arith.addf %622, %630 : vector<8x8xf32>
    %cst_163 = arith.constant 0.000000e+00 : f32
    %632 = vector.broadcast %cst_163 : f32 to vector<8x8xf32>
    %633 = arith.select %35, %611, %632 : vector<8x8xi1>, vector<8x8xf32>
    %cst_164 = arith.constant dense<0.000000e+00> : vector<8xf32>
    %634 = vector.multi_reduction <add>, %633, %cst_164 [1] : vector<8x8xf32> to vector<8xf32>
    %635 = vector.shape_cast %634 : vector<8xf32> to vector<8x1xf32>
    %636 = vector.extract_strided_slice %14 {offsets = [2, 0], sizes = [1, 8], strides = [1, 1]} : vector<9x8xf32> to vector<1x8xf32>
    %637 = vector.broadcast %635 : vector<8x1xf32> to vector<8x8xf32>
    %638 = vector.broadcast %636 : vector<1x8xf32> to vector<8x8xf32>
    %639 = arith.mulf %637, %638 : vector<8x8xf32>
    %640 = arith.addf %631, %639 : vector<8x8xf32>
    %cst_165 = arith.constant 0.000000e+00 : f32
    %641 = vector.broadcast %cst_165 : f32 to vector<8x8xf32>
    %642 = arith.select %37, %611, %641 : vector<8x8xi1>, vector<8x8xf32>
    %cst_166 = arith.constant dense<0.000000e+00> : vector<8xf32>
    %643 = vector.multi_reduction <add>, %642, %cst_166 [1] : vector<8x8xf32> to vector<8xf32>
    %644 = vector.shape_cast %643 : vector<8xf32> to vector<8x1xf32>
    %645 = vector.extract_strided_slice %14 {offsets = [3, 0], sizes = [1, 8], strides = [1, 1]} : vector<9x8xf32> to vector<1x8xf32>
    %646 = vector.broadcast %644 : vector<8x1xf32> to vector<8x8xf32>
    %647 = vector.broadcast %645 : vector<1x8xf32> to vector<8x8xf32>
    %648 = arith.mulf %646, %647 : vector<8x8xf32>
    %649 = arith.addf %640, %648 : vector<8x8xf32>
    %cst_167 = arith.constant 0.000000e+00 : f32
    %650 = vector.broadcast %cst_167 : f32 to vector<8x8xf32>
    %651 = arith.select %39, %611, %650 : vector<8x8xi1>, vector<8x8xf32>
    %cst_168 = arith.constant dense<0.000000e+00> : vector<8xf32>
    %652 = vector.multi_reduction <add>, %651, %cst_168 [1] : vector<8x8xf32> to vector<8xf32>
    %653 = vector.shape_cast %652 : vector<8xf32> to vector<8x1xf32>
    %654 = vector.extract_strided_slice %14 {offsets = [4, 0], sizes = [1, 8], strides = [1, 1]} : vector<9x8xf32> to vector<1x8xf32>
    %655 = vector.broadcast %653 : vector<8x1xf32> to vector<8x8xf32>
    %656 = vector.broadcast %654 : vector<1x8xf32> to vector<8x8xf32>
    %657 = arith.mulf %655, %656 : vector<8x8xf32>
    %658 = arith.addf %649, %657 : vector<8x8xf32>
    %cst_169 = arith.constant 0.000000e+00 : f32
    %659 = vector.broadcast %cst_169 : f32 to vector<8x8xf32>
    %660 = arith.select %41, %611, %659 : vector<8x8xi1>, vector<8x8xf32>
    %cst_170 = arith.constant dense<0.000000e+00> : vector<8xf32>
    %661 = vector.multi_reduction <add>, %660, %cst_170 [1] : vector<8x8xf32> to vector<8xf32>
    %662 = vector.shape_cast %661 : vector<8xf32> to vector<8x1xf32>
    %663 = vector.extract_strided_slice %14 {offsets = [5, 0], sizes = [1, 8], strides = [1, 1]} : vector<9x8xf32> to vector<1x8xf32>
    %664 = vector.broadcast %662 : vector<8x1xf32> to vector<8x8xf32>
    %665 = vector.broadcast %663 : vector<1x8xf32> to vector<8x8xf32>
    %666 = arith.mulf %664, %665 : vector<8x8xf32>
    %667 = arith.addf %658, %666 : vector<8x8xf32>
    %cst_171 = arith.constant 0.000000e+00 : f32
    %668 = vector.broadcast %cst_171 : f32 to vector<8x8xf32>
    %669 = arith.select %43, %611, %668 : vector<8x8xi1>, vector<8x8xf32>
    %cst_172 = arith.constant dense<0.000000e+00> : vector<8xf32>
    %670 = vector.multi_reduction <add>, %669, %cst_172 [1] : vector<8x8xf32> to vector<8xf32>
    %671 = vector.shape_cast %670 : vector<8xf32> to vector<8x1xf32>
    %672 = vector.extract_strided_slice %14 {offsets = [6, 0], sizes = [1, 8], strides = [1, 1]} : vector<9x8xf32> to vector<1x8xf32>
    %673 = vector.broadcast %671 : vector<8x1xf32> to vector<8x8xf32>
    %674 = vector.broadcast %672 : vector<1x8xf32> to vector<8x8xf32>
    %675 = arith.mulf %673, %674 : vector<8x8xf32>
    %676 = arith.addf %667, %675 : vector<8x8xf32>
    %cst_173 = arith.constant 0.000000e+00 : f32
    %677 = vector.broadcast %cst_173 : f32 to vector<8x8xf32>
    %678 = arith.select %45, %611, %677 : vector<8x8xi1>, vector<8x8xf32>
    %cst_174 = arith.constant dense<0.000000e+00> : vector<8xf32>
    %679 = vector.multi_reduction <add>, %678, %cst_174 [1] : vector<8x8xf32> to vector<8xf32>
    %680 = vector.shape_cast %679 : vector<8xf32> to vector<8x1xf32>
    %681 = vector.extract_strided_slice %14 {offsets = [7, 0], sizes = [1, 8], strides = [1, 1]} : vector<9x8xf32> to vector<1x8xf32>
    %682 = vector.broadcast %680 : vector<8x1xf32> to vector<8x8xf32>
    %683 = vector.broadcast %681 : vector<1x8xf32> to vector<8x8xf32>
    %684 = arith.mulf %682, %683 : vector<8x8xf32>
    %685 = arith.addf %676, %684 : vector<8x8xf32>
    %cst_175 = arith.constant 0.000000e+00 : f32
    %686 = vector.broadcast %cst_175 : f32 to vector<8x8xf32>
    %687 = arith.select %47, %611, %686 : vector<8x8xi1>, vector<8x8xf32>
    %cst_176 = arith.constant dense<0.000000e+00> : vector<8xf32>
    %688 = vector.multi_reduction <add>, %687, %cst_176 [1] : vector<8x8xf32> to vector<8xf32>
    %689 = vector.shape_cast %688 : vector<8xf32> to vector<8x1xf32>
    %690 = vector.extract_strided_slice %14 {offsets = [8, 0], sizes = [1, 8], strides = [1, 1]} : vector<9x8xf32> to vector<1x8xf32>
    %691 = vector.broadcast %689 : vector<8x1xf32> to vector<8x8xf32>
    %692 = vector.broadcast %690 : vector<1x8xf32> to vector<8x8xf32>
    %693 = arith.mulf %691, %692 : vector<8x8xf32>
    %694 = arith.addf %685, %693 : vector<8x8xf32>
    %695 = arith.addf %612, %694 : vector<8x8xf32>
    %696 = vector.extract_strided_slice %12 {offsets = [24, 0], sizes = [8, 32], strides = [1, 1]} : vector<32x32xf32> to vector<8x32xf32>
    %cst_177 = arith.constant dense<0.000000e+00> : vector<8x32xf32>
    %697 = tpu.matmul %695, %696, %cst_177 {dimension_numbers = #tpu.dot_dimension_numbers<[1], [0], [0], [1], [0, 0, 1, 1], [], []>} : vector<8x8xf32>, vector<8x32xf32>, vector<8x32xf32> -> vector<8x32xf32>
    %698 = arith.addf %536, %697 : vector<8x32xf32>
    %699 = vector.broadcast %13 : vector<1x32xf32> to vector<8x32xf32>
    %700 = arith.addf %698, %699 : vector<8x32xf32>
    %701 = arith.addf %700, %1 : vector<8x32xf32>
    %c0_178 = arith.constant 0 : index
    %c0_179 = arith.constant 0 : index
    %702 = vector.load %arg12[%c0_178, %c0_179] : memref<1x32xf32, #tpu.memory_space<vmem>>, vector<1x32xf32>
    %c0_180 = arith.constant 0 : index
    %c0_181 = arith.constant 0 : index
    %703 = vector.load %arg13[%c0_180, %c0_181] : memref<1x32xf32, #tpu.memory_space<vmem>>, vector<1x32xf32>
    %cst_182 = arith.constant dense<0.000000e+00> : vector<8xf32>
    %704 = vector.multi_reduction <add>, %701, %cst_182 [1] : vector<8x32xf32> to vector<8xf32>
    %705 = vector.shape_cast %704 : vector<8xf32> to vector<8x1xf32>
    %cst_183 = arith.constant 3.200000e+01 : f32
    %706 = vector.broadcast %cst_183 : f32 to vector<8x1xf32>
    %707 = arith.divf %705, %706 : vector<8x1xf32>
    %708 = vector.broadcast %707 : vector<8x1xf32> to vector<8x32xf32>
    %709 = arith.subf %701, %708 : vector<8x32xf32>
    %710 = arith.mulf %709, %709 : vector<8x32xf32>
    %cst_184 = arith.constant dense<0.000000e+00> : vector<8xf32>
    %711 = vector.multi_reduction <add>, %710, %cst_184 [1] : vector<8x32xf32> to vector<8xf32>
    %712 = vector.shape_cast %711 : vector<8xf32> to vector<8x1xf32>
    %cst_185 = arith.constant 3.200000e+01 : f32
    %713 = vector.broadcast %cst_185 : f32 to vector<8x1xf32>
    %714 = arith.divf %712, %713 : vector<8x1xf32>
    %715 = vector.broadcast %707 : vector<8x1xf32> to vector<8x32xf32>
    %716 = arith.subf %701, %715 : vector<8x32xf32>
    %cst_186 = arith.constant 9.99999974E-6 : f32
    %717 = vector.broadcast %cst_186 : f32 to vector<8x1xf32>
    %718 = arith.addf %714, %717 : vector<8x1xf32>
    %719 = math.rsqrt %718 : vector<8x1xf32>
    %720 = vector.broadcast %719 : vector<8x1xf32> to vector<8x32xf32>
    %721 = arith.mulf %716, %720 : vector<8x32xf32>
    %722 = vector.broadcast %702 : vector<1x32xf32> to vector<8x32xf32>
    %723 = arith.mulf %721, %722 : vector<8x32xf32>
    %724 = vector.broadcast %703 : vector<1x32xf32> to vector<8x32xf32>
    %725 = arith.addf %723, %724 : vector<8x32xf32>
    %c0_187 = arith.constant 0 : index
    %c0_188 = arith.constant 0 : index
    %726 = vector.load %arg14[%c0_187, %c0_188] : memref<32x32xf32, #tpu.memory_space<vmem>>, vector<32x32xf32>
    %c0_189 = arith.constant 0 : index
    %c0_190 = arith.constant 0 : index
    %727 = vector.load %arg15[%c0_189, %c0_190] : memref<1x32xf32, #tpu.memory_space<vmem>>, vector<1x32xf32>
    %c0_191 = arith.constant 0 : index
    %c0_192 = arith.constant 0 : index
    %728 = vector.load %arg16[%c0_191, %c0_192] : memref<32x64xf32, #tpu.memory_space<vmem>>, vector<32x64xf32>
    %c0_193 = arith.constant 0 : index
    %c0_194 = arith.constant 0 : index
    %729 = vector.load %arg17[%c0_193, %c0_194] : memref<1x64xf32, #tpu.memory_space<vmem>>, vector<1x64xf32>
    %c0_195 = arith.constant 0 : index
    %c0_196 = arith.constant 0 : index
    %730 = vector.load %arg18[%c0_195, %c0_196] : memref<32x32xf32, #tpu.memory_space<vmem>>, vector<32x32xf32>
    %c0_197 = arith.constant 0 : index
    %c0_198 = arith.constant 0 : index
    %731 = vector.load %arg19[%c0_197, %c0_198] : memref<1x32xf32, #tpu.memory_space<vmem>>, vector<1x32xf32>
    %c0_199 = arith.constant 0 : index
    %c0_200 = arith.constant 0 : index
    %732 = vector.load %arg20[%c0_199, %c0_200] : memref<9x8xf32, #tpu.memory_space<vmem>>, vector<9x8xf32>
    %cst_201 = arith.constant dense<0.000000e+00> : vector<8x32xf32>
    %733 = tpu.matmul %725, %726, %cst_201 {dimension_numbers = #tpu.dot_dimension_numbers<[1], [0], [0], [1], [0, 0, 1, 1], [], []>} : vector<8x32xf32>, vector<32x32xf32>, vector<8x32xf32> -> vector<8x32xf32>
    %734 = vector.broadcast %727 : vector<1x32xf32> to vector<8x32xf32>
    %735 = arith.addf %733, %734 : vector<8x32xf32>
    %cst_202 = arith.constant dense<0.000000e+00> : vector<8x64xf32>
    %736 = tpu.matmul %3, %728, %cst_202 {dimension_numbers = #tpu.dot_dimension_numbers<[1], [0], [0], [1], [0, 0, 1, 1], [], []>} : vector<8x32xf32>, vector<32x64xf32>, vector<8x64xf32> -> vector<8x64xf32>
    %737 = vector.broadcast %729 : vector<1x64xf32> to vector<8x64xf32>
    %738 = arith.addf %736, %737 : vector<8x64xf32>
    %739 = tpu.iota {dimensions = array<i32: 0>} : vector<8x8xi32>
    %740 = tpu.iota {dimensions = array<i32: 1>} : vector<8x8xi32>
    %741 = arith.subi %739, %740 : vector<8x8xi32>
    %c-4_i32_203 = arith.constant -4 : i32
    %c4_i32_204 = arith.constant 4 : i32
    %742 = vector.broadcast %c-4_i32_203 : i32 to vector<8x8xi32>
    %743 = arith.maxsi %742, %741 : vector<8x8xi32>
    %744 = vector.broadcast %c4_i32_204 : i32 to vector<8x8xi32>
    %745 = arith.minsi %744, %743 : vector<8x8xi32>
    %c4_i32_205 = arith.constant 4 : i32
    %746 = vector.broadcast %c4_i32_205 : i32 to vector<8x8xi32>
    %747 = arith.addi %745, %746 : vector<8x8xi32>
    %c0_i32_206 = arith.constant 0 : i32
    %748 = vector.broadcast %c0_i32_206 : i32 to vector<8x8xi32>
    %749 = arith.cmpi eq, %747, %748 : vector<8x8xi32>
    %c1_i32_207 = arith.constant 1 : i32
    %750 = vector.broadcast %c1_i32_207 : i32 to vector<8x8xi32>
    %751 = arith.cmpi eq, %747, %750 : vector<8x8xi32>
    %c2_i32_208 = arith.constant 2 : i32
    %752 = vector.broadcast %c2_i32_208 : i32 to vector<8x8xi32>
    %753 = arith.cmpi eq, %747, %752 : vector<8x8xi32>
    %c3_i32_209 = arith.constant 3 : i32
    %754 = vector.broadcast %c3_i32_209 : i32 to vector<8x8xi32>
    %755 = arith.cmpi eq, %747, %754 : vector<8x8xi32>
    %c4_i32_210 = arith.constant 4 : i32
    %756 = vector.broadcast %c4_i32_210 : i32 to vector<8x8xi32>
    %757 = arith.cmpi eq, %747, %756 : vector<8x8xi32>
    %c5_i32_211 = arith.constant 5 : i32
    %758 = vector.broadcast %c5_i32_211 : i32 to vector<8x8xi32>
    %759 = arith.cmpi eq, %747, %758 : vector<8x8xi32>
    %c6_i32_212 = arith.constant 6 : i32
    %760 = vector.broadcast %c6_i32_212 : i32 to vector<8x8xi32>
    %761 = arith.cmpi eq, %747, %760 : vector<8x8xi32>
    %c7_i32_213 = arith.constant 7 : i32
    %762 = vector.broadcast %c7_i32_213 : i32 to vector<8x8xi32>
    %763 = arith.cmpi eq, %747, %762 : vector<8x8xi32>
    %c8_i32_214 = arith.constant 8 : i32
    %764 = vector.broadcast %c8_i32_214 : i32 to vector<8x8xi32>
    %765 = arith.cmpi eq, %747, %764 : vector<8x8xi32>
    %cst_215 = arith.constant 0.000000e+00 : f32
    %766 = vector.broadcast %cst_215 : f32 to vector<8x8xf32>
    %767 = arith.cmpf oeq, %7, %766 : vector<8x8xf32>
    %cst_216 = arith.constant 0.000000e+00 : f32
    %768 = vector.broadcast %cst_216 : f32 to vector<8x32xf32>
    %769 = vector.extract_strided_slice %735 {offsets = [0, 0], sizes = [8, 8], strides = [1, 1]} : vector<8x32xf32> to vector<8x8xf32>
    %cst_217 = arith.constant 0.353553385 : f32
    %770 = vector.broadcast %cst_217 : f32 to vector<8x8xf32>
    %771 = arith.mulf %769, %770 : vector<8x8xf32>
    %772 = vector.extract_strided_slice %738 {offsets = [0, 0], sizes = [8, 8], strides = [1, 1]} : vector<8x64xf32> to vector<8x8xf32>
    %773 = vector.extract_strided_slice %738 {offsets = [0, 32], sizes = [8, 8], strides = [1, 1]} : vector<8x64xf32> to vector<8x8xf32>
    %cst_218 = arith.constant dense<0.000000e+00> : vector<8x8xf32>
    %774 = tpu.matmul %771, %772, %cst_218 {dimension_numbers = #tpu.dot_dimension_numbers<[1], [1], [0], [0], [0, 0, 1, 0], [], []>} : vector<8x8xf32>, vector<8x8xf32>, vector<8x8xf32> -> vector<8x8xf32>
    %cst_219 = arith.constant dense<0.000000e+00> : vector<8x9xf32>
    %775 = tpu.matmul %771, %732, %cst_219 {dimension_numbers = #tpu.dot_dimension_numbers<[1], [1], [0], [0], [0, 0, 1, 0], [], []>} : vector<8x8xf32>, vector<9x8xf32>, vector<8x9xf32> -> vector<8x9xf32>
    %cst_220 = arith.constant 0.000000e+00 : f32
    %776 = vector.broadcast %cst_220 : f32 to vector<8x8xf32>
    %777 = vector.extract_strided_slice %775 {offsets = [0, 0], sizes = [8, 1], strides = [1, 1]} : vector<8x9xf32> to vector<8x1xf32>
    %cst_221 = arith.constant 0.000000e+00 : f32
    %778 = vector.shape_cast %777 : vector<8x1xf32> to vector<8x1xf32>
    %779 = vector.broadcast %778 : vector<8x1xf32> to vector<8x8xf32>
    %780 = vector.broadcast %cst_221 : f32 to vector<8x8xf32>
    %781 = arith.select %749, %779, %780 : vector<8x8xi1>, vector<8x8xf32>
    %782 = arith.addf %776, %781 : vector<8x8xf32>
    %783 = vector.extract_strided_slice %775 {offsets = [0, 1], sizes = [8, 1], strides = [1, 1]} : vector<8x9xf32> to vector<8x1xf32>
    %cst_222 = arith.constant 0.000000e+00 : f32
    %784 = vector.shape_cast %783 : vector<8x1xf32> to vector<8x1xf32>
    %785 = vector.broadcast %784 : vector<8x1xf32> to vector<8x8xf32>
    %786 = vector.broadcast %cst_222 : f32 to vector<8x8xf32>
    %787 = arith.select %751, %785, %786 : vector<8x8xi1>, vector<8x8xf32>
    %788 = arith.addf %782, %787 : vector<8x8xf32>
    %789 = vector.extract_strided_slice %775 {offsets = [0, 2], sizes = [8, 1], strides = [1, 1]} : vector<8x9xf32> to vector<8x1xf32>
    %cst_223 = arith.constant 0.000000e+00 : f32
    %790 = vector.shape_cast %789 : vector<8x1xf32> to vector<8x1xf32>
    %791 = vector.broadcast %790 : vector<8x1xf32> to vector<8x8xf32>
    %792 = vector.broadcast %cst_223 : f32 to vector<8x8xf32>
    %793 = arith.select %753, %791, %792 : vector<8x8xi1>, vector<8x8xf32>
    %794 = arith.addf %788, %793 : vector<8x8xf32>
    %795 = vector.extract_strided_slice %775 {offsets = [0, 3], sizes = [8, 1], strides = [1, 1]} : vector<8x9xf32> to vector<8x1xf32>
    %cst_224 = arith.constant 0.000000e+00 : f32
    %796 = vector.shape_cast %795 : vector<8x1xf32> to vector<8x1xf32>
    %797 = vector.broadcast %796 : vector<8x1xf32> to vector<8x8xf32>
    %798 = vector.broadcast %cst_224 : f32 to vector<8x8xf32>
    %799 = arith.select %755, %797, %798 : vector<8x8xi1>, vector<8x8xf32>
    %800 = arith.addf %794, %799 : vector<8x8xf32>
    %801 = vector.extract_strided_slice %775 {offsets = [0, 4], sizes = [8, 1], strides = [1, 1]} : vector<8x9xf32> to vector<8x1xf32>
    %cst_225 = arith.constant 0.000000e+00 : f32
    %802 = vector.shape_cast %801 : vector<8x1xf32> to vector<8x1xf32>
    %803 = vector.broadcast %802 : vector<8x1xf32> to vector<8x8xf32>
    %804 = vector.broadcast %cst_225 : f32 to vector<8x8xf32>
    %805 = arith.select %757, %803, %804 : vector<8x8xi1>, vector<8x8xf32>
    %806 = arith.addf %800, %805 : vector<8x8xf32>
    %807 = vector.extract_strided_slice %775 {offsets = [0, 5], sizes = [8, 1], strides = [1, 1]} : vector<8x9xf32> to vector<8x1xf32>
    %cst_226 = arith.constant 0.000000e+00 : f32
    %808 = vector.shape_cast %807 : vector<8x1xf32> to vector<8x1xf32>
    %809 = vector.broadcast %808 : vector<8x1xf32> to vector<8x8xf32>
    %810 = vector.broadcast %cst_226 : f32 to vector<8x8xf32>
    %811 = arith.select %759, %809, %810 : vector<8x8xi1>, vector<8x8xf32>
    %812 = arith.addf %806, %811 : vector<8x8xf32>
    %813 = vector.extract_strided_slice %775 {offsets = [0, 6], sizes = [8, 1], strides = [1, 1]} : vector<8x9xf32> to vector<8x1xf32>
    %cst_227 = arith.constant 0.000000e+00 : f32
    %814 = vector.shape_cast %813 : vector<8x1xf32> to vector<8x1xf32>
    %815 = vector.broadcast %814 : vector<8x1xf32> to vector<8x8xf32>
    %816 = vector.broadcast %cst_227 : f32 to vector<8x8xf32>
    %817 = arith.select %761, %815, %816 : vector<8x8xi1>, vector<8x8xf32>
    %818 = arith.addf %812, %817 : vector<8x8xf32>
    %819 = vector.extract_strided_slice %775 {offsets = [0, 7], sizes = [8, 1], strides = [1, 1]} : vector<8x9xf32> to vector<8x1xf32>
    %cst_228 = arith.constant 0.000000e+00 : f32
    %820 = vector.shape_cast %819 : vector<8x1xf32> to vector<8x1xf32>
    %821 = vector.broadcast %820 : vector<8x1xf32> to vector<8x8xf32>
    %822 = vector.broadcast %cst_228 : f32 to vector<8x8xf32>
    %823 = arith.select %763, %821, %822 : vector<8x8xi1>, vector<8x8xf32>
    %824 = arith.addf %818, %823 : vector<8x8xf32>
    %825 = vector.extract_strided_slice %775 {offsets = [0, 8], sizes = [8, 1], strides = [1, 1]} : vector<8x9xf32> to vector<8x1xf32>
    %cst_229 = arith.constant 0.000000e+00 : f32
    %826 = vector.shape_cast %825 : vector<8x1xf32> to vector<8x1xf32>
    %827 = vector.broadcast %826 : vector<8x1xf32> to vector<8x8xf32>
    %828 = vector.broadcast %cst_229 : f32 to vector<8x8xf32>
    %829 = arith.select %765, %827, %828 : vector<8x8xi1>, vector<8x8xf32>
    %830 = arith.addf %824, %829 : vector<8x8xf32>
    %831 = arith.addf %774, %830 : vector<8x8xf32>
    %cst_230 = arith.constant -1.000000e+10 : f32
    %832 = vector.broadcast %cst_230 : f32 to vector<8x8xf32>
    %833 = arith.select %767, %832, %831 : vector<8x8xi1>, vector<8x8xf32>
    %cst_231 = arith.constant dense<0xFF800000> : vector<8xf32>
    %834 = vector.multi_reduction <maximumf>, %833, %cst_231 [1] : vector<8x8xf32> to vector<8xf32>
    %835 = vector.shape_cast %834 : vector<8xf32> to vector<8x1xf32>
    %836 = vector.broadcast %835 : vector<8x1xf32> to vector<8x8xf32>
    %837 = arith.subf %833, %836 : vector<8x8xf32>
    %838 = math.exp %837 : vector<8x8xf32>
    %cst_232 = arith.constant dense<0.000000e+00> : vector<8xf32>
    %839 = vector.multi_reduction <add>, %838, %cst_232 [1] : vector<8x8xf32> to vector<8xf32>
    %840 = vector.shape_cast %839 : vector<8xf32> to vector<8x1xf32>
    %841 = tpu.reciprocal %840 {approx = true} : vector<8x1xf32> -> vector<8x1xf32>
    %842 = vector.broadcast %841 : vector<8x1xf32> to vector<8x8xf32>
    %843 = arith.mulf %838, %842 : vector<8x8xf32>
    %cst_233 = arith.constant dense<0.000000e+00> : vector<8x8xf32>
    %844 = tpu.matmul %843, %773, %cst_233 {dimension_numbers = #tpu.dot_dimension_numbers<[1], [0], [0], [1], [0, 0, 1, 1], [], []>} : vector<8x8xf32>, vector<8x8xf32>, vector<8x8xf32> -> vector<8x8xf32>
    %cst_234 = arith.constant 0.000000e+00 : f32
    %845 = vector.broadcast %cst_234 : f32 to vector<8x8xf32>
    %cst_235 = arith.constant 0.000000e+00 : f32
    %846 = vector.broadcast %cst_235 : f32 to vector<8x8xf32>
    %847 = arith.select %749, %843, %846 : vector<8x8xi1>, vector<8x8xf32>
    %cst_236 = arith.constant dense<0.000000e+00> : vector<8xf32>
    %848 = vector.multi_reduction <add>, %847, %cst_236 [1] : vector<8x8xf32> to vector<8xf32>
    %849 = vector.shape_cast %848 : vector<8xf32> to vector<8x1xf32>
    %850 = vector.extract_strided_slice %732 {offsets = [0, 0], sizes = [1, 8], strides = [1, 1]} : vector<9x8xf32> to vector<1x8xf32>
    %851 = vector.broadcast %849 : vector<8x1xf32> to vector<8x8xf32>
    %852 = vector.broadcast %850 : vector<1x8xf32> to vector<8x8xf32>
    %853 = arith.mulf %851, %852 : vector<8x8xf32>
    %854 = arith.addf %845, %853 : vector<8x8xf32>
    %cst_237 = arith.constant 0.000000e+00 : f32
    %855 = vector.broadcast %cst_237 : f32 to vector<8x8xf32>
    %856 = arith.select %751, %843, %855 : vector<8x8xi1>, vector<8x8xf32>
    %cst_238 = arith.constant dense<0.000000e+00> : vector<8xf32>
    %857 = vector.multi_reduction <add>, %856, %cst_238 [1] : vector<8x8xf32> to vector<8xf32>
    %858 = vector.shape_cast %857 : vector<8xf32> to vector<8x1xf32>
    %859 = vector.extract_strided_slice %732 {offsets = [1, 0], sizes = [1, 8], strides = [1, 1]} : vector<9x8xf32> to vector<1x8xf32>
    %860 = vector.broadcast %858 : vector<8x1xf32> to vector<8x8xf32>
    %861 = vector.broadcast %859 : vector<1x8xf32> to vector<8x8xf32>
    %862 = arith.mulf %860, %861 : vector<8x8xf32>
    %863 = arith.addf %854, %862 : vector<8x8xf32>
    %cst_239 = arith.constant 0.000000e+00 : f32
    %864 = vector.broadcast %cst_239 : f32 to vector<8x8xf32>
    %865 = arith.select %753, %843, %864 : vector<8x8xi1>, vector<8x8xf32>
    %cst_240 = arith.constant dense<0.000000e+00> : vector<8xf32>
    %866 = vector.multi_reduction <add>, %865, %cst_240 [1] : vector<8x8xf32> to vector<8xf32>
    %867 = vector.shape_cast %866 : vector<8xf32> to vector<8x1xf32>
    %868 = vector.extract_strided_slice %732 {offsets = [2, 0], sizes = [1, 8], strides = [1, 1]} : vector<9x8xf32> to vector<1x8xf32>
    %869 = vector.broadcast %867 : vector<8x1xf32> to vector<8x8xf32>
    %870 = vector.broadcast %868 : vector<1x8xf32> to vector<8x8xf32>
    %871 = arith.mulf %869, %870 : vector<8x8xf32>
    %872 = arith.addf %863, %871 : vector<8x8xf32>
    %cst_241 = arith.constant 0.000000e+00 : f32
    %873 = vector.broadcast %cst_241 : f32 to vector<8x8xf32>
    %874 = arith.select %755, %843, %873 : vector<8x8xi1>, vector<8x8xf32>
    %cst_242 = arith.constant dense<0.000000e+00> : vector<8xf32>
    %875 = vector.multi_reduction <add>, %874, %cst_242 [1] : vector<8x8xf32> to vector<8xf32>
    %876 = vector.shape_cast %875 : vector<8xf32> to vector<8x1xf32>
    %877 = vector.extract_strided_slice %732 {offsets = [3, 0], sizes = [1, 8], strides = [1, 1]} : vector<9x8xf32> to vector<1x8xf32>
    %878 = vector.broadcast %876 : vector<8x1xf32> to vector<8x8xf32>
    %879 = vector.broadcast %877 : vector<1x8xf32> to vector<8x8xf32>
    %880 = arith.mulf %878, %879 : vector<8x8xf32>
    %881 = arith.addf %872, %880 : vector<8x8xf32>
    %cst_243 = arith.constant 0.000000e+00 : f32
    %882 = vector.broadcast %cst_243 : f32 to vector<8x8xf32>
    %883 = arith.select %757, %843, %882 : vector<8x8xi1>, vector<8x8xf32>
    %cst_244 = arith.constant dense<0.000000e+00> : vector<8xf32>
    %884 = vector.multi_reduction <add>, %883, %cst_244 [1] : vector<8x8xf32> to vector<8xf32>
    %885 = vector.shape_cast %884 : vector<8xf32> to vector<8x1xf32>
    %886 = vector.extract_strided_slice %732 {offsets = [4, 0], sizes = [1, 8], strides = [1, 1]} : vector<9x8xf32> to vector<1x8xf32>
    %887 = vector.broadcast %885 : vector<8x1xf32> to vector<8x8xf32>
    %888 = vector.broadcast %886 : vector<1x8xf32> to vector<8x8xf32>
    %889 = arith.mulf %887, %888 : vector<8x8xf32>
    %890 = arith.addf %881, %889 : vector<8x8xf32>
    %cst_245 = arith.constant 0.000000e+00 : f32
    %891 = vector.broadcast %cst_245 : f32 to vector<8x8xf32>
    %892 = arith.select %759, %843, %891 : vector<8x8xi1>, vector<8x8xf32>
    %cst_246 = arith.constant dense<0.000000e+00> : vector<8xf32>
    %893 = vector.multi_reduction <add>, %892, %cst_246 [1] : vector<8x8xf32> to vector<8xf32>
    %894 = vector.shape_cast %893 : vector<8xf32> to vector<8x1xf32>
    %895 = vector.extract_strided_slice %732 {offsets = [5, 0], sizes = [1, 8], strides = [1, 1]} : vector<9x8xf32> to vector<1x8xf32>
    %896 = vector.broadcast %894 : vector<8x1xf32> to vector<8x8xf32>
    %897 = vector.broadcast %895 : vector<1x8xf32> to vector<8x8xf32>
    %898 = arith.mulf %896, %897 : vector<8x8xf32>
    %899 = arith.addf %890, %898 : vector<8x8xf32>
    %cst_247 = arith.constant 0.000000e+00 : f32
    %900 = vector.broadcast %cst_247 : f32 to vector<8x8xf32>
    %901 = arith.select %761, %843, %900 : vector<8x8xi1>, vector<8x8xf32>
    %cst_248 = arith.constant dense<0.000000e+00> : vector<8xf32>
    %902 = vector.multi_reduction <add>, %901, %cst_248 [1] : vector<8x8xf32> to vector<8xf32>
    %903 = vector.shape_cast %902 : vector<8xf32> to vector<8x1xf32>
    %904 = vector.extract_strided_slice %732 {offsets = [6, 0], sizes = [1, 8], strides = [1, 1]} : vector<9x8xf32> to vector<1x8xf32>
    %905 = vector.broadcast %903 : vector<8x1xf32> to vector<8x8xf32>
    %906 = vector.broadcast %904 : vector<1x8xf32> to vector<8x8xf32>
    %907 = arith.mulf %905, %906 : vector<8x8xf32>
    %908 = arith.addf %899, %907 : vector<8x8xf32>
    %cst_249 = arith.constant 0.000000e+00 : f32
    %909 = vector.broadcast %cst_249 : f32 to vector<8x8xf32>
    %910 = arith.select %763, %843, %909 : vector<8x8xi1>, vector<8x8xf32>
    %cst_250 = arith.constant dense<0.000000e+00> : vector<8xf32>
    %911 = vector.multi_reduction <add>, %910, %cst_250 [1] : vector<8x8xf32> to vector<8xf32>
    %912 = vector.shape_cast %911 : vector<8xf32> to vector<8x1xf32>
    %913 = vector.extract_strided_slice %732 {offsets = [7, 0], sizes = [1, 8], strides = [1, 1]} : vector<9x8xf32> to vector<1x8xf32>
    %914 = vector.broadcast %912 : vector<8x1xf32> to vector<8x8xf32>
    %915 = vector.broadcast %913 : vector<1x8xf32> to vector<8x8xf32>
    %916 = arith.mulf %914, %915 : vector<8x8xf32>
    %917 = arith.addf %908, %916 : vector<8x8xf32>
    %cst_251 = arith.constant 0.000000e+00 : f32
    %918 = vector.broadcast %cst_251 : f32 to vector<8x8xf32>
    %919 = arith.select %765, %843, %918 : vector<8x8xi1>, vector<8x8xf32>
    %cst_252 = arith.constant dense<0.000000e+00> : vector<8xf32>
    %920 = vector.multi_reduction <add>, %919, %cst_252 [1] : vector<8x8xf32> to vector<8xf32>
    %921 = vector.shape_cast %920 : vector<8xf32> to vector<8x1xf32>
    %922 = vector.extract_strided_slice %732 {offsets = [8, 0], sizes = [1, 8], strides = [1, 1]} : vector<9x8xf32> to vector<1x8xf32>
    %923 = vector.broadcast %921 : vector<8x1xf32> to vector<8x8xf32>
    %924 = vector.broadcast %922 : vector<1x8xf32> to vector<8x8xf32>
    %925 = arith.mulf %923, %924 : vector<8x8xf32>
    %926 = arith.addf %917, %925 : vector<8x8xf32>
    %927 = arith.addf %844, %926 : vector<8x8xf32>
    %928 = vector.extract_strided_slice %730 {offsets = [0, 0], sizes = [8, 32], strides = [1, 1]} : vector<32x32xf32> to vector<8x32xf32>
    %cst_253 = arith.constant dense<0.000000e+00> : vector<8x32xf32>
    %929 = tpu.matmul %927, %928, %cst_253 {dimension_numbers = #tpu.dot_dimension_numbers<[1], [0], [0], [1], [0, 0, 1, 1], [], []>} : vector<8x8xf32>, vector<8x32xf32>, vector<8x32xf32> -> vector<8x32xf32>
    %930 = arith.addf %768, %929 : vector<8x32xf32>
    %931 = vector.extract_strided_slice %735 {offsets = [0, 8], sizes = [8, 8], strides = [1, 1]} : vector<8x32xf32> to vector<8x8xf32>
    %cst_254 = arith.constant 0.353553385 : f32
    %932 = vector.broadcast %cst_254 : f32 to vector<8x8xf32>
    %933 = arith.mulf %931, %932 : vector<8x8xf32>
    %934 = vector.extract_strided_slice %738 {offsets = [0, 8], sizes = [8, 8], strides = [1, 1]} : vector<8x64xf32> to vector<8x8xf32>
    %935 = vector.extract_strided_slice %738 {offsets = [0, 40], sizes = [8, 8], strides = [1, 1]} : vector<8x64xf32> to vector<8x8xf32>
    %cst_255 = arith.constant dense<0.000000e+00> : vector<8x8xf32>
    %936 = tpu.matmul %933, %934, %cst_255 {dimension_numbers = #tpu.dot_dimension_numbers<[1], [1], [0], [0], [0, 0, 1, 0], [], []>} : vector<8x8xf32>, vector<8x8xf32>, vector<8x8xf32> -> vector<8x8xf32>
    %cst_256 = arith.constant dense<0.000000e+00> : vector<8x9xf32>
    %937 = tpu.matmul %933, %732, %cst_256 {dimension_numbers = #tpu.dot_dimension_numbers<[1], [1], [0], [0], [0, 0, 1, 0], [], []>} : vector<8x8xf32>, vector<9x8xf32>, vector<8x9xf32> -> vector<8x9xf32>
    %cst_257 = arith.constant 0.000000e+00 : f32
    %938 = vector.broadcast %cst_257 : f32 to vector<8x8xf32>
    %939 = vector.extract_strided_slice %937 {offsets = [0, 0], sizes = [8, 1], strides = [1, 1]} : vector<8x9xf32> to vector<8x1xf32>
    %cst_258 = arith.constant 0.000000e+00 : f32
    %940 = vector.shape_cast %939 : vector<8x1xf32> to vector<8x1xf32>
    %941 = vector.broadcast %940 : vector<8x1xf32> to vector<8x8xf32>
    %942 = vector.broadcast %cst_258 : f32 to vector<8x8xf32>
    %943 = arith.select %749, %941, %942 : vector<8x8xi1>, vector<8x8xf32>
    %944 = arith.addf %938, %943 : vector<8x8xf32>
    %945 = vector.extract_strided_slice %937 {offsets = [0, 1], sizes = [8, 1], strides = [1, 1]} : vector<8x9xf32> to vector<8x1xf32>
    %cst_259 = arith.constant 0.000000e+00 : f32
    %946 = vector.shape_cast %945 : vector<8x1xf32> to vector<8x1xf32>
    %947 = vector.broadcast %946 : vector<8x1xf32> to vector<8x8xf32>
    %948 = vector.broadcast %cst_259 : f32 to vector<8x8xf32>
    %949 = arith.select %751, %947, %948 : vector<8x8xi1>, vector<8x8xf32>
    %950 = arith.addf %944, %949 : vector<8x8xf32>
    %951 = vector.extract_strided_slice %937 {offsets = [0, 2], sizes = [8, 1], strides = [1, 1]} : vector<8x9xf32> to vector<8x1xf32>
    %cst_260 = arith.constant 0.000000e+00 : f32
    %952 = vector.shape_cast %951 : vector<8x1xf32> to vector<8x1xf32>
    %953 = vector.broadcast %952 : vector<8x1xf32> to vector<8x8xf32>
    %954 = vector.broadcast %cst_260 : f32 to vector<8x8xf32>
    %955 = arith.select %753, %953, %954 : vector<8x8xi1>, vector<8x8xf32>
    %956 = arith.addf %950, %955 : vector<8x8xf32>
    %957 = vector.extract_strided_slice %937 {offsets = [0, 3], sizes = [8, 1], strides = [1, 1]} : vector<8x9xf32> to vector<8x1xf32>
    %cst_261 = arith.constant 0.000000e+00 : f32
    %958 = vector.shape_cast %957 : vector<8x1xf32> to vector<8x1xf32>
    %959 = vector.broadcast %958 : vector<8x1xf32> to vector<8x8xf32>
    %960 = vector.broadcast %cst_261 : f32 to vector<8x8xf32>
    %961 = arith.select %755, %959, %960 : vector<8x8xi1>, vector<8x8xf32>
    %962 = arith.addf %956, %961 : vector<8x8xf32>
    %963 = vector.extract_strided_slice %937 {offsets = [0, 4], sizes = [8, 1], strides = [1, 1]} : vector<8x9xf32> to vector<8x1xf32>
    %cst_262 = arith.constant 0.000000e+00 : f32
    %964 = vector.shape_cast %963 : vector<8x1xf32> to vector<8x1xf32>
    %965 = vector.broadcast %964 : vector<8x1xf32> to vector<8x8xf32>
    %966 = vector.broadcast %cst_262 : f32 to vector<8x8xf32>
    %967 = arith.select %757, %965, %966 : vector<8x8xi1>, vector<8x8xf32>
    %968 = arith.addf %962, %967 : vector<8x8xf32>
    %969 = vector.extract_strided_slice %937 {offsets = [0, 5], sizes = [8, 1], strides = [1, 1]} : vector<8x9xf32> to vector<8x1xf32>
    %cst_263 = arith.constant 0.000000e+00 : f32
    %970 = vector.shape_cast %969 : vector<8x1xf32> to vector<8x1xf32>
    %971 = vector.broadcast %970 : vector<8x1xf32> to vector<8x8xf32>
    %972 = vector.broadcast %cst_263 : f32 to vector<8x8xf32>
    %973 = arith.select %759, %971, %972 : vector<8x8xi1>, vector<8x8xf32>
    %974 = arith.addf %968, %973 : vector<8x8xf32>
    %975 = vector.extract_strided_slice %937 {offsets = [0, 6], sizes = [8, 1], strides = [1, 1]} : vector<8x9xf32> to vector<8x1xf32>
    %cst_264 = arith.constant 0.000000e+00 : f32
    %976 = vector.shape_cast %975 : vector<8x1xf32> to vector<8x1xf32>
    %977 = vector.broadcast %976 : vector<8x1xf32> to vector<8x8xf32>
    %978 = vector.broadcast %cst_264 : f32 to vector<8x8xf32>
    %979 = arith.select %761, %977, %978 : vector<8x8xi1>, vector<8x8xf32>
    %980 = arith.addf %974, %979 : vector<8x8xf32>
    %981 = vector.extract_strided_slice %937 {offsets = [0, 7], sizes = [8, 1], strides = [1, 1]} : vector<8x9xf32> to vector<8x1xf32>
    %cst_265 = arith.constant 0.000000e+00 : f32
    %982 = vector.shape_cast %981 : vector<8x1xf32> to vector<8x1xf32>
    %983 = vector.broadcast %982 : vector<8x1xf32> to vector<8x8xf32>
    %984 = vector.broadcast %cst_265 : f32 to vector<8x8xf32>
    %985 = arith.select %763, %983, %984 : vector<8x8xi1>, vector<8x8xf32>
    %986 = arith.addf %980, %985 : vector<8x8xf32>
    %987 = vector.extract_strided_slice %937 {offsets = [0, 8], sizes = [8, 1], strides = [1, 1]} : vector<8x9xf32> to vector<8x1xf32>
    %cst_266 = arith.constant 0.000000e+00 : f32
    %988 = vector.shape_cast %987 : vector<8x1xf32> to vector<8x1xf32>
    %989 = vector.broadcast %988 : vector<8x1xf32> to vector<8x8xf32>
    %990 = vector.broadcast %cst_266 : f32 to vector<8x8xf32>
    %991 = arith.select %765, %989, %990 : vector<8x8xi1>, vector<8x8xf32>
    %992 = arith.addf %986, %991 : vector<8x8xf32>
    %993 = arith.addf %936, %992 : vector<8x8xf32>
    %cst_267 = arith.constant -1.000000e+10 : f32
    %994 = vector.broadcast %cst_267 : f32 to vector<8x8xf32>
    %995 = arith.select %767, %994, %993 : vector<8x8xi1>, vector<8x8xf32>
    %cst_268 = arith.constant dense<0xFF800000> : vector<8xf32>
    %996 = vector.multi_reduction <maximumf>, %995, %cst_268 [1] : vector<8x8xf32> to vector<8xf32>
    %997 = vector.shape_cast %996 : vector<8xf32> to vector<8x1xf32>
    %998 = vector.broadcast %997 : vector<8x1xf32> to vector<8x8xf32>
    %999 = arith.subf %995, %998 : vector<8x8xf32>
    %1000 = math.exp %999 : vector<8x8xf32>
    %cst_269 = arith.constant dense<0.000000e+00> : vector<8xf32>
    %1001 = vector.multi_reduction <add>, %1000, %cst_269 [1] : vector<8x8xf32> to vector<8xf32>
    %1002 = vector.shape_cast %1001 : vector<8xf32> to vector<8x1xf32>
    %1003 = tpu.reciprocal %1002 {approx = true} : vector<8x1xf32> -> vector<8x1xf32>
    %1004 = vector.broadcast %1003 : vector<8x1xf32> to vector<8x8xf32>
    %1005 = arith.mulf %1000, %1004 : vector<8x8xf32>
    %cst_270 = arith.constant dense<0.000000e+00> : vector<8x8xf32>
    %1006 = tpu.matmul %1005, %935, %cst_270 {dimension_numbers = #tpu.dot_dimension_numbers<[1], [0], [0], [1], [0, 0, 1, 1], [], []>} : vector<8x8xf32>, vector<8x8xf32>, vector<8x8xf32> -> vector<8x8xf32>
    %cst_271 = arith.constant 0.000000e+00 : f32
    %1007 = vector.broadcast %cst_271 : f32 to vector<8x8xf32>
    %cst_272 = arith.constant 0.000000e+00 : f32
    %1008 = vector.broadcast %cst_272 : f32 to vector<8x8xf32>
    %1009 = arith.select %749, %1005, %1008 : vector<8x8xi1>, vector<8x8xf32>
    %cst_273 = arith.constant dense<0.000000e+00> : vector<8xf32>
    %1010 = vector.multi_reduction <add>, %1009, %cst_273 [1] : vector<8x8xf32> to vector<8xf32>
    %1011 = vector.shape_cast %1010 : vector<8xf32> to vector<8x1xf32>
    %1012 = vector.extract_strided_slice %732 {offsets = [0, 0], sizes = [1, 8], strides = [1, 1]} : vector<9x8xf32> to vector<1x8xf32>
    %1013 = vector.broadcast %1011 : vector<8x1xf32> to vector<8x8xf32>
    %1014 = vector.broadcast %1012 : vector<1x8xf32> to vector<8x8xf32>
    %1015 = arith.mulf %1013, %1014 : vector<8x8xf32>
    %1016 = arith.addf %1007, %1015 : vector<8x8xf32>
    %cst_274 = arith.constant 0.000000e+00 : f32
    %1017 = vector.broadcast %cst_274 : f32 to vector<8x8xf32>
    %1018 = arith.select %751, %1005, %1017 : vector<8x8xi1>, vector<8x8xf32>
    %cst_275 = arith.constant dense<0.000000e+00> : vector<8xf32>
    %1019 = vector.multi_reduction <add>, %1018, %cst_275 [1] : vector<8x8xf32> to vector<8xf32>
    %1020 = vector.shape_cast %1019 : vector<8xf32> to vector<8x1xf32>
    %1021 = vector.extract_strided_slice %732 {offsets = [1, 0], sizes = [1, 8], strides = [1, 1]} : vector<9x8xf32> to vector<1x8xf32>
    %1022 = vector.broadcast %1020 : vector<8x1xf32> to vector<8x8xf32>
    %1023 = vector.broadcast %1021 : vector<1x8xf32> to vector<8x8xf32>
    %1024 = arith.mulf %1022, %1023 : vector<8x8xf32>
    %1025 = arith.addf %1016, %1024 : vector<8x8xf32>
    %cst_276 = arith.constant 0.000000e+00 : f32
    %1026 = vector.broadcast %cst_276 : f32 to vector<8x8xf32>
    %1027 = arith.select %753, %1005, %1026 : vector<8x8xi1>, vector<8x8xf32>
    %cst_277 = arith.constant dense<0.000000e+00> : vector<8xf32>
    %1028 = vector.multi_reduction <add>, %1027, %cst_277 [1] : vector<8x8xf32> to vector<8xf32>
    %1029 = vector.shape_cast %1028 : vector<8xf32> to vector<8x1xf32>
    %1030 = vector.extract_strided_slice %732 {offsets = [2, 0], sizes = [1, 8], strides = [1, 1]} : vector<9x8xf32> to vector<1x8xf32>
    %1031 = vector.broadcast %1029 : vector<8x1xf32> to vector<8x8xf32>
    %1032 = vector.broadcast %1030 : vector<1x8xf32> to vector<8x8xf32>
    %1033 = arith.mulf %1031, %1032 : vector<8x8xf32>
    %1034 = arith.addf %1025, %1033 : vector<8x8xf32>
    %cst_278 = arith.constant 0.000000e+00 : f32
    %1035 = vector.broadcast %cst_278 : f32 to vector<8x8xf32>
    %1036 = arith.select %755, %1005, %1035 : vector<8x8xi1>, vector<8x8xf32>
    %cst_279 = arith.constant dense<0.000000e+00> : vector<8xf32>
    %1037 = vector.multi_reduction <add>, %1036, %cst_279 [1] : vector<8x8xf32> to vector<8xf32>
    %1038 = vector.shape_cast %1037 : vector<8xf32> to vector<8x1xf32>
    %1039 = vector.extract_strided_slice %732 {offsets = [3, 0], sizes = [1, 8], strides = [1, 1]} : vector<9x8xf32> to vector<1x8xf32>
    %1040 = vector.broadcast %1038 : vector<8x1xf32> to vector<8x8xf32>
    %1041 = vector.broadcast %1039 : vector<1x8xf32> to vector<8x8xf32>
    %1042 = arith.mulf %1040, %1041 : vector<8x8xf32>
    %1043 = arith.addf %1034, %1042 : vector<8x8xf32>
    %cst_280 = arith.constant 0.000000e+00 : f32
    %1044 = vector.broadcast %cst_280 : f32 to vector<8x8xf32>
    %1045 = arith.select %757, %1005, %1044 : vector<8x8xi1>, vector<8x8xf32>
    %cst_281 = arith.constant dense<0.000000e+00> : vector<8xf32>
    %1046 = vector.multi_reduction <add>, %1045, %cst_281 [1] : vector<8x8xf32> to vector<8xf32>
    %1047 = vector.shape_cast %1046 : vector<8xf32> to vector<8x1xf32>
    %1048 = vector.extract_strided_slice %732 {offsets = [4, 0], sizes = [1, 8], strides = [1, 1]} : vector<9x8xf32> to vector<1x8xf32>
    %1049 = vector.broadcast %1047 : vector<8x1xf32> to vector<8x8xf32>
    %1050 = vector.broadcast %1048 : vector<1x8xf32> to vector<8x8xf32>
    %1051 = arith.mulf %1049, %1050 : vector<8x8xf32>
    %1052 = arith.addf %1043, %1051 : vector<8x8xf32>
    %cst_282 = arith.constant 0.000000e+00 : f32
    %1053 = vector.broadcast %cst_282 : f32 to vector<8x8xf32>
    %1054 = arith.select %759, %1005, %1053 : vector<8x8xi1>, vector<8x8xf32>
    %cst_283 = arith.constant dense<0.000000e+00> : vector<8xf32>
    %1055 = vector.multi_reduction <add>, %1054, %cst_283 [1] : vector<8x8xf32> to vector<8xf32>
    %1056 = vector.shape_cast %1055 : vector<8xf32> to vector<8x1xf32>
    %1057 = vector.extract_strided_slice %732 {offsets = [5, 0], sizes = [1, 8], strides = [1, 1]} : vector<9x8xf32> to vector<1x8xf32>
    %1058 = vector.broadcast %1056 : vector<8x1xf32> to vector<8x8xf32>
    %1059 = vector.broadcast %1057 : vector<1x8xf32> to vector<8x8xf32>
    %1060 = arith.mulf %1058, %1059 : vector<8x8xf32>
    %1061 = arith.addf %1052, %1060 : vector<8x8xf32>
    %cst_284 = arith.constant 0.000000e+00 : f32
    %1062 = vector.broadcast %cst_284 : f32 to vector<8x8xf32>
    %1063 = arith.select %761, %1005, %1062 : vector<8x8xi1>, vector<8x8xf32>
    %cst_285 = arith.constant dense<0.000000e+00> : vector<8xf32>
    %1064 = vector.multi_reduction <add>, %1063, %cst_285 [1] : vector<8x8xf32> to vector<8xf32>
    %1065 = vector.shape_cast %1064 : vector<8xf32> to vector<8x1xf32>
    %1066 = vector.extract_strided_slice %732 {offsets = [6, 0], sizes = [1, 8], strides = [1, 1]} : vector<9x8xf32> to vector<1x8xf32>
    %1067 = vector.broadcast %1065 : vector<8x1xf32> to vector<8x8xf32>
    %1068 = vector.broadcast %1066 : vector<1x8xf32> to vector<8x8xf32>
    %1069 = arith.mulf %1067, %1068 : vector<8x8xf32>
    %1070 = arith.addf %1061, %1069 : vector<8x8xf32>
    %cst_286 = arith.constant 0.000000e+00 : f32
    %1071 = vector.broadcast %cst_286 : f32 to vector<8x8xf32>
    %1072 = arith.select %763, %1005, %1071 : vector<8x8xi1>, vector<8x8xf32>
    %cst_287 = arith.constant dense<0.000000e+00> : vector<8xf32>
    %1073 = vector.multi_reduction <add>, %1072, %cst_287 [1] : vector<8x8xf32> to vector<8xf32>
    %1074 = vector.shape_cast %1073 : vector<8xf32> to vector<8x1xf32>
    %1075 = vector.extract_strided_slice %732 {offsets = [7, 0], sizes = [1, 8], strides = [1, 1]} : vector<9x8xf32> to vector<1x8xf32>
    %1076 = vector.broadcast %1074 : vector<8x1xf32> to vector<8x8xf32>
    %1077 = vector.broadcast %1075 : vector<1x8xf32> to vector<8x8xf32>
    %1078 = arith.mulf %1076, %1077 : vector<8x8xf32>
    %1079 = arith.addf %1070, %1078 : vector<8x8xf32>
    %cst_288 = arith.constant 0.000000e+00 : f32
    %1080 = vector.broadcast %cst_288 : f32 to vector<8x8xf32>
    %1081 = arith.select %765, %1005, %1080 : vector<8x8xi1>, vector<8x8xf32>
    %cst_289 = arith.constant dense<0.000000e+00> : vector<8xf32>
    %1082 = vector.multi_reduction <add>, %1081, %cst_289 [1] : vector<8x8xf32> to vector<8xf32>
    %1083 = vector.shape_cast %1082 : vector<8xf32> to vector<8x1xf32>
    %1084 = vector.extract_strided_slice %732 {offsets = [8, 0], sizes = [1, 8], strides = [1, 1]} : vector<9x8xf32> to vector<1x8xf32>
    %1085 = vector.broadcast %1083 : vector<8x1xf32> to vector<8x8xf32>
    %1086 = vector.broadcast %1084 : vector<1x8xf32> to vector<8x8xf32>
    %1087 = arith.mulf %1085, %1086 : vector<8x8xf32>
    %1088 = arith.addf %1079, %1087 : vector<8x8xf32>
    %1089 = arith.addf %1006, %1088 : vector<8x8xf32>
    %1090 = vector.extract_strided_slice %730 {offsets = [8, 0], sizes = [8, 32], strides = [1, 1]} : vector<32x32xf32> to vector<8x32xf32>
    %cst_290 = arith.constant dense<0.000000e+00> : vector<8x32xf32>
    %1091 = tpu.matmul %1089, %1090, %cst_290 {dimension_numbers = #tpu.dot_dimension_numbers<[1], [0], [0], [1], [0, 0, 1, 1], [], []>} : vector<8x8xf32>, vector<8x32xf32>, vector<8x32xf32> -> vector<8x32xf32>
    %1092 = arith.addf %930, %1091 : vector<8x32xf32>
    %1093 = vector.extract_strided_slice %735 {offsets = [0, 16], sizes = [8, 8], strides = [1, 1]} : vector<8x32xf32> to vector<8x8xf32>
    %cst_291 = arith.constant 0.353553385 : f32
    %1094 = vector.broadcast %cst_291 : f32 to vector<8x8xf32>
    %1095 = arith.mulf %1093, %1094 : vector<8x8xf32>
    %1096 = vector.extract_strided_slice %738 {offsets = [0, 16], sizes = [8, 8], strides = [1, 1]} : vector<8x64xf32> to vector<8x8xf32>
    %1097 = vector.extract_strided_slice %738 {offsets = [0, 48], sizes = [8, 8], strides = [1, 1]} : vector<8x64xf32> to vector<8x8xf32>
    %cst_292 = arith.constant dense<0.000000e+00> : vector<8x8xf32>
    %1098 = tpu.matmul %1095, %1096, %cst_292 {dimension_numbers = #tpu.dot_dimension_numbers<[1], [1], [0], [0], [0, 0, 1, 0], [], []>} : vector<8x8xf32>, vector<8x8xf32>, vector<8x8xf32> -> vector<8x8xf32>
    %cst_293 = arith.constant dense<0.000000e+00> : vector<8x9xf32>
    %1099 = tpu.matmul %1095, %732, %cst_293 {dimension_numbers = #tpu.dot_dimension_numbers<[1], [1], [0], [0], [0, 0, 1, 0], [], []>} : vector<8x8xf32>, vector<9x8xf32>, vector<8x9xf32> -> vector<8x9xf32>
    %cst_294 = arith.constant 0.000000e+00 : f32
    %1100 = vector.broadcast %cst_294 : f32 to vector<8x8xf32>
    %1101 = vector.extract_strided_slice %1099 {offsets = [0, 0], sizes = [8, 1], strides = [1, 1]} : vector<8x9xf32> to vector<8x1xf32>
    %cst_295 = arith.constant 0.000000e+00 : f32
    %1102 = vector.shape_cast %1101 : vector<8x1xf32> to vector<8x1xf32>
    %1103 = vector.broadcast %1102 : vector<8x1xf32> to vector<8x8xf32>
    %1104 = vector.broadcast %cst_295 : f32 to vector<8x8xf32>
    %1105 = arith.select %749, %1103, %1104 : vector<8x8xi1>, vector<8x8xf32>
    %1106 = arith.addf %1100, %1105 : vector<8x8xf32>
    %1107 = vector.extract_strided_slice %1099 {offsets = [0, 1], sizes = [8, 1], strides = [1, 1]} : vector<8x9xf32> to vector<8x1xf32>
    %cst_296 = arith.constant 0.000000e+00 : f32
    %1108 = vector.shape_cast %1107 : vector<8x1xf32> to vector<8x1xf32>
    %1109 = vector.broadcast %1108 : vector<8x1xf32> to vector<8x8xf32>
    %1110 = vector.broadcast %cst_296 : f32 to vector<8x8xf32>
    %1111 = arith.select %751, %1109, %1110 : vector<8x8xi1>, vector<8x8xf32>
    %1112 = arith.addf %1106, %1111 : vector<8x8xf32>
    %1113 = vector.extract_strided_slice %1099 {offsets = [0, 2], sizes = [8, 1], strides = [1, 1]} : vector<8x9xf32> to vector<8x1xf32>
    %cst_297 = arith.constant 0.000000e+00 : f32
    %1114 = vector.shape_cast %1113 : vector<8x1xf32> to vector<8x1xf32>
    %1115 = vector.broadcast %1114 : vector<8x1xf32> to vector<8x8xf32>
    %1116 = vector.broadcast %cst_297 : f32 to vector<8x8xf32>
    %1117 = arith.select %753, %1115, %1116 : vector<8x8xi1>, vector<8x8xf32>
    %1118 = arith.addf %1112, %1117 : vector<8x8xf32>
    %1119 = vector.extract_strided_slice %1099 {offsets = [0, 3], sizes = [8, 1], strides = [1, 1]} : vector<8x9xf32> to vector<8x1xf32>
    %cst_298 = arith.constant 0.000000e+00 : f32
    %1120 = vector.shape_cast %1119 : vector<8x1xf32> to vector<8x1xf32>
    %1121 = vector.broadcast %1120 : vector<8x1xf32> to vector<8x8xf32>
    %1122 = vector.broadcast %cst_298 : f32 to vector<8x8xf32>
    %1123 = arith.select %755, %1121, %1122 : vector<8x8xi1>, vector<8x8xf32>
    %1124 = arith.addf %1118, %1123 : vector<8x8xf32>
    %1125 = vector.extract_strided_slice %1099 {offsets = [0, 4], sizes = [8, 1], strides = [1, 1]} : vector<8x9xf32> to vector<8x1xf32>
    %cst_299 = arith.constant 0.000000e+00 : f32
    %1126 = vector.shape_cast %1125 : vector<8x1xf32> to vector<8x1xf32>
    %1127 = vector.broadcast %1126 : vector<8x1xf32> to vector<8x8xf32>
    %1128 = vector.broadcast %cst_299 : f32 to vector<8x8xf32>
    %1129 = arith.select %757, %1127, %1128 : vector<8x8xi1>, vector<8x8xf32>
    %1130 = arith.addf %1124, %1129 : vector<8x8xf32>
    %1131 = vector.extract_strided_slice %1099 {offsets = [0, 5], sizes = [8, 1], strides = [1, 1]} : vector<8x9xf32> to vector<8x1xf32>
    %cst_300 = arith.constant 0.000000e+00 : f32
    %1132 = vector.shape_cast %1131 : vector<8x1xf32> to vector<8x1xf32>
    %1133 = vector.broadcast %1132 : vector<8x1xf32> to vector<8x8xf32>
    %1134 = vector.broadcast %cst_300 : f32 to vector<8x8xf32>
    %1135 = arith.select %759, %1133, %1134 : vector<8x8xi1>, vector<8x8xf32>
    %1136 = arith.addf %1130, %1135 : vector<8x8xf32>
    %1137 = vector.extract_strided_slice %1099 {offsets = [0, 6], sizes = [8, 1], strides = [1, 1]} : vector<8x9xf32> to vector<8x1xf32>
    %cst_301 = arith.constant 0.000000e+00 : f32
    %1138 = vector.shape_cast %1137 : vector<8x1xf32> to vector<8x1xf32>
    %1139 = vector.broadcast %1138 : vector<8x1xf32> to vector<8x8xf32>
    %1140 = vector.broadcast %cst_301 : f32 to vector<8x8xf32>
    %1141 = arith.select %761, %1139, %1140 : vector<8x8xi1>, vector<8x8xf32>
    %1142 = arith.addf %1136, %1141 : vector<8x8xf32>
    %1143 = vector.extract_strided_slice %1099 {offsets = [0, 7], sizes = [8, 1], strides = [1, 1]} : vector<8x9xf32> to vector<8x1xf32>
    %cst_302 = arith.constant 0.000000e+00 : f32
    %1144 = vector.shape_cast %1143 : vector<8x1xf32> to vector<8x1xf32>
    %1145 = vector.broadcast %1144 : vector<8x1xf32> to vector<8x8xf32>
    %1146 = vector.broadcast %cst_302 : f32 to vector<8x8xf32>
    %1147 = arith.select %763, %1145, %1146 : vector<8x8xi1>, vector<8x8xf32>
    %1148 = arith.addf %1142, %1147 : vector<8x8xf32>
    %1149 = vector.extract_strided_slice %1099 {offsets = [0, 8], sizes = [8, 1], strides = [1, 1]} : vector<8x9xf32> to vector<8x1xf32>
    %cst_303 = arith.constant 0.000000e+00 : f32
    %1150 = vector.shape_cast %1149 : vector<8x1xf32> to vector<8x1xf32>
    %1151 = vector.broadcast %1150 : vector<8x1xf32> to vector<8x8xf32>
    %1152 = vector.broadcast %cst_303 : f32 to vector<8x8xf32>
    %1153 = arith.select %765, %1151, %1152 : vector<8x8xi1>, vector<8x8xf32>
    %1154 = arith.addf %1148, %1153 : vector<8x8xf32>
    %1155 = arith.addf %1098, %1154 : vector<8x8xf32>
    %cst_304 = arith.constant -1.000000e+10 : f32
    %1156 = vector.broadcast %cst_304 : f32 to vector<8x8xf32>
    %1157 = arith.select %767, %1156, %1155 : vector<8x8xi1>, vector<8x8xf32>
    %cst_305 = arith.constant dense<0xFF800000> : vector<8xf32>
    %1158 = vector.multi_reduction <maximumf>, %1157, %cst_305 [1] : vector<8x8xf32> to vector<8xf32>
    %1159 = vector.shape_cast %1158 : vector<8xf32> to vector<8x1xf32>
    %1160 = vector.broadcast %1159 : vector<8x1xf32> to vector<8x8xf32>
    %1161 = arith.subf %1157, %1160 : vector<8x8xf32>
    %1162 = math.exp %1161 : vector<8x8xf32>
    %cst_306 = arith.constant dense<0.000000e+00> : vector<8xf32>
    %1163 = vector.multi_reduction <add>, %1162, %cst_306 [1] : vector<8x8xf32> to vector<8xf32>
    %1164 = vector.shape_cast %1163 : vector<8xf32> to vector<8x1xf32>
    %1165 = tpu.reciprocal %1164 {approx = true} : vector<8x1xf32> -> vector<8x1xf32>
    %1166 = vector.broadcast %1165 : vector<8x1xf32> to vector<8x8xf32>
    %1167 = arith.mulf %1162, %1166 : vector<8x8xf32>
    %cst_307 = arith.constant dense<0.000000e+00> : vector<8x8xf32>
    %1168 = tpu.matmul %1167, %1097, %cst_307 {dimension_numbers = #tpu.dot_dimension_numbers<[1], [0], [0], [1], [0, 0, 1, 1], [], []>} : vector<8x8xf32>, vector<8x8xf32>, vector<8x8xf32> -> vector<8x8xf32>
    %cst_308 = arith.constant 0.000000e+00 : f32
    %1169 = vector.broadcast %cst_308 : f32 to vector<8x8xf32>
    %cst_309 = arith.constant 0.000000e+00 : f32
    %1170 = vector.broadcast %cst_309 : f32 to vector<8x8xf32>
    %1171 = arith.select %749, %1167, %1170 : vector<8x8xi1>, vector<8x8xf32>
    %cst_310 = arith.constant dense<0.000000e+00> : vector<8xf32>
    %1172 = vector.multi_reduction <add>, %1171, %cst_310 [1] : vector<8x8xf32> to vector<8xf32>
    %1173 = vector.shape_cast %1172 : vector<8xf32> to vector<8x1xf32>
    %1174 = vector.extract_strided_slice %732 {offsets = [0, 0], sizes = [1, 8], strides = [1, 1]} : vector<9x8xf32> to vector<1x8xf32>
    %1175 = vector.broadcast %1173 : vector<8x1xf32> to vector<8x8xf32>
    %1176 = vector.broadcast %1174 : vector<1x8xf32> to vector<8x8xf32>
    %1177 = arith.mulf %1175, %1176 : vector<8x8xf32>
    %1178 = arith.addf %1169, %1177 : vector<8x8xf32>
    %cst_311 = arith.constant 0.000000e+00 : f32
    %1179 = vector.broadcast %cst_311 : f32 to vector<8x8xf32>
    %1180 = arith.select %751, %1167, %1179 : vector<8x8xi1>, vector<8x8xf32>
    %cst_312 = arith.constant dense<0.000000e+00> : vector<8xf32>
    %1181 = vector.multi_reduction <add>, %1180, %cst_312 [1] : vector<8x8xf32> to vector<8xf32>
    %1182 = vector.shape_cast %1181 : vector<8xf32> to vector<8x1xf32>
    %1183 = vector.extract_strided_slice %732 {offsets = [1, 0], sizes = [1, 8], strides = [1, 1]} : vector<9x8xf32> to vector<1x8xf32>
    %1184 = vector.broadcast %1182 : vector<8x1xf32> to vector<8x8xf32>
    %1185 = vector.broadcast %1183 : vector<1x8xf32> to vector<8x8xf32>
    %1186 = arith.mulf %1184, %1185 : vector<8x8xf32>
    %1187 = arith.addf %1178, %1186 : vector<8x8xf32>
    %cst_313 = arith.constant 0.000000e+00 : f32
    %1188 = vector.broadcast %cst_313 : f32 to vector<8x8xf32>
    %1189 = arith.select %753, %1167, %1188 : vector<8x8xi1>, vector<8x8xf32>
    %cst_314 = arith.constant dense<0.000000e+00> : vector<8xf32>
    %1190 = vector.multi_reduction <add>, %1189, %cst_314 [1] : vector<8x8xf32> to vector<8xf32>
    %1191 = vector.shape_cast %1190 : vector<8xf32> to vector<8x1xf32>
    %1192 = vector.extract_strided_slice %732 {offsets = [2, 0], sizes = [1, 8], strides = [1, 1]} : vector<9x8xf32> to vector<1x8xf32>
    %1193 = vector.broadcast %1191 : vector<8x1xf32> to vector<8x8xf32>
    %1194 = vector.broadcast %1192 : vector<1x8xf32> to vector<8x8xf32>
    %1195 = arith.mulf %1193, %1194 : vector<8x8xf32>
    %1196 = arith.addf %1187, %1195 : vector<8x8xf32>
    %cst_315 = arith.constant 0.000000e+00 : f32
    %1197 = vector.broadcast %cst_315 : f32 to vector<8x8xf32>
    %1198 = arith.select %755, %1167, %1197 : vector<8x8xi1>, vector<8x8xf32>
    %cst_316 = arith.constant dense<0.000000e+00> : vector<8xf32>
    %1199 = vector.multi_reduction <add>, %1198, %cst_316 [1] : vector<8x8xf32> to vector<8xf32>
    %1200 = vector.shape_cast %1199 : vector<8xf32> to vector<8x1xf32>
    %1201 = vector.extract_strided_slice %732 {offsets = [3, 0], sizes = [1, 8], strides = [1, 1]} : vector<9x8xf32> to vector<1x8xf32>
    %1202 = vector.broadcast %1200 : vector<8x1xf32> to vector<8x8xf32>
    %1203 = vector.broadcast %1201 : vector<1x8xf32> to vector<8x8xf32>
    %1204 = arith.mulf %1202, %1203 : vector<8x8xf32>
    %1205 = arith.addf %1196, %1204 : vector<8x8xf32>
    %cst_317 = arith.constant 0.000000e+00 : f32
    %1206 = vector.broadcast %cst_317 : f32 to vector<8x8xf32>
    %1207 = arith.select %757, %1167, %1206 : vector<8x8xi1>, vector<8x8xf32>
    %cst_318 = arith.constant dense<0.000000e+00> : vector<8xf32>
    %1208 = vector.multi_reduction <add>, %1207, %cst_318 [1] : vector<8x8xf32> to vector<8xf32>
    %1209 = vector.shape_cast %1208 : vector<8xf32> to vector<8x1xf32>
    %1210 = vector.extract_strided_slice %732 {offsets = [4, 0], sizes = [1, 8], strides = [1, 1]} : vector<9x8xf32> to vector<1x8xf32>
    %1211 = vector.broadcast %1209 : vector<8x1xf32> to vector<8x8xf32>
    %1212 = vector.broadcast %1210 : vector<1x8xf32> to vector<8x8xf32>
    %1213 = arith.mulf %1211, %1212 : vector<8x8xf32>
    %1214 = arith.addf %1205, %1213 : vector<8x8xf32>
    %cst_319 = arith.constant 0.000000e+00 : f32
    %1215 = vector.broadcast %cst_319 : f32 to vector<8x8xf32>
    %1216 = arith.select %759, %1167, %1215 : vector<8x8xi1>, vector<8x8xf32>
    %cst_320 = arith.constant dense<0.000000e+00> : vector<8xf32>
    %1217 = vector.multi_reduction <add>, %1216, %cst_320 [1] : vector<8x8xf32> to vector<8xf32>
    %1218 = vector.shape_cast %1217 : vector<8xf32> to vector<8x1xf32>
    %1219 = vector.extract_strided_slice %732 {offsets = [5, 0], sizes = [1, 8], strides = [1, 1]} : vector<9x8xf32> to vector<1x8xf32>
    %1220 = vector.broadcast %1218 : vector<8x1xf32> to vector<8x8xf32>
    %1221 = vector.broadcast %1219 : vector<1x8xf32> to vector<8x8xf32>
    %1222 = arith.mulf %1220, %1221 : vector<8x8xf32>
    %1223 = arith.addf %1214, %1222 : vector<8x8xf32>
    %cst_321 = arith.constant 0.000000e+00 : f32
    %1224 = vector.broadcast %cst_321 : f32 to vector<8x8xf32>
    %1225 = arith.select %761, %1167, %1224 : vector<8x8xi1>, vector<8x8xf32>
    %cst_322 = arith.constant dense<0.000000e+00> : vector<8xf32>
    %1226 = vector.multi_reduction <add>, %1225, %cst_322 [1] : vector<8x8xf32> to vector<8xf32>
    %1227 = vector.shape_cast %1226 : vector<8xf32> to vector<8x1xf32>
    %1228 = vector.extract_strided_slice %732 {offsets = [6, 0], sizes = [1, 8], strides = [1, 1]} : vector<9x8xf32> to vector<1x8xf32>
    %1229 = vector.broadcast %1227 : vector<8x1xf32> to vector<8x8xf32>
    %1230 = vector.broadcast %1228 : vector<1x8xf32> to vector<8x8xf32>
    %1231 = arith.mulf %1229, %1230 : vector<8x8xf32>
    %1232 = arith.addf %1223, %1231 : vector<8x8xf32>
    %cst_323 = arith.constant 0.000000e+00 : f32
    %1233 = vector.broadcast %cst_323 : f32 to vector<8x8xf32>
    %1234 = arith.select %763, %1167, %1233 : vector<8x8xi1>, vector<8x8xf32>
    %cst_324 = arith.constant dense<0.000000e+00> : vector<8xf32>
    %1235 = vector.multi_reduction <add>, %1234, %cst_324 [1] : vector<8x8xf32> to vector<8xf32>
    %1236 = vector.shape_cast %1235 : vector<8xf32> to vector<8x1xf32>
    %1237 = vector.extract_strided_slice %732 {offsets = [7, 0], sizes = [1, 8], strides = [1, 1]} : vector<9x8xf32> to vector<1x8xf32>
    %1238 = vector.broadcast %1236 : vector<8x1xf32> to vector<8x8xf32>
    %1239 = vector.broadcast %1237 : vector<1x8xf32> to vector<8x8xf32>
    %1240 = arith.mulf %1238, %1239 : vector<8x8xf32>
    %1241 = arith.addf %1232, %1240 : vector<8x8xf32>
    %cst_325 = arith.constant 0.000000e+00 : f32
    %1242 = vector.broadcast %cst_325 : f32 to vector<8x8xf32>
    %1243 = arith.select %765, %1167, %1242 : vector<8x8xi1>, vector<8x8xf32>
    %cst_326 = arith.constant dense<0.000000e+00> : vector<8xf32>
    %1244 = vector.multi_reduction <add>, %1243, %cst_326 [1] : vector<8x8xf32> to vector<8xf32>
    %1245 = vector.shape_cast %1244 : vector<8xf32> to vector<8x1xf32>
    %1246 = vector.extract_strided_slice %732 {offsets = [8, 0], sizes = [1, 8], strides = [1, 1]} : vector<9x8xf32> to vector<1x8xf32>
    %1247 = vector.broadcast %1245 : vector<8x1xf32> to vector<8x8xf32>
    %1248 = vector.broadcast %1246 : vector<1x8xf32> to vector<8x8xf32>
    %1249 = arith.mulf %1247, %1248 : vector<8x8xf32>
    %1250 = arith.addf %1241, %1249 : vector<8x8xf32>
    %1251 = arith.addf %1168, %1250 : vector<8x8xf32>
    %1252 = vector.extract_strided_slice %730 {offsets = [16, 0], sizes = [8, 32], strides = [1, 1]} : vector<32x32xf32> to vector<8x32xf32>
    %cst_327 = arith.constant dense<0.000000e+00> : vector<8x32xf32>
    %1253 = tpu.matmul %1251, %1252, %cst_327 {dimension_numbers = #tpu.dot_dimension_numbers<[1], [0], [0], [1], [0, 0, 1, 1], [], []>} : vector<8x8xf32>, vector<8x32xf32>, vector<8x32xf32> -> vector<8x32xf32>
    %1254 = arith.addf %1092, %1253 : vector<8x32xf32>
    %1255 = vector.extract_strided_slice %735 {offsets = [0, 24], sizes = [8, 8], strides = [1, 1]} : vector<8x32xf32> to vector<8x8xf32>
    %cst_328 = arith.constant 0.353553385 : f32
    %1256 = vector.broadcast %cst_328 : f32 to vector<8x8xf32>
    %1257 = arith.mulf %1255, %1256 : vector<8x8xf32>
    %1258 = vector.extract_strided_slice %738 {offsets = [0, 24], sizes = [8, 8], strides = [1, 1]} : vector<8x64xf32> to vector<8x8xf32>
    %1259 = vector.extract_strided_slice %738 {offsets = [0, 56], sizes = [8, 8], strides = [1, 1]} : vector<8x64xf32> to vector<8x8xf32>
    %cst_329 = arith.constant dense<0.000000e+00> : vector<8x8xf32>
    %1260 = tpu.matmul %1257, %1258, %cst_329 {dimension_numbers = #tpu.dot_dimension_numbers<[1], [1], [0], [0], [0, 0, 1, 0], [], []>} : vector<8x8xf32>, vector<8x8xf32>, vector<8x8xf32> -> vector<8x8xf32>
    %cst_330 = arith.constant dense<0.000000e+00> : vector<8x9xf32>
    %1261 = tpu.matmul %1257, %732, %cst_330 {dimension_numbers = #tpu.dot_dimension_numbers<[1], [1], [0], [0], [0, 0, 1, 0], [], []>} : vector<8x8xf32>, vector<9x8xf32>, vector<8x9xf32> -> vector<8x9xf32>
    %cst_331 = arith.constant 0.000000e+00 : f32
    %1262 = vector.broadcast %cst_331 : f32 to vector<8x8xf32>
    %1263 = vector.extract_strided_slice %1261 {offsets = [0, 0], sizes = [8, 1], strides = [1, 1]} : vector<8x9xf32> to vector<8x1xf32>
    %cst_332 = arith.constant 0.000000e+00 : f32
    %1264 = vector.shape_cast %1263 : vector<8x1xf32> to vector<8x1xf32>
    %1265 = vector.broadcast %1264 : vector<8x1xf32> to vector<8x8xf32>
    %1266 = vector.broadcast %cst_332 : f32 to vector<8x8xf32>
    %1267 = arith.select %749, %1265, %1266 : vector<8x8xi1>, vector<8x8xf32>
    %1268 = arith.addf %1262, %1267 : vector<8x8xf32>
    %1269 = vector.extract_strided_slice %1261 {offsets = [0, 1], sizes = [8, 1], strides = [1, 1]} : vector<8x9xf32> to vector<8x1xf32>
    %cst_333 = arith.constant 0.000000e+00 : f32
    %1270 = vector.shape_cast %1269 : vector<8x1xf32> to vector<8x1xf32>
    %1271 = vector.broadcast %1270 : vector<8x1xf32> to vector<8x8xf32>
    %1272 = vector.broadcast %cst_333 : f32 to vector<8x8xf32>
    %1273 = arith.select %751, %1271, %1272 : vector<8x8xi1>, vector<8x8xf32>
    %1274 = arith.addf %1268, %1273 : vector<8x8xf32>
    %1275 = vector.extract_strided_slice %1261 {offsets = [0, 2], sizes = [8, 1], strides = [1, 1]} : vector<8x9xf32> to vector<8x1xf32>
    %cst_334 = arith.constant 0.000000e+00 : f32
    %1276 = vector.shape_cast %1275 : vector<8x1xf32> to vector<8x1xf32>
    %1277 = vector.broadcast %1276 : vector<8x1xf32> to vector<8x8xf32>
    %1278 = vector.broadcast %cst_334 : f32 to vector<8x8xf32>
    %1279 = arith.select %753, %1277, %1278 : vector<8x8xi1>, vector<8x8xf32>
    %1280 = arith.addf %1274, %1279 : vector<8x8xf32>
    %1281 = vector.extract_strided_slice %1261 {offsets = [0, 3], sizes = [8, 1], strides = [1, 1]} : vector<8x9xf32> to vector<8x1xf32>
    %cst_335 = arith.constant 0.000000e+00 : f32
    %1282 = vector.shape_cast %1281 : vector<8x1xf32> to vector<8x1xf32>
    %1283 = vector.broadcast %1282 : vector<8x1xf32> to vector<8x8xf32>
    %1284 = vector.broadcast %cst_335 : f32 to vector<8x8xf32>
    %1285 = arith.select %755, %1283, %1284 : vector<8x8xi1>, vector<8x8xf32>
    %1286 = arith.addf %1280, %1285 : vector<8x8xf32>
    %1287 = vector.extract_strided_slice %1261 {offsets = [0, 4], sizes = [8, 1], strides = [1, 1]} : vector<8x9xf32> to vector<8x1xf32>
    %cst_336 = arith.constant 0.000000e+00 : f32
    %1288 = vector.shape_cast %1287 : vector<8x1xf32> to vector<8x1xf32>
    %1289 = vector.broadcast %1288 : vector<8x1xf32> to vector<8x8xf32>
    %1290 = vector.broadcast %cst_336 : f32 to vector<8x8xf32>
    %1291 = arith.select %757, %1289, %1290 : vector<8x8xi1>, vector<8x8xf32>
    %1292 = arith.addf %1286, %1291 : vector<8x8xf32>
    %1293 = vector.extract_strided_slice %1261 {offsets = [0, 5], sizes = [8, 1], strides = [1, 1]} : vector<8x9xf32> to vector<8x1xf32>
    %cst_337 = arith.constant 0.000000e+00 : f32
    %1294 = vector.shape_cast %1293 : vector<8x1xf32> to vector<8x1xf32>
    %1295 = vector.broadcast %1294 : vector<8x1xf32> to vector<8x8xf32>
    %1296 = vector.broadcast %cst_337 : f32 to vector<8x8xf32>
    %1297 = arith.select %759, %1295, %1296 : vector<8x8xi1>, vector<8x8xf32>
    %1298 = arith.addf %1292, %1297 : vector<8x8xf32>
    %1299 = vector.extract_strided_slice %1261 {offsets = [0, 6], sizes = [8, 1], strides = [1, 1]} : vector<8x9xf32> to vector<8x1xf32>
    %cst_338 = arith.constant 0.000000e+00 : f32
    %1300 = vector.shape_cast %1299 : vector<8x1xf32> to vector<8x1xf32>
    %1301 = vector.broadcast %1300 : vector<8x1xf32> to vector<8x8xf32>
    %1302 = vector.broadcast %cst_338 : f32 to vector<8x8xf32>
    %1303 = arith.select %761, %1301, %1302 : vector<8x8xi1>, vector<8x8xf32>
    %1304 = arith.addf %1298, %1303 : vector<8x8xf32>
    %1305 = vector.extract_strided_slice %1261 {offsets = [0, 7], sizes = [8, 1], strides = [1, 1]} : vector<8x9xf32> to vector<8x1xf32>
    %cst_339 = arith.constant 0.000000e+00 : f32
    %1306 = vector.shape_cast %1305 : vector<8x1xf32> to vector<8x1xf32>
    %1307 = vector.broadcast %1306 : vector<8x1xf32> to vector<8x8xf32>
    %1308 = vector.broadcast %cst_339 : f32 to vector<8x8xf32>
    %1309 = arith.select %763, %1307, %1308 : vector<8x8xi1>, vector<8x8xf32>
    %1310 = arith.addf %1304, %1309 : vector<8x8xf32>
    %1311 = vector.extract_strided_slice %1261 {offsets = [0, 8], sizes = [8, 1], strides = [1, 1]} : vector<8x9xf32> to vector<8x1xf32>
    %cst_340 = arith.constant 0.000000e+00 : f32
    %1312 = vector.shape_cast %1311 : vector<8x1xf32> to vector<8x1xf32>
    %1313 = vector.broadcast %1312 : vector<8x1xf32> to vector<8x8xf32>
    %1314 = vector.broadcast %cst_340 : f32 to vector<8x8xf32>
    %1315 = arith.select %765, %1313, %1314 : vector<8x8xi1>, vector<8x8xf32>
    %1316 = arith.addf %1310, %1315 : vector<8x8xf32>
    %1317 = arith.addf %1260, %1316 : vector<8x8xf32>
    %cst_341 = arith.constant -1.000000e+10 : f32
    %1318 = vector.broadcast %cst_341 : f32 to vector<8x8xf32>
    %1319 = arith.select %767, %1318, %1317 : vector<8x8xi1>, vector<8x8xf32>
    %cst_342 = arith.constant dense<0xFF800000> : vector<8xf32>
    %1320 = vector.multi_reduction <maximumf>, %1319, %cst_342 [1] : vector<8x8xf32> to vector<8xf32>
    %1321 = vector.shape_cast %1320 : vector<8xf32> to vector<8x1xf32>
    %1322 = vector.broadcast %1321 : vector<8x1xf32> to vector<8x8xf32>
    %1323 = arith.subf %1319, %1322 : vector<8x8xf32>
    %1324 = math.exp %1323 : vector<8x8xf32>
    %cst_343 = arith.constant dense<0.000000e+00> : vector<8xf32>
    %1325 = vector.multi_reduction <add>, %1324, %cst_343 [1] : vector<8x8xf32> to vector<8xf32>
    %1326 = vector.shape_cast %1325 : vector<8xf32> to vector<8x1xf32>
    %1327 = tpu.reciprocal %1326 {approx = true} : vector<8x1xf32> -> vector<8x1xf32>
    %1328 = vector.broadcast %1327 : vector<8x1xf32> to vector<8x8xf32>
    %1329 = arith.mulf %1324, %1328 : vector<8x8xf32>
    %cst_344 = arith.constant dense<0.000000e+00> : vector<8x8xf32>
    %1330 = tpu.matmul %1329, %1259, %cst_344 {dimension_numbers = #tpu.dot_dimension_numbers<[1], [0], [0], [1], [0, 0, 1, 1], [], []>} : vector<8x8xf32>, vector<8x8xf32>, vector<8x8xf32> -> vector<8x8xf32>
    %cst_345 = arith.constant 0.000000e+00 : f32
    %1331 = vector.broadcast %cst_345 : f32 to vector<8x8xf32>
    %cst_346 = arith.constant 0.000000e+00 : f32
    %1332 = vector.broadcast %cst_346 : f32 to vector<8x8xf32>
    %1333 = arith.select %749, %1329, %1332 : vector<8x8xi1>, vector<8x8xf32>
    %cst_347 = arith.constant dense<0.000000e+00> : vector<8xf32>
    %1334 = vector.multi_reduction <add>, %1333, %cst_347 [1] : vector<8x8xf32> to vector<8xf32>
    %1335 = vector.shape_cast %1334 : vector<8xf32> to vector<8x1xf32>
    %1336 = vector.extract_strided_slice %732 {offsets = [0, 0], sizes = [1, 8], strides = [1, 1]} : vector<9x8xf32> to vector<1x8xf32>
    %1337 = vector.broadcast %1335 : vector<8x1xf32> to vector<8x8xf32>
    %1338 = vector.broadcast %1336 : vector<1x8xf32> to vector<8x8xf32>
    %1339 = arith.mulf %1337, %1338 : vector<8x8xf32>
    %1340 = arith.addf %1331, %1339 : vector<8x8xf32>
    %cst_348 = arith.constant 0.000000e+00 : f32
    %1341 = vector.broadcast %cst_348 : f32 to vector<8x8xf32>
    %1342 = arith.select %751, %1329, %1341 : vector<8x8xi1>, vector<8x8xf32>
    %cst_349 = arith.constant dense<0.000000e+00> : vector<8xf32>
    %1343 = vector.multi_reduction <add>, %1342, %cst_349 [1] : vector<8x8xf32> to vector<8xf32>
    %1344 = vector.shape_cast %1343 : vector<8xf32> to vector<8x1xf32>
    %1345 = vector.extract_strided_slice %732 {offsets = [1, 0], sizes = [1, 8], strides = [1, 1]} : vector<9x8xf32> to vector<1x8xf32>
    %1346 = vector.broadcast %1344 : vector<8x1xf32> to vector<8x8xf32>
    %1347 = vector.broadcast %1345 : vector<1x8xf32> to vector<8x8xf32>
    %1348 = arith.mulf %1346, %1347 : vector<8x8xf32>
    %1349 = arith.addf %1340, %1348 : vector<8x8xf32>
    %cst_350 = arith.constant 0.000000e+00 : f32
    %1350 = vector.broadcast %cst_350 : f32 to vector<8x8xf32>
    %1351 = arith.select %753, %1329, %1350 : vector<8x8xi1>, vector<8x8xf32>
    %cst_351 = arith.constant dense<0.000000e+00> : vector<8xf32>
    %1352 = vector.multi_reduction <add>, %1351, %cst_351 [1] : vector<8x8xf32> to vector<8xf32>
    %1353 = vector.shape_cast %1352 : vector<8xf32> to vector<8x1xf32>
    %1354 = vector.extract_strided_slice %732 {offsets = [2, 0], sizes = [1, 8], strides = [1, 1]} : vector<9x8xf32> to vector<1x8xf32>
    %1355 = vector.broadcast %1353 : vector<8x1xf32> to vector<8x8xf32>
    %1356 = vector.broadcast %1354 : vector<1x8xf32> to vector<8x8xf32>
    %1357 = arith.mulf %1355, %1356 : vector<8x8xf32>
    %1358 = arith.addf %1349, %1357 : vector<8x8xf32>
    %cst_352 = arith.constant 0.000000e+00 : f32
    %1359 = vector.broadcast %cst_352 : f32 to vector<8x8xf32>
    %1360 = arith.select %755, %1329, %1359 : vector<8x8xi1>, vector<8x8xf32>
    %cst_353 = arith.constant dense<0.000000e+00> : vector<8xf32>
    %1361 = vector.multi_reduction <add>, %1360, %cst_353 [1] : vector<8x8xf32> to vector<8xf32>
    %1362 = vector.shape_cast %1361 : vector<8xf32> to vector<8x1xf32>
    %1363 = vector.extract_strided_slice %732 {offsets = [3, 0], sizes = [1, 8], strides = [1, 1]} : vector<9x8xf32> to vector<1x8xf32>
    %1364 = vector.broadcast %1362 : vector<8x1xf32> to vector<8x8xf32>
    %1365 = vector.broadcast %1363 : vector<1x8xf32> to vector<8x8xf32>
    %1366 = arith.mulf %1364, %1365 : vector<8x8xf32>
    %1367 = arith.addf %1358, %1366 : vector<8x8xf32>
    %cst_354 = arith.constant 0.000000e+00 : f32
    %1368 = vector.broadcast %cst_354 : f32 to vector<8x8xf32>
    %1369 = arith.select %757, %1329, %1368 : vector<8x8xi1>, vector<8x8xf32>
    %cst_355 = arith.constant dense<0.000000e+00> : vector<8xf32>
    %1370 = vector.multi_reduction <add>, %1369, %cst_355 [1] : vector<8x8xf32> to vector<8xf32>
    %1371 = vector.shape_cast %1370 : vector<8xf32> to vector<8x1xf32>
    %1372 = vector.extract_strided_slice %732 {offsets = [4, 0], sizes = [1, 8], strides = [1, 1]} : vector<9x8xf32> to vector<1x8xf32>
    %1373 = vector.broadcast %1371 : vector<8x1xf32> to vector<8x8xf32>
    %1374 = vector.broadcast %1372 : vector<1x8xf32> to vector<8x8xf32>
    %1375 = arith.mulf %1373, %1374 : vector<8x8xf32>
    %1376 = arith.addf %1367, %1375 : vector<8x8xf32>
    %cst_356 = arith.constant 0.000000e+00 : f32
    %1377 = vector.broadcast %cst_356 : f32 to vector<8x8xf32>
    %1378 = arith.select %759, %1329, %1377 : vector<8x8xi1>, vector<8x8xf32>
    %cst_357 = arith.constant dense<0.000000e+00> : vector<8xf32>
    %1379 = vector.multi_reduction <add>, %1378, %cst_357 [1] : vector<8x8xf32> to vector<8xf32>
    %1380 = vector.shape_cast %1379 : vector<8xf32> to vector<8x1xf32>
    %1381 = vector.extract_strided_slice %732 {offsets = [5, 0], sizes = [1, 8], strides = [1, 1]} : vector<9x8xf32> to vector<1x8xf32>
    %1382 = vector.broadcast %1380 : vector<8x1xf32> to vector<8x8xf32>
    %1383 = vector.broadcast %1381 : vector<1x8xf32> to vector<8x8xf32>
    %1384 = arith.mulf %1382, %1383 : vector<8x8xf32>
    %1385 = arith.addf %1376, %1384 : vector<8x8xf32>
    %cst_358 = arith.constant 0.000000e+00 : f32
    %1386 = vector.broadcast %cst_358 : f32 to vector<8x8xf32>
    %1387 = arith.select %761, %1329, %1386 : vector<8x8xi1>, vector<8x8xf32>
    %cst_359 = arith.constant dense<0.000000e+00> : vector<8xf32>
    %1388 = vector.multi_reduction <add>, %1387, %cst_359 [1] : vector<8x8xf32> to vector<8xf32>
    %1389 = vector.shape_cast %1388 : vector<8xf32> to vector<8x1xf32>
    %1390 = vector.extract_strided_slice %732 {offsets = [6, 0], sizes = [1, 8], strides = [1, 1]} : vector<9x8xf32> to vector<1x8xf32>
    %1391 = vector.broadcast %1389 : vector<8x1xf32> to vector<8x8xf32>
    %1392 = vector.broadcast %1390 : vector<1x8xf32> to vector<8x8xf32>
    %1393 = arith.mulf %1391, %1392 : vector<8x8xf32>
    %1394 = arith.addf %1385, %1393 : vector<8x8xf32>
    %cst_360 = arith.constant 0.000000e+00 : f32
    %1395 = vector.broadcast %cst_360 : f32 to vector<8x8xf32>
    %1396 = arith.select %763, %1329, %1395 : vector<8x8xi1>, vector<8x8xf32>
    %cst_361 = arith.constant dense<0.000000e+00> : vector<8xf32>
    %1397 = vector.multi_reduction <add>, %1396, %cst_361 [1] : vector<8x8xf32> to vector<8xf32>
    %1398 = vector.shape_cast %1397 : vector<8xf32> to vector<8x1xf32>
    %1399 = vector.extract_strided_slice %732 {offsets = [7, 0], sizes = [1, 8], strides = [1, 1]} : vector<9x8xf32> to vector<1x8xf32>
    %1400 = vector.broadcast %1398 : vector<8x1xf32> to vector<8x8xf32>
    %1401 = vector.broadcast %1399 : vector<1x8xf32> to vector<8x8xf32>
    %1402 = arith.mulf %1400, %1401 : vector<8x8xf32>
    %1403 = arith.addf %1394, %1402 : vector<8x8xf32>
    %cst_362 = arith.constant 0.000000e+00 : f32
    %1404 = vector.broadcast %cst_362 : f32 to vector<8x8xf32>
    %1405 = arith.select %765, %1329, %1404 : vector<8x8xi1>, vector<8x8xf32>
    %cst_363 = arith.constant dense<0.000000e+00> : vector<8xf32>
    %1406 = vector.multi_reduction <add>, %1405, %cst_363 [1] : vector<8x8xf32> to vector<8xf32>
    %1407 = vector.shape_cast %1406 : vector<8xf32> to vector<8x1xf32>
    %1408 = vector.extract_strided_slice %732 {offsets = [8, 0], sizes = [1, 8], strides = [1, 1]} : vector<9x8xf32> to vector<1x8xf32>
    %1409 = vector.broadcast %1407 : vector<8x1xf32> to vector<8x8xf32>
    %1410 = vector.broadcast %1408 : vector<1x8xf32> to vector<8x8xf32>
    %1411 = arith.mulf %1409, %1410 : vector<8x8xf32>
    %1412 = arith.addf %1403, %1411 : vector<8x8xf32>
    %1413 = arith.addf %1330, %1412 : vector<8x8xf32>
    %1414 = vector.extract_strided_slice %730 {offsets = [24, 0], sizes = [8, 32], strides = [1, 1]} : vector<32x32xf32> to vector<8x32xf32>
    %cst_364 = arith.constant dense<0.000000e+00> : vector<8x32xf32>
    %1415 = tpu.matmul %1413, %1414, %cst_364 {dimension_numbers = #tpu.dot_dimension_numbers<[1], [0], [0], [1], [0, 0, 1, 1], [], []>} : vector<8x8xf32>, vector<8x32xf32>, vector<8x32xf32> -> vector<8x32xf32>
    %1416 = arith.addf %1254, %1415 : vector<8x32xf32>
    %1417 = vector.broadcast %731 : vector<1x32xf32> to vector<8x32xf32>
    %1418 = arith.addf %1416, %1417 : vector<8x32xf32>
    %1419 = tpu.concatenate %844, %1006, %1168, %1330 in 1 : vector<8x8xf32>, vector<8x8xf32>, vector<8x8xf32>, vector<8x8xf32> -> vector<8x32xf32>
    %c0_365 = arith.constant 0 : index
    %c0_366 = arith.constant 0 : index
    %c0_367 = arith.constant 0 : index
    %1420 = vector.load %arg30[%c0_365, %c0_366, %c0_367] : memref<1x8x32xf32, #tpu.memory_space<vmem>>, vector<1x8x32xf32>
    %1421 = vector.shape_cast %1420 : vector<1x8x32xf32> to vector<8x32xf32>
    %1422 = vector.shape_cast %1419 : vector<8x32xf32> to vector<1x8x32xf32>
    tpu.vector_store %arg30[%c0_365, %c0_366, %c0_367], %1422 {strides = array<i32>} : memref<1x8x32xf32, #tpu.memory_space<vmem>>, vector<1x8x32xf32>,
    %1423 = arith.addf %1418, %725 : vector<8x32xf32>
    %c0_368 = arith.constant 0 : index
    %c0_369 = arith.constant 0 : index
    %1424 = vector.load %arg21[%c0_368, %c0_369] : memref<1x32xf32, #tpu.memory_space<vmem>>, vector<1x32xf32>
    %c0_370 = arith.constant 0 : index
    %c0_371 = arith.constant 0 : index
    %1425 = vector.load %arg22[%c0_370, %c0_371] : memref<1x32xf32, #tpu.memory_space<vmem>>, vector<1x32xf32>
    %cst_372 = arith.constant dense<0.000000e+00> : vector<8xf32>
    %1426 = vector.multi_reduction <add>, %1423, %cst_372 [1] : vector<8x32xf32> to vector<8xf32>
    %1427 = vector.shape_cast %1426 : vector<8xf32> to vector<8x1xf32>
    %cst_373 = arith.constant 3.200000e+01 : f32
    %1428 = vector.broadcast %cst_373 : f32 to vector<8x1xf32>
    %1429 = arith.divf %1427, %1428 : vector<8x1xf32>
    %1430 = vector.broadcast %1429 : vector<8x1xf32> to vector<8x32xf32>
    %1431 = arith.subf %1423, %1430 : vector<8x32xf32>
    %1432 = arith.mulf %1431, %1431 : vector<8x32xf32>
    %cst_374 = arith.constant dense<0.000000e+00> : vector<8xf32>
    %1433 = vector.multi_reduction <add>, %1432, %cst_374 [1] : vector<8x32xf32> to vector<8xf32>
    %1434 = vector.shape_cast %1433 : vector<8xf32> to vector<8x1xf32>
    %cst_375 = arith.constant 3.200000e+01 : f32
    %1435 = vector.broadcast %cst_375 : f32 to vector<8x1xf32>
    %1436 = arith.divf %1434, %1435 : vector<8x1xf32>
    %1437 = vector.broadcast %1429 : vector<8x1xf32> to vector<8x32xf32>
    %1438 = arith.subf %1423, %1437 : vector<8x32xf32>
    %cst_376 = arith.constant 9.99999974E-6 : f32
    %1439 = vector.broadcast %cst_376 : f32 to vector<8x1xf32>
    %1440 = arith.addf %1436, %1439 : vector<8x1xf32>
    %1441 = math.rsqrt %1440 : vector<8x1xf32>
    %1442 = vector.broadcast %1441 : vector<8x1xf32> to vector<8x32xf32>
    %1443 = arith.mulf %1438, %1442 : vector<8x32xf32>
    %1444 = vector.broadcast %1424 : vector<1x32xf32> to vector<8x32xf32>
    %1445 = arith.mulf %1443, %1444 : vector<8x32xf32>
    %1446 = vector.broadcast %1425 : vector<1x32xf32> to vector<8x32xf32>
    %1447 = arith.addf %1445, %1446 : vector<8x32xf32>
    %c0_377 = arith.constant 0 : index
    %c0_378 = arith.constant 0 : index
    %1448 = vector.load %arg23[%c0_377, %c0_378] : memref<32x64xf32, #tpu.memory_space<vmem>>, vector<32x64xf32>
    %cst_379 = arith.constant dense<0.000000e+00> : vector<8x64xf32>
    %1449 = tpu.matmul %1447, %1448, %cst_379 {dimension_numbers = #tpu.dot_dimension_numbers<[1], [0], [0], [1], [0, 0, 1, 1], [], []>} : vector<8x32xf32>, vector<32x64xf32>, vector<8x64xf32> -> vector<8x64xf32>
    %c0_380 = arith.constant 0 : index
    %c0_381 = arith.constant 0 : index
    %1450 = vector.load %arg24[%c0_380, %c0_381] : memref<1x64xf32, #tpu.memory_space<vmem>>, vector<1x64xf32>
    %1451 = vector.broadcast %1450 : vector<1x64xf32> to vector<8x64xf32>
    %1452 = arith.addf %1449, %1451 : vector<8x64xf32>
    %cst_382 = arith.constant 0.000000e+00 : f32
    %1453 = vector.broadcast %cst_382 : f32 to vector<8x64xf32>
    %1454 = arith.maximumf %1452, %1453 : vector<8x64xf32>
    %c0_383 = arith.constant 0 : index
    %c0_384 = arith.constant 0 : index
    %1455 = vector.load %arg25[%c0_383, %c0_384] : memref<64x32xf32, #tpu.memory_space<vmem>>, vector<64x32xf32>
    %cst_385 = arith.constant dense<0.000000e+00> : vector<8x32xf32>
    %1456 = tpu.matmul %1454, %1455, %cst_385 {dimension_numbers = #tpu.dot_dimension_numbers<[1], [0], [0], [1], [0, 0, 1, 1], [], []>} : vector<8x64xf32>, vector<64x32xf32>, vector<8x32xf32> -> vector<8x32xf32>
    %c0_386 = arith.constant 0 : index
    %c0_387 = arith.constant 0 : index
    %1457 = vector.load %arg26[%c0_386, %c0_387] : memref<1x32xf32, #tpu.memory_space<vmem>>, vector<1x32xf32>
    %1458 = vector.broadcast %1457 : vector<1x32xf32> to vector<8x32xf32>
    %1459 = arith.addf %1456, %1458 : vector<8x32xf32>
    %1460 = arith.addf %1459, %1447 : vector<8x32xf32>
    %c0_388 = arith.constant 0 : index
    %c0_389 = arith.constant 0 : index
    %1461 = vector.load %arg27[%c0_388, %c0_389] : memref<1x32xf32, #tpu.memory_space<vmem>>, vector<1x32xf32>
    %c0_390 = arith.constant 0 : index
    %c0_391 = arith.constant 0 : index
    %1462 = vector.load %arg28[%c0_390, %c0_391] : memref<1x32xf32, #tpu.memory_space<vmem>>, vector<1x32xf32>
    %cst_392 = arith.constant dense<0.000000e+00> : vector<8xf32>
    %1463 = vector.multi_reduction <add>, %1460, %cst_392 [1] : vector<8x32xf32> to vector<8xf32>
    %1464 = vector.shape_cast %1463 : vector<8xf32> to vector<8x1xf32>
    %cst_393 = arith.constant 3.200000e+01 : f32
    %1465 = vector.broadcast %cst_393 : f32 to vector<8x1xf32>
    %1466 = arith.divf %1464, %1465 : vector<8x1xf32>
    %1467 = vector.broadcast %1466 : vector<8x1xf32> to vector<8x32xf32>
    %1468 = arith.subf %1460, %1467 : vector<8x32xf32>
    %1469 = arith.mulf %1468, %1468 : vector<8x32xf32>
    %cst_394 = arith.constant dense<0.000000e+00> : vector<8xf32>
    %1470 = vector.multi_reduction <add>, %1469, %cst_394 [1] : vector<8x32xf32> to vector<8xf32>
    %1471 = vector.shape_cast %1470 : vector<8xf32> to vector<8x1xf32>
    %cst_395 = arith.constant 3.200000e+01 : f32
    %1472 = vector.broadcast %cst_395 : f32 to vector<8x1xf32>
    %1473 = arith.divf %1471, %1472 : vector<8x1xf32>
    %1474 = vector.broadcast %1466 : vector<8x1xf32> to vector<8x32xf32>
    %1475 = arith.subf %1460, %1474 : vector<8x32xf32>
    %cst_396 = arith.constant 9.99999974E-6 : f32
    %1476 = vector.broadcast %cst_396 : f32 to vector<8x1xf32>
    %1477 = arith.addf %1473, %1476 : vector<8x1xf32>
    %1478 = math.rsqrt %1477 : vector<8x1xf32>
    %1479 = vector.broadcast %1478 : vector<8x1xf32> to vector<8x32xf32>
    %1480 = arith.mulf %1475, %1479 : vector<8x32xf32>
    %1481 = vector.broadcast %1461 : vector<1x32xf32> to vector<8x32xf32>
    %1482 = arith.mulf %1480, %1481 : vector<8x32xf32>
    %1483 = vector.broadcast %1462 : vector<1x32xf32> to vector<8x32xf32>
    %1484 = arith.addf %1482, %1483 : vector<8x32xf32>
    %c0_397 = arith.constant 0 : index
    %c0_398 = arith.constant 0 : index
    %c0_399 = arith.constant 0 : index
    %1485 = vector.load %arg29[%c0_397, %c0_398, %c0_399] : memref<1x8x32xf32, #tpu.memory_space<vmem>>, vector<1x8x32xf32>
    %1486 = vector.shape_cast %1485 : vector<1x8x32xf32> to vector<8x32xf32>
    %1487 = vector.shape_cast %1484 : vector<8x32xf32> to vector<1x8x32xf32>
    tpu.vector_store %arg29[%c0_397, %c0_398, %c0_399], %1487 {strides = array<i32>} : memref<1x8x32xf32, #tpu.memory_space<vmem>>, vector<1x8x32xf32>,
    return
  }
  func.func @transform_0(%arg0: i32) -> (i32, i32, i32) {
    %c0_i32 = arith.constant 0 : i32
    %c0_i32_0 = arith.constant 0 : i32
    %c0_i32_1 = arith.constant 0 : i32
    return %arg0, %c0_i32, %c0_i32_0 : i32, i32, i32
  }
  func.func @transform_1(%arg0: i32) -> (i32, i32, i32) {
    %c0_i32 = arith.constant 0 : i32
    %c0_i32_0 = arith.constant 0 : i32
    %c0_i32_1 = arith.constant 0 : i32
    return %arg0, %c0_i32, %c0_i32_0 : i32, i32, i32
  }
  func.func @transform_2(%arg0: i32) -> (i32, i32, i32) {
    %c0_i32 = arith.constant 0 : i32
    %c0_i32_0 = arith.constant 0 : i32
    %c0_i32_1 = arith.constant 0 : i32
    return %arg0, %c0_i32, %c0_i32_0 : i32, i32, i32
  }
  func.func @transform_3(%arg0: i32) -> (i32, i32, i32) {
    %c0_i32 = arith.constant 0 : i32
    %c0_i32_0 = arith.constant 0 : i32
    %c0_i32_1 = arith.constant 0 : i32
    return %arg0, %c0_i32, %c0_i32_0 : i32, i32, i32
  }
  func.func @transform_4(%arg0: i32) -> (i32, i32) {
    %c0_i32 = arith.constant 0 : i32
    %c0_i32_0 = arith.constant 0 : i32
    %c0_i32_1 = arith.constant 0 : i32
    return %c0_i32, %c0_i32_0 : i32, i32
  }
  func.func @transform_5(%arg0: i32) -> (i32, i32) {
    %c0_i32 = arith.constant 0 : i32
    %c0_i32_0 = arith.constant 0 : i32
    %c0_i32_1 = arith.constant 0 : i32
    return %c0_i32, %c0_i32_0 : i32, i32
  }
  func.func @transform_6(%arg0: i32) -> (i32, i32) {
    %c0_i32 = arith.constant 0 : i32
    %c0_i32_0 = arith.constant 0 : i32
    %c0_i32_1 = arith.constant 0 : i32
    return %c0_i32, %c0_i32_0 : i32, i32
  }
  func.func @transform_7(%arg0: i32) -> (i32, i32) {
    %c0_i32 = arith.constant 0 : i32
    %c0_i32_0 = arith.constant 0 : i32
    %c0_i32_1 = arith.constant 0 : i32
    return %c0_i32, %c0_i32_0 : i32, i32
  }
  func.func @transform_8(%arg0: i32) -> (i32, i32) {
    %c0_i32 = arith.constant 0 : i32
    %c0_i32_0 = arith.constant 0 : i32
    %c0_i32_1 = arith.constant 0 : i32
    return %c0_i32, %c0_i32_0 : i32, i32
  }
  func.func @transform_9(%arg0: i32) -> (i32, i32) {
    %c0_i32 = arith.constant 0 : i32
    %c0_i32_0 = arith.constant 0 : i32
    %c0_i32_1 = arith.constant 0 : i32
    return %c0_i32, %c0_i32_0 : i32, i32
  }
  func.func @transform_10(%arg0: i32) -> (i32, i32) {
    %c0_i32 = arith.constant 0 : i32
    %c0_i32_0 = arith.constant 0 : i32
    %c0_i32_1 = arith.constant 0 : i32
    return %c0_i32, %c0_i32_0 : i32, i32
  }
  func.func @transform_11(%arg0: i32) -> (i32, i32) {
    %c0_i32 = arith.constant 0 : i32
    %c0_i32_0 = arith.constant 0 : i32
    %c0_i32_1 = arith.constant 0 : i32
    return %c0_i32, %c0_i32_0 : i32, i32
  }
  func.func @transform_12(%arg0: i32) -> (i32, i32) {
    %c0_i32 = arith.constant 0 : i32
    %c0_i32_0 = arith.constant 0 : i32
    %c0_i32_1 = arith.constant 0 : i32
    return %c0_i32, %c0_i32_0 : i32, i32
  }
  func.func @transform_13(%arg0: i32) -> (i32, i32) {
    %c0_i32 = arith.constant 0 : i32
    %c0_i32_0 = arith.constant 0 : i32
    %c0_i32_1 = arith.constant 0 : i32
    return %c0_i32, %c0_i32_0 : i32, i32
  }
  func.func @transform_14(%arg0: i32) -> (i32, i32) {
    %c0_i32 = arith.constant 0 : i32
    %c0_i32_0 = arith.constant 0 : i32
    %c0_i32_1 = arith.constant 0 : i32
    return %c0_i32, %c0_i32_0 : i32, i32
  }
  func.func @transform_15(%arg0: i32) -> (i32, i32) {
    %c0_i32 = arith.constant 0 : i32
    %c0_i32_0 = arith.constant 0 : i32
    %c0_i32_1 = arith.constant 0 : i32
    return %c0_i32, %c0_i32_0 : i32, i32
  }
  func.func @transform_16(%arg0: i32) -> (i32, i32) {
    %c0_i32 = arith.constant 0 : i32
    %c0_i32_0 = arith.constant 0 : i32
    %c0_i32_1 = arith.constant 0 : i32
    return %c0_i32, %c0_i32_0 : i32, i32
  }
  func.func @transform_17(%arg0: i32) -> (i32, i32) {
    %c0_i32 = arith.constant 0 : i32
    %c0_i32_0 = arith.constant 0 : i32
    %c0_i32_1 = arith.constant 0 : i32
    return %c0_i32, %c0_i32_0 : i32, i32
  }
  func.func @transform_18(%arg0: i32) -> (i32, i32) {
    %c0_i32 = arith.constant 0 : i32
    %c0_i32_0 = arith.constant 0 : i32
    %c0_i32_1 = arith.constant 0 : i32
    return %c0_i32, %c0_i32_0 : i32, i32
  }
  func.func @transform_19(%arg0: i32) -> (i32, i32) {
    %c0_i32 = arith.constant 0 : i32
    %c0_i32_0 = arith.constant 0 : i32
    %c0_i32_1 = arith.constant 0 : i32
    return %c0_i32, %c0_i32_0 : i32, i32
  }
  func.func @transform_20(%arg0: i32) -> (i32, i32) {
    %c0_i32 = arith.constant 0 : i32
    %c0_i32_0 = arith.constant 0 : i32
    %c0_i32_1 = arith.constant 0 : i32
    return %c0_i32, %c0_i32_0 : i32, i32
  }
  func.func @transform_21(%arg0: i32) -> (i32, i32) {
    %c0_i32 = arith.constant 0 : i32
    %c0_i32_0 = arith.constant 0 : i32
    %c0_i32_1 = arith.constant 0 : i32
    return %c0_i32, %c0_i32_0 : i32, i32
  }
  func.func @transform_22(%arg0: i32) -> (i32, i32) {
    %c0_i32 = arith.constant 0 : i32
    %c0_i32_0 = arith.constant 0 : i32
    %c0_i32_1 = arith.constant 0 : i32
    return %c0_i32, %c0_i32_0 : i32, i32
  }
  func.func @transform_23(%arg0: i32) -> (i32, i32) {
    %c0_i32 = arith.constant 0 : i32
    %c0_i32_0 = arith.constant 0 : i32
    %c0_i32_1 = arith.constant 0 : i32
    return %c0_i32, %c0_i32_0 : i32, i32
  }
  func.func @transform_24(%arg0: i32) -> (i32, i32) {
    %c0_i32 = arith.constant 0 : i32
    %c0_i32_0 = arith.constant 0 : i32
    %c0_i32_1 = arith.constant 0 : i32
    return %c0_i32, %c0_i32_0 : i32, i32
  }
  func.func @transform_25(%arg0: i32) -> (i32, i32) {
    %c0_i32 = arith.constant 0 : i32
    %c0_i32_0 = arith.constant 0 : i32
    %c0_i32_1 = arith.constant 0 : i32
    return %c0_i32, %c0_i32_0 : i32, i32
  }
  func.func @transform_26(%arg0: i32) -> (i32, i32) {
    %c0_i32 = arith.constant 0 : i32
    %c0_i32_0 = arith.constant 0 : i32
    %c0_i32_1 = arith.constant 0 : i32
    return %c0_i32, %c0_i32_0 : i32, i32
  }
  func.func @transform_27(%arg0: i32) -> (i32, i32) {
    %c0_i32 = arith.constant 0 : i32
    %c0_i32_0 = arith.constant 0 : i32
    %c0_i32_1 = arith.constant 0 : i32
    return %c0_i32, %c0_i32_0 : i32, i32
  }
  func.func @transform_28(%arg0: i32) -> (i32, i32, i32) {
    %c0_i32 = arith.constant 0 : i32
    %c0_i32_0 = arith.constant 0 : i32
    %c0_i32_1 = arith.constant 0 : i32
    return %arg0, %c0_i32, %c0_i32_0 : i32, i32, i32
  }
  func.func @transform_29(%arg0: i32) -> (i32, i32, i32) {
    %c0_i32 = arith.constant 0 : i32
    %c0_i32_0 = arith.constant 0 : i32
    %c0_i32_1 = arith.constant 0 : i32
    return %arg0, %c0_i32, %c0_i32_0 : i32, i32, i32
  }
}

</mosaic_0001>

<bundles_post_ra>
// kernel: decoder_layer.1
= control target key start
LH: loop header
LB: loop body
LE: loop exit
PB: predicated region body
PF: predicated region fallthrough
CT: control target
= control target key end

     0   :  { %s6021_s6 = smov 1   ;;  %s6022_s10 = smov 2   ;;  %s7384_s0 = inlined_call_operand.smem [shape: u32[30], index: -1, kind: input, shape index: {}] }
   0x1   :  { %s6081_s5 = sld [smem:[%s7384_s0]]   ;;  %s6023_s14 = smov 3  }
   0x2   :  { %s6086_s9 = sld [smem:[%s7384_s0 + %s6021_s6]]   ;;  %s6024_s18 = smov 4  }
   0x3   :  { %s6091_s13 = sld [smem:[%s7384_s0 + %s6022_s10]]   ;;  %s6025_s22 = smov 5  }
   0x4   :  { %s6096_s17 = sld [smem:[%s7384_s0 + %s6023_s14]]   ;;  %s6026_s26 = smov 6  }
   0x5   :  { %s6101_s21 = sld [smem:[%s7384_s0 + %s6024_s18]]   ;;  %s6027_s30 = smov 7  }
   0x6   :  { %s6106_s25 = sld [smem:[%s7384_s0 + %s6025_s22]]   ;;  %s6028_s4 = smov 8  }
   0x7   :  { %7402 = sst [smem:[#allocation5_spill]] %s6081_s5  ;;  %s6029_s10 = smov 9  }
   0x8   :  { %7403 = sst [smem:[#allocation6_spill]] %s6086_s9  ;;  %s6030_s15 = smov 10  }
   0x9   :  { %s6111_s29 = sld [smem:[%s7384_s0 + %s6026_s26]]   ;;  %s6031_s20 = smov 11  }
   0xa   :  { %7404 = sst [smem:[#allocation7_spill]] %s6096_s17  ;;  %s6032_s26 = smov 12  }
   0xb   :  { %s6116_s3 = sld [smem:[%s7384_s0 + %s6027_s30]]   ;;  %s6033_s1 = smov 13  }
   0xc   :  { %s6121_s8 = sld [smem:[%s7384_s0 + %s6028_s4]]   ;;  %s6034_s7 = smov 14  }
   0xd   :  { %s6126_s14 = sld [smem:[%s7384_s0 + %s6029_s10]]   ;;  %s6036_s22 = smov 16  }
   0xe   :  { %s6131_s19 = sld [smem:[%s7384_s0 + %s6030_s15]]   ;;  %s6035_s15 = smov 15  }
   0xf   :  { %s6136_s24 = sld [smem:[%s7384_s0 + %s6031_s20]]   ;;  %s6037_s28 = smov 17  }
  0x10   :  { %s6141_s30 = sld [smem:[%s7384_s0 + %s6032_s26]]  }
  0x11   :  { %7405 = sst [smem:[#allocation8_spill]] %s6116_s3 }
  0x12   :  { %7406 = sst [smem:[#allocation9_spill]] %s6121_s8 }
  0x13   :  { %s6146_s6 = sld [smem:[%s7384_s0 + %s6033_s1]]  }
  0x14   :  { %s6151_s12 = sld [smem:[%s7384_s0 + %s6034_s7]]   ;;  %s6038_s7 = smov 18  }
  0x15   :  { %s6156_s20 = sld [smem:[%s7384_s0 + %s6035_s15]]   ;;  %s6039_s15 = smov 19  }
  0x16   :  { %7407 = sst [smem:[#allocation10_spill]] %s6141_s30 }
  0x17   :  { %s6161_s27 = sld [smem:[%s7384_s0 + %s6036_s22]]   ;;  %s6040_s22 = smov 20  }
  0x18   :  { %s6166_s4 = sld [smem:[%s7384_s0 + %s6037_s28]]   ;;  %s6041_s28 = smov 21  }
  0x19   :  { %7408 = sst [smem:[#allocation11_spill]] %s6146_s6 }
  0x1a   :  { %7409 = sst [smem:[#allocation12_spill]] %s6151_s12 }
  0x1b   :  { %s6171_s17 = sld [smem:[%s7384_s0 + %s6038_s7]]   ;;  %s6042_s7 = smov 22  }
  0x1c   :  { %s6176_s12 = sld [smem:[%s7384_s0 + %s6039_s15]]   ;;  %s6043_s15 = smov 23  }
  0x1d   :  { %7410 = sst [smem:[#allocation13_spill]] %s6161_s27 }
  0x1e   :  { %7411 = sst [smem:[#allocation14_spill]] %s6166_s4 }
  0x1f   :  { %s6181_s27 = sld [smem:[%s7384_s0 + %s6040_s22]]   ;;  %s6044_s22 = smov 24  }
  0x20   :  { %s6186_s4 = sld [smem:[%s7384_s0 + %s6041_s28]]   ;;  %s6045_s28 = smov 25  }
  0x21   :  { %7412 = sst [smem:[#allocation15_spill]] %s6171_s17 }
  0x22   :  { %7413 = sst [smem:[#allocation16_spill]] %s6176_s12 }
  0x23   :  { %s6191_s17 = sld [smem:[%s7384_s0 + %s6042_s7]]   ;;  %s6046_s7 = smov 26  }
  0x24   :  { %s6196_s30 = sld [smem:[%s7384_s0 + %s6043_s15]]   ;;  %s6047_s15 = smov 27  }
  0x25   :  { %7414 = sst [smem:[#allocation17_spill]] %s6181_s27 }
  0x26   :  { %7415 = sst [smem:[#allocation18_spill]] %s6186_s4 }
  0x27   :  { %s6201_s27 = sld [smem:[%s7384_s0 + %s6044_s22]]   ;;  %s6048_s22 = smov 28  }
  0x28   :  { %s6206_s4 = sld [smem:[%s7384_s0 + %s6045_s28]]   ;;  %s6049_s28 = smov 29  }
  0x29   :  { %7416 = sst [smem:[#allocation19_spill]] %s6191_s17 }
  0x2a   :  { %7417 = sst [smem:[#allocation20_spill]] %s6196_s30 }
  0x2b   :  { %s6211_s17 = sld [smem:[%s7384_s0 + %s6046_s7]]  }
  0x2c   :  { %s6216_s30 = sld [smem:[%s7384_s0 + %s6047_s15]]  }
  0x2d   :  { %7418 = sst [smem:[#allocation21_spill]] %s6201_s27 }
  0x2e   :  { %7419 = sst [smem:[#allocation22_spill]] %s6206_s4 }
  0x2f   :  { %s6221_s27 = sld [smem:[%s7384_s0 + %s6048_s22]]  }
  0x30   :  { %s6226_s4 = sld [smem:[%s7384_s0 + %s6049_s28]]  }
  0x36   :  { %7420 = sst [smem:[#allocation23_spill]] %s6226_s4 }
  0x37   :  { %65 = vsyncpa [#allocation3], 0 }
  0x38   :  { %67 = vsyncpa [#allocation3 + $0x1], 0  ;;  %s6228_s7 = smov 0   ;;  %s6230_s10 = smov 0  }
  0x39   :  { %s6232_s11 = smov 0   ;;  %s6234_s15 = smov 0  }
  0x3a LB: > { %s7421_s12 = sld [smem:[#allocation16_spill]]  ;;  %s7422_s8 = sld [smem:[#allocation9_spill]]  ;;  %s6015_s11 = sphi %s6232_s11, %s7453_s11   ;;  %s6011_s10 = sphi %s6230_s10, %s7452_s10   ;;  %s6007_s7 = sphi %s6228_s7, %s7451_s7   ;;  %s6019_s15 = sphi %s6234_s15, %s7454_s15  }
  0x3b   : > { %s7423_s6 = sld [smem:[#allocation11_spill]]  ;;  %s6249_s0 = sadd.s32 4294967295, %s6019_s15  }
  0x3c   : > { %s5235_s16 = sadd.s32 4294967294, %s6019_s15   ;;  %s6253_s18 = sadd.s32 1, %s6019_s15  }
  0x3d   : > { %s688_s22 = sadd.s32 1, %s6015_s11  ;;  %s685_s23 = ssub.s32 %s6019_s15, %s6253_s18 }
  0x3e   : > { %p698_p0 = scmp.ne.s32.totalorder %s6015_s11, %s6011_s10  ;;  %p686_p1 = scmp.eq.s32.totalorder %s685_s23, 0 }
  0x3f   : > { %p699_p2 = scmp.eq.s32.totalorder %s6249_s0, 1  ;;  %p704_p3 = scmp.ne.s32.totalorder %s6011_s10, %s6007_s7 }
  0x40   : > { %p705_p4 = scmp.eq.s32.totalorder %s5235_s16, 1  ;;  %p5238_p7 = scmp.ge.s32.totalorder %s6019_s15, 1 }
  0x41   : > { %s6264_s26 = scalar_select %p686_p1, %s6015_s11, %s688_s22  }
  0x42   : > { %p6266_p5 = por %p699_p2, %p698_p0  ;;  %p6270_p6 = por %p705_p4, %p704_p3 }
  0x43   : > { %p849_p8 = scmp.lt.s32.totalorder %s6019_s15, 3 }
  0x45   : > { %p850_p9 = pnand %p5238_p7, %p849_p8 }
  0x46   : > { %v964_v0 = vld [vmem:[%s6101_s21] sm:$0xff] (!%p850_p9)  ;;  %v965_v1 = vld [vmem:[%s6101_s21 + $0x8] sm:$0xff] (!%p850_p9)  ;;  %v6050_v3 = vmov (!%p850_p9), 0.0|0.0   ;;  %v966_v6 = vld [vmem:[%s6101_s21 + $0x10] sm:$0xff] (!%p850_p9)  ;;  %p940_p10 = scmp.lt.s32.totalorder (!%p850_p9), %s6249_s0, 1  ;;  %s7426_s5 = sld [smem:[#allocation5_spill]] (!%p850_p9)  ;;  %v1137_v41 = vlaneseq (!%p850_p9) }
  0x47   : > { %853 = sbr.rel (%p850_p9) target bundleno = 8515 (0x2143), region = 132  ;;  %v969_v2 = vld [vmem:[%s6111_s29] sm:$0xff] (!%p850_p9)  ;;  %5681 = vmatprep.subr.bf16.mxu0 (!%p850_p9), %v6050_v3  ;;  %v5682_v4 = vpack.c.bf16 (!%p850_p9), %v965_v1, %v964_v0  ;;  %5687 = vmatprep.subr.bf16.mxu1 (!%p850_p9), %v6050_v3  ;;  %v970_v5 = vld [vmem:[%s6111_s29 + $0x8] sm:$0xff] (!%p850_p9)  ;;  %v967_v7 = vld [vmem:[%s6101_s21 + $0x18] sm:$0xff] (!%p850_p9)  ;;  %vm6051_vm0 = vmmov (!%p850_p9), 0   ;;  %v6052_v9 = vmov (!%p850_p9), 0.0  }
  0x48   : > { %v5688_v8 = vpack.c.bf16 (!%p850_p9), %v970_v5, %v969_v2  ;;  %5439 = vmatprep.mubr.msk.f32.mxu0 (!%p850_p9), %vm6051_vm0, %v6052_v9  ;;  %v971_v10 = vld [vmem:[%s6111_s29 + $0x10] sm:$0xff] (!%p850_p9)  ;;  %v972_v11 = vld [vmem:[%s6111_s29 + $0x18] sm:$0xff] (!%p850_p9)  ;;  %5450 = vmatprep.mubr.msk.f32.mxu1 (!%p850_p9), %vm6051_vm0, %v6052_v9  ;;  %v5685_v12 = vpack.c.bf16 (!%p850_p9), %v967_v7, %v966_v6  ;;  %vm987_vm1 = vcmask (!%p850_p9), 261120   ;;  %v6303_v15 = vld [vmem:[%s6131_s19] sm:$0xff] (!%p850_p9)  ;;  %s7427_s3 = sld [smem:[#allocation8_spill]] (!%p850_p9)  ;;  %vm1158_vm2 = vcmask (!%p850_p9), 64512  }
  0x49   : > { %5683 = vmatpush3.bf16.msra.mxu0 (!%p850_p9), %v5682_v4  ;;  %v5691_v13 = vpack.c.bf16 (!%p850_p9), %v972_v11, %v971_v10  ;;  %v6306_v16 = vld [vmem:[%s6131_s19 + $0x8] sm:$0x1] (!%p850_p9)  ;;  %vm6321_vm3 = vmpackc.low (!%p850_p9), %vm1158_vm2, %vm1158_vm2  ;;  %v6053_v19 = vmov (!%p850_p9), 2   ;;  %v6054_v20 = vmov (!%p850_p9), 0   ;;  %v5245_v21 = vld [vmem:[%s6106_s25] ss:$0 sm:$0xff] (!%p850_p9) }
  0x4a   : > { %5684 = vmatprep.subr.bf16.mxu0 (!%p850_p9), %v6050_v3  ;;  %5689 = vmatpush3.bf16.msra.mxu1 (!%p850_p9), %v5688_v8  ;;  %v6315_v17 = vpack.c.bf16 (!%p850_p9), %v6306_v16, %v6303_v15  ;;  %v6055_v33 = vmov (!%p850_p9), 3   ;;  %v6056_v34 = vmov (!%p850_p9), 1   ;;  %v6057_v36 = vmov (!%p850_p9), 4   ;;  %s7388_s23 = smov (!%p850_p9), 120   ;;  %s7431_s9 = sld [smem:[#allocation6_spill]] (!%p850_p9) }
  0x4b   : > { %5690 = vmatprep.subr.bf16.mxu1 (!%p850_p9), %v6050_v3  ;;  %5847 = vset.pattern.permute.xlu1 (!%p850_p9), %v6053_v19  ;;  %v6058_v37 = vmov (!%p850_p9), 5   ;;  %v6059_v38 = vmov (!%p850_p9), 6   ;;  %v6060_v39 = vmov (!%p850_p9), 8   ;;  %v6061_v40 = vmov (!%p850_p9), 7   ;;  %s7450_s4 = sld [smem:[#allocation23_spill]] (!%p850_p9) }
  0x4c   : > { %5845 = vset.pattern.permute.xlu0 (!%p850_p9), %v6054_v20  ;;  %v6365_v42 = vshrl.u32 (!%p850_p9), %v1137_v41, 7  ;;  %v1140_v43 = vand.u32 (!%p850_p9), 127, %v1137_v41 }
  0x4d   : > { %5686 = vmatpush3.bf16.msra.mxu0 (!%p850_p9), %v5685_v12 }
  0x4e   : > { %s941_s2 = scalar_select %p940_p10, %s6249_s0, 1  ;;  %5692 = vmatpush3.bf16.msra.mxu1 %v5691_v13  ;;  %5693 = vmatprep.subr.bf16.mxu0 %v6050_v3  ;;  %v5247_v22 = vld [vmem:[%s7427_s3] ss:$0 sm:$0xff]  ;;  %v1141_v44 = vsub.s32 %v6365_v42, %v1140_v43 }
  0x4f   : > { %5465 = vmatprep.subr.mxu1 %v6052_v9  ;;  %s7394_s3 = smov 80  }
  0x50   : > { %s6294_s16 = sshll.u32 %s941_s2, 3  ;;  %vm1142_vm4 = vcmp.gt.s32.totalorder %v1141_v44, 4294967292 }
  0x51   : > { %s6298_s22 = scalar_lea.vmem %s7426_s5, %s6294_s16  ;;  %v1143_v45 = vsel %vm1142_vm4, %v1141_v44, 4294967292  ;;  %s951_s2 = scalar_lea.vmem %s6091_s13, %s6294_s16 }
  0x52   : > { %v960_v14 = vld [vmem:[%s6298_s22] sm:$0xff]  ;;  %vm1144_vm5 = vcmp.lt.s32.totalorder %v1143_v45, 4  ;;  %s7448_s5 = sld [smem:[#allocation20_spill]] }
  0x53   : > { %5440 = vmatmul.mubr.msk.f32.vlgmr.msra.gmra.mrb[0].mxu0 %vm987_vm1, %v960_v14  ;;  %5451 = vmatmul.mubr.msk.f32.vlgmr.msra.gmra.mrb[0].mxu1 %vm987_vm1, %v960_v14  ;;  %v1145_v46 = vsel %vm1144_vm5, %v1143_v45, 4  ;;  %v6400_v11 = vld [vmem:[%s951_s2] sm:$0xff]  ;;  %s7430_s2 = smov 120   ;;  %vm4828_vm5 = vcmask 195584  }
  0x54   : > { %5457 = vmatprep.mubr.msk.f32.mxu0 %vm6051_vm0, %v6052_v9  ;;  %5467 = vmatprep.mubr.msk.f32.mxu1 %vm6051_vm0, %v6052_v9  ;;  %v6368_v47 = vadd.s32 4, %v1145_v46  ;;  %vm1156_vm15 = vcmp.eq.f32.partialorder %v6400_v11, 0.0 }
  0x56   : > { %5696 = vmatpush3.bf16.xpose.msk.msra.mxu0 %vm6321_vm3, %v6315_v17  ;;  %vm1147_vm6 = vcmp.eq.s32.totalorder %v6368_v47, 0  ;;  %vm1148_vm7 = vcmp.eq.s32.totalorder %v6368_v47, 1  ;;  %vm1149_vm8 = vcmp.eq.s32.totalorder %v6368_v47, 2  ;;  %vm1150_vm9 = vcmp.eq.s32.totalorder %v6368_v47, 3 }
  0x57   : > { %5460 = vmatprep.subr.mxu0 %v6052_v9  ;;  %vm1151_vm10 = vcmp.eq.s32.totalorder %v6368_v47, 4  ;;  %vm1152_vm11 = vcmp.eq.s32.totalorder %v6368_v47, 5  ;;  %vm1153_vm12 = vcmp.eq.s32.totalorder %v6368_v47, 6  ;;  %vm1154_vm13 = vcmp.eq.s32.totalorder %v6368_v47, 7 }
  0x58   : > { %vm1155_vm14 = vcmp.eq.s32.totalorder %v6368_v47, 8 }
 0x126   : > { %v1057_v23 = vpop.f32.mrb[0].mxu0  ;;  %v1133_v26 = vpop.f32.mrb[0].mxu1 }
 0x127   : > { %v1058_v24 = vadd.f32 %v5245_v21, %v1057_v23  ;;  %v5441_v25 = vpop.f32.mrb[1].mxu0  ;;  %v6333_v27 = vadd.f32 %v5247_v22, %v1133_v26  ;;  %v5452_v28 = vpop.f32.mrb[1].mxu1 }
 0x129   : > { %v6335_v29 = vmul.f32 0.35355338, %v1058_v24 }
 0x12b   : > { %5458 = vmatmul.mubr.msk.f32.vlgmr.msra.gmra.mrb[2].mxu0 %vm1158_vm2, %v6335_v29 }
 0x12c   : > { %5461 = vmatpush3.xpose.msk.msra.mxu0 %vm1158_vm2, %v6333_v27  ;;  %5462 = vmatprep.mubr.msk.f32.mxu0 %vm6051_vm0, %v6052_v9 }
 0x12d   : > { %5697 = vmatprep.subr.bf16.mxu0 %v6050_v3 }
 0x12f   : > { %5463 = vmatmul.mubr.msk.f32.vlgmr.msra.gmra.mrb[4].mxu0 %vm1158_vm2, %v6335_v29 }
 0x130   : > { %5700 = vmatpush3.bf16.xpose.msk.msra.mxu0 %vm6321_vm3, %v6315_v17  ;;  %5474 = vmatprep.mubr.msk.f32.mxu0 %vm6051_vm0, %v6052_v9 }
 0x131   : > { %5487 = vmatprep.subr.mxu0 %v6052_v9 }
 0x1fe   : > { %v1234_v30 = vpop.f32.mrb[2].mxu0 }
 0x1ff   : > { %1252 = vperm.xlu1 %5847, %v1234_v30   ;;  %1240 = vperm.xlu0 %5845, %v1234_v30   ;;  %v5459_v31 = vpop.f32.mrb[3].mxu0 }
 0x202   : > { %v6352_v32 = vpop.f32.mrb[4].mxu0 }
 0x203   : > { %5848 = vset.pattern.permute.xlu1 %v6055_v33  ;;  %5846 = vset.pattern.permute.xlu0 %v6056_v34  ;;  %v5464_v35 = vpop.f32.mrb[5].mxu0 }
 0x204   : > { %1258 = vperm.xlu1 %5848, %v1234_v30   ;;  %1246 = vperm.xlu0 %5846, %v1234_v30  }
 0x208   : > { %5849 = vset.pattern.permute.xlu1 %v6057_v36  ;;  %5850 = vset.pattern.permute.xlu0 %v6058_v37 }
 0x209   : > { %1264 = vperm.xlu1 %5849, %v1234_v30   ;;  %1270 = vperm.xlu0 %5850, %v1234_v30  }
 0x20d   : > { %5851 = vset.pattern.permute.xlu1 %v6059_v38  ;;  %5853 = vset.pattern.permute.xlu0 %v6060_v39 }
 0x20e   : > { %1276 = vperm.xlu1 %5851, %v1234_v30   ;;  %1288 = vperm.xlu0 %5853, %v1234_v30  }
 0x212   : > { %5852 = vset.pattern.permute.xlu1 %v6061_v40  ;;  %1544 = vrot.lane.b32.xlu0 %v6335_v29, %s7388_s23  ;;  %s7390_s23 = smov 96  }
 0x213   : > { %1282 = vperm.xlu1 %5852, %v1234_v30   ;;  %5857 = vset.pattern.permute.xlu0 %v6055_v33 }
 0x217   : > { %5854 = vset.pattern.permute.xlu1 %v6054_v20 }
 0x27e   : > { %v1253_v48 = vpop.permute.xlu1 %1252  ;;  %v1241_v49 = vpop.permute.xlu0 %1240 }
 0x27f   : > { %v1243_v52 = vsel %vm1147_vm6, %v1241_v49, 0.0  ;;  %v1255_v55 = vsel %vm1149_vm8, %v1253_v48, 0.0 }
 0x283   : > { %v1259_v50 = vpop.permute.xlu1 %1258  ;;  %v1247_v51 = vpop.permute.xlu0 %1246 }
 0x284   : > { %v1249_v53 = vsel %vm1148_vm7, %v1247_v51, 0.0  ;;  %v1261_v57 = vsel %vm1150_vm9, %v1259_v50, 0.0 }
 0x285   : > { %v1250_v54 = vadd.f32 %v1249_v53, %v1243_v52 }
 0x287   : > { %v1256_v56 = vadd.f32 %v1255_v55, %v1250_v54 }
 0x288   : > { %v1265_v58 = vpop.permute.xlu1 %1264  ;;  %v1271_v59 = vpop.permute.xlu0 %1270 }
 0x289   : > { %v1262_v60 = vadd.f32 %v1261_v57, %v1256_v56  ;;  %v1267_v61 = vsel %vm1151_vm10, %v1265_v58, 0.0  ;;  %v1273_v63 = vsel %vm1152_vm11, %v1271_v59, 0.0 }
 0x28b   : > { %v1268_v62 = vadd.f32 %v1267_v61, %v1262_v60 }
 0x28d   : > { %v1277_v0 = vpop.permute.xlu1 %1276  ;;  %v1289_v1 = vpop.permute.xlu0 %1288  ;;  %v1274_v2 = vadd.f32 %v1273_v63, %v1268_v62 }
 0x28e   : > { %v1279_v4 = vsel %vm1153_vm12, %v1277_v0, 0.0  ;;  %v1291_v12 = vsel %vm1155_vm14, %v1289_v1, 0.0 }
 0x28f   : > { %v1280_v6 = vadd.f32 %v1279_v4, %v1274_v2 }
 0x291   : > { %v1545_v5 = vpop.permute.xlu0 %1544 }
 0x292   : > { %v1283_v7 = vpop.permute.xlu1 %1282  ;;  %5475 = vmatmul.mubr.msk.f32.vlgmr.msra.gmra.mrb[6].mxu0 %vm1158_vm2, %v1545_v5 }
 0x293   : > { %v1285_v8 = vsel %vm1154_vm13, %v1283_v7, 0.0  ;;  %5489 = vmatprep.mubr.msk.f32.mxu0 %vm6051_vm0, %v6052_v9 }
 0x294   : > { %v1286_v10 = vadd.f32 %v1285_v8, %v1280_v6 }
 0x296   : > { %v1292_v13 = vadd.f32 %v1291_v12, %v1286_v10 }
 0x298   : > { %v1363_v14 = vadd.f32 %v6352_v32, %v1292_v13 }
 0x29a   : > { %v1366_v21 = vsel %vm1156_vm15, -1e+10, %v1363_v14 }
 0x29b   : > { %v1367_v22 = vsel %vm1158_vm2, %v1366_v21, -inf }
 0x29c   : > { %1368 = vmax.xlane.f32.xlu1 %v1367_v22 }
 0x2ad   : > { %1468 = vrot.lane.b32.xlu1 %v6333_v27, %s7390_s23  ;;  %s7391_s23 = smov 88  }
 0x329   : > { %v1369_v23 = vpop.xlane.xlu1 %1368 }
 0x32a   : > { %v1370_v24 = vsub.f32 %v1366_v21, %v1369_v23 }
 0x32c   : > { %v1371_v25 = vmul.f32 1.442695, %v1370_v24 }
 0x32d   : > { %v1469_v26 = vpop.permute.xlu1 %1468 }
 0x32e   : > { %5918 = vpow2.f32 %v1371_v25  ;;  %5466 = vmatpush3.msra.mxu1 %v1469_v26 }
 0x32f   : > { %5477 = vmatprep.subr.mxu1 %v6052_v9 }
 0x338   : > { %v5919_v28 = vpop.eup %5918 }
 0x339   : > { %v1373_v30 = vsel %vm1158_vm2, %v5919_v28, 0.0 }
 0x33a   : > { %1374 = vadd.xlane.f32.xlu0 %v1373_v30 }
 0x350   : > { %1673 = vrot.lane.b32.xlu0 %v6333_v27, %s7430_s2 }
 0x365   : > { %v1614_v31 = vpop.f32.mrb[6].mxu0 }
 0x366   : > { %1638 = vperm.xlu0 %5857, %v1614_v31   ;;  %1620 = vperm.xlu1 %5854, %v1614_v31   ;;  %v5476_v32 = vpop.f32.mrb[7].mxu0 }
 0x36a   : > { %5860 = vset.pattern.permute.xlu0 %v6059_v38  ;;  %5855 = vset.pattern.permute.xlu1 %v6056_v34 }
 0x36b   : > { %1656 = vperm.xlu0 %5860, %v1614_v31   ;;  %1626 = vperm.xlu1 %5855, %v1614_v31  }
 0x36f   : > { %5856 = vset.pattern.permute.xlu1 %v6053_v19  ;;  %5864 = vset.pattern.permute.xlu0 %v6056_v34 }
 0x370   : > { %1632 = vperm.xlu1 %5856, %v1614_v31  }
 0x374   : > { %5858 = vset.pattern.permute.xlu1 %v6057_v36 }
 0x375   : > { %1644 = vperm.xlu1 %5858, %v1614_v31  }
 0x379   : > { %5859 = vset.pattern.permute.xlu1 %v6058_v37 }
 0x37a   : > { %1650 = vperm.xlu1 %5859, %v1614_v31  }
 0x37e   : > { %5861 = vset.pattern.permute.xlu1 %v6061_v40 }
 0x37f   : > { %1662 = vperm.xlu1 %5861, %v1614_v31  }
 0x383   : > { %5862 = vset.pattern.permute.xlu1 %v6060_v39 }
 0x384   : > { %1668 = vperm.xlu1 %5862, %v1614_v31  }
 0x388   : > { %5863 = vset.pattern.permute.xlu1 %v6054_v20 }
 0x3c7   : > { %v1375_v35 = vpop.xlane.xlu0 %1374 }
 0x3c8   : > { %5920 = vrcp.f32 %v1375_v35 }
 0x3cb   : > { %v1674_v44 = vpop.permute.xlu0 %1673 }
 0x3d2   : > { %v5921_v41 = vpop.eup %5920 }
 0x3d3   : > { %v6424_v43 = vmul.f32 %v5921_v41, %v5919_v28 }
 0x3d5   : > { %5468 = vmatmul.mubr.msk.f32.vlgmr.msra.gmra.mrb[2].mxu1 %vm1158_vm2, %v6424_v43 }
 0x3d6   : > { %5478 = vmatpush3.xpose.msk.msra.mxu1 %vm1158_vm2, %v1674_v44  ;;  %5479 = vmatprep.mubr.msk.f32.mxu1 %vm6051_vm0, %v6052_v9 }
 0x3d7   : > { %5482 = vmatprep.subr.mxu1 %v6052_v9 }
 0x3d9   : > { %5480 = vmatmul.mubr.msk.f32.vlgmr.msra.gmra.mrb[4].mxu1 %vm1158_vm2, %v1545_v5 }
 0x3da   : > { %5484 = vmatprep.mubr.msk.f32.mxu1 %vm6051_vm0, %v6052_v9 }
 0x3e5   : > { %v1621_v45 = vpop.permute.xlu1 %1620  ;;  %v1639_v54 = vpop.permute.xlu0 %1638 }
 0x3e6   : > { %v1623_v51 = vsel %vm1147_vm6, %v1621_v45, 0.0  ;;  %v1641_v57 = vsel %vm1150_vm9, %v1639_v54, 0.0 }
 0x3ea   : > { %v1627_v46 = vpop.permute.xlu1 %1626  ;;  %v1657_v63 = vpop.permute.xlu0 %1656 }
 0x3eb   : > { %v1629_v49 = vsel %vm1148_vm7, %v1627_v46, 0.0  ;;  %v1659_v1 = vsel %vm1153_vm12, %v1657_v63, 0.0 }
 0x3ec   : > { %v1630_v53 = vadd.f32 %v1629_v49, %v1623_v51  ;;  %v1378_v49 = vsel %vm1147_vm6, %v6424_v43, 0.0 }
 0x3ed   : > { %v1379_v51 = vsel %vm1158_vm2, %v1378_v49, 0.0 }
 0x3ef   : > { %v1633_v48 = vpop.permute.xlu1 %1632 }
 0x3f0   : > { %v1635_v52 = vsel %vm1149_vm8, %v1633_v48, 0.0 }
 0x3f1   : > { %v1636_v55 = vadd.f32 %v1635_v52, %v1630_v53  ;;  %v1398_v53 = vsel %vm1149_vm8, %v6424_v43, 0.0 }
 0x3f3   : > { %v1642_v58 = vadd.f32 %v1641_v57, %v1636_v55  ;;  %v1399_v55 = vsel %vm1158_vm2, %v1398_v53, 0.0  ;;  %v1408_v57 = vsel %vm1150_vm9, %v6424_v43, 0.0 }
 0x3f4   : > { %v1645_v50 = vpop.permute.xlu1 %1644 }
 0x3f5   : > { %v1647_v59 = vsel %vm1151_vm10, %v1645_v50, 0.0 }
 0x3f6   : > { %v1648_v61 = vadd.f32 %v1647_v59, %v1642_v58  ;;  %v1409_v59 = vsel %vm1158_vm2, %v1408_v57, 0.0 }
 0x3f9   : > { %v1651_v56 = vpop.permute.xlu1 %1650 }
 0x3fa   : > { %v1653_v60 = vsel %vm1152_vm11, %v1651_v56, 0.0 }
 0x3fb   : > { %v1654_v0 = vadd.f32 %v1653_v60, %v1648_v61  ;;  %v1418_v61 = vsel %vm1151_vm10, %v6424_v43, 0.0 }
 0x3fc   : > { %v1419_v63 = vsel %vm1158_vm2, %v1418_v61, 0.0 }
 0x3fd   : > { %v1660_v2 = vadd.f32 %v1659_v1, %v1654_v0  ;;  %v1428_v1 = vsel %vm1152_vm11, %v6424_v43, 0.0 }
 0x3fe   : > { %v1663_v62 = vpop.permute.xlu1 %1662 }
 0x3ff   : > { %v1665_v5 = vsel %vm1154_vm13, %v1663_v62, 0.0 }
 0x400   : > { %v1666_v8 = vadd.f32 %v1665_v5, %v1660_v2 }
 0x403   : > { %v1669_v4 = vpop.permute.xlu1 %1668 }
 0x404   : > { %v1671_v6 = vsel %vm1155_vm14, %v1669_v4, 0.0  ;;  %v1429_v4 = vsel %vm1158_vm2, %v1428_v1, 0.0 }
 0x405   : > { %v1672_v12 = vadd.f32 %v1671_v6, %v1666_v8  ;;  %v1438_v6 = vsel %vm1153_vm12, %v6424_v43, 0.0 }
 0x4a8   : > { %v6453_v7 = vpop.f32.mrb[2].mxu1 }
 0x4a9   : > { %v5469_v10 = vpop.f32.mrb[3].mxu1 }
 0x4aa   : > { %v1439_v10 = vsel %vm1158_vm2, %v1438_v6, 0.0  ;;  %v1454_v6 = vsub.s32 7, %v6365_v42 }
 0x4ac   : > { %v1743_v13 = vpop.f32.mrb[4].mxu1 }
 0x4ad   : > { %v1744_v14 = vadd.f32 %v1743_v13, %v1672_v12  ;;  %v5481_v21 = vpop.f32.mrb[5].mxu1  ;;  %v1448_v13 = vsel %vm1154_vm13, %v6424_v43, 0.0 }
 0x4ae   : > { %v1449_v21 = vsel %vm1158_vm2, %v1448_v13, 0.0 }
 0x4af   : > { %v1747_v22 = vsel %vm1156_vm15, -1e+10, %v1744_v14 }
 0x4b0   : > { %v1748_v23 = vsel %vm1158_vm2, %v1747_v22, -inf }
 0x4b1   : > { %1749 = vmax.xlane.f32.xlu0 %v1748_v23  ;;  %v1458_v23 = vsel %vm1155_vm14, %v6424_v43, 0.0 }
 0x4c7   : > { %1813 = vrot.lane.b32.xlu0 %v6333_v27, %s7391_s23  ;;  %s7392_s23 = smov 112  }
 0x53e   : > { %v1750_v24 = vpop.xlane.xlu0 %1749 }
 0x53f   : > { %v1751_v25 = vsub.f32 %v1747_v22, %v1750_v24  ;;  %v1459_v24 = vsel %vm1158_vm2, %v1458_v23, 0.0 }
 0x541   : > { %v1752_v26 = vmul.f32 1.442695, %v1751_v25  ;;  %v975_v25 = vld [vmem:[%s7422_s8 + $0x8] sm:$0xff] }
 0x542   : > { %v1814_v28 = vpop.permute.xlu0 %1813  ;;  %5488 = vmatpush3.msra.mxu0 %v975_v25 }
 0x543   : > { %5922 = vpow2.f32 %v1752_v26  ;;  %5483 = vmatpush3.msra.mxu1 %v1814_v28  ;;  %5701 = vmatprep.subr.bf16.mxu0 %v6050_v3  ;;  %v1388_v26 = vsel %vm1148_vm7, %v6424_v43, 0.0 }
 0x544   : > { %5492 = vmatprep.subr.mxu1 %v6052_v9  ;;  %v1389_v28 = vsel %vm1158_vm2, %v1388_v26, 0.0 }
 0x54d   : > { %v5923_v30 = vpop.eup %5922 }
 0x54e   : > { %v1754_v31 = vsel %vm1158_vm2, %v5923_v30, 0.0 }
 0x54f   : > { %1755 = vadd.xlane.f32.xlu1 %v1754_v31 }
 0x5dc   : > { %v1756_v32 = vpop.xlane.xlu1 %1755 }
 0x5dd   : > { %5924 = vrcp.f32 %v1756_v32 }
 0x5e7   : > { %v5925_v35 = vpop.eup %5924 }
 0x5e8   : > { %v1758_v41 = vmul.f32 %v5925_v35, %v5923_v30  ;;  %v974_v30 = vld [vmem:[%s7422_s8] sm:$0xff] }
 0x5ea   : > { %5485 = vmatmul.mubr.msk.f32.vlgmr.msra.gmra.mrb[6].mxu1 %vm1158_vm2, %v1758_v41  ;;  %v1789_v44 = vsel %vm1152_vm11, %v1758_v41, 0.0  ;;  %v1759_v45 = vsel %vm1147_vm6, %v1758_v41, 0.0  ;;  %v1765_v50 = vsel %vm1148_vm7, %v1758_v41, 0.0  ;;  %v1771_v54 = vsel %vm1149_vm8, %v1758_v41, 0.0 }
 0x5eb   : > { %v1790_v46 = vsel %vm1158_vm2, %v1789_v44, 0.0  ;;  %v1760_v48 = vsel %vm1158_vm2, %v1759_v45, 0.0  ;;  %5494 = vmatprep.mubr.msk.f32.mxu1 %vm6051_vm0, %v6052_v9  ;;  %v1766_v52 = vsel %vm1158_vm2, %v1765_v50, 0.0  ;;  %v1772_v56 = vsel %vm1158_vm2, %v1771_v54, 0.0  ;;  %5493 = vmatpush3.msra.mxu1 %v974_v30 }
 0x5ec   : > { %1791 = vadd.xlane.f32.xlu0 %v1790_v46  ;;  %1761 = vadd.xlane.f32.xlu1 %v1760_v48  ;;  %v1777_v58 = vsel %vm1150_vm9, %v1758_v41, 0.0  ;;  %v1783_v62 = vsel %vm1151_vm10, %v1758_v41, 0.0  ;;  %v1795_v2 = vsel %vm1153_vm12, %v1758_v41, 0.0  ;;  %v1801_v8 = vsel %vm1154_vm13, %v1758_v41, 0.0 }
 0x5ed   : > { %v1778_v60 = vsel %vm1158_vm2, %v1777_v58, 0.0  ;;  %v1784_v0 = vsel %vm1158_vm2, %v1783_v62, 0.0  ;;  %v1796_v5 = vsel %vm1158_vm2, %v1795_v2, 0.0  ;;  %v1802_v12 = vsel %vm1158_vm2, %v1801_v8, 0.0  ;;  %5504 = vmatprep.subr.mxu1 %v6052_v9 }
 0x5ee   : > { %v1807_v14 = vsel %vm1155_vm14, %v1758_v41, 0.0  ;;  %v1394_v44 = vsub.s32 1, %v6365_v42  ;;  %v6538_v45 = vsub.s32 0, %v6365_v42  ;;  %v1404_v46 = vsub.s32 2, %v6365_v42 }
 0x5ef   : > { %v1808_v22 = vsel %vm1158_vm2, %v1807_v14, 0.0  ;;  %v1414_v48 = vsub.s32 3, %v6365_v42  ;;  %v1444_v2 = vsub.s32 6, %v6365_v42 }
 0x5f0   : > { %1380 = vadd.xlane.f32.xlu0 %v1379_v51  ;;  %1767 = vadd.xlane.f32.xlu1 %v1766_v52  ;;  %v6544_v43 = vrot.slane %v6303_v15, %v1394_v44  ;;  %v6549_v50 = vrot.slane %v6303_v15, %v6538_v45  ;;  %v6554_v51 = vrot.slane %v6303_v15, %v1404_v46  ;;  %v1424_v52 = vsub.s32 4, %v6365_v42 }
 0x5f2   : > { %v6568_v58 = vrot.slane %v6303_v15, %v1424_v52 }
 0x5f4   : > { %1400 = vadd.xlane.f32.xlu0 %v1399_v55  ;;  %1773 = vadd.xlane.f32.xlu1 %v1772_v56  ;;  %v6561_v55 = vrot.slane %v6303_v15, %v1414_v48 }
 0x5f8   : > { %1410 = vadd.xlane.f32.xlu0 %v1409_v59  ;;  %1779 = vadd.xlane.f32.xlu1 %v1778_v60  ;;  %v1434_v60 = vsub.s32 5, %v6365_v42 }
 0x5fc   : > { %1420 = vadd.xlane.f32.xlu0 %v1419_v63  ;;  %1785 = vadd.xlane.f32.xlu1 %v1784_v0 }
 0x600   : > { %1430 = vadd.xlane.f32.xlu0 %v1429_v4  ;;  %1797 = vadd.xlane.f32.xlu1 %v1796_v5  ;;  %v6577_v4 = vrot.slane %v6303_v15, %v1434_v60 }
 0x604   : > { %1440 = vadd.xlane.f32.xlu0 %v1439_v10  ;;  %1803 = vadd.xlane.f32.xlu1 %v1802_v12  ;;  %v6583_v12 = vrot.slane %v6303_v15, %v1444_v2 }
 0x608   : > { %1450 = vadd.xlane.f32.xlu0 %v1449_v21  ;;  %1809 = vadd.xlane.f32.xlu1 %v1808_v22  ;;  %v6589_v21 = vrot.slane %v6303_v15, %v1454_v6 }
 0x60c   : > { %1460 = vadd.xlane.f32.xlu0 %v1459_v24  ;;  %v6594_v24 = vrot.slane %v6306_v16, %v6538_v45 }
 0x619   : > { %2035 = vrot.lane.b32.xlu1 %v6335_v29, %s7392_s23 }
 0x622   : > { %2164 = vrot.lane.b32.xlu0 %v6333_v27, %s7392_s23  ;;  %s7396_s23 = smov 104  }
 0x63d   : > { %1390 = vadd.xlane.f32.xlu1 %v1389_v28 }
 0x679   : > { %v1762_v31 = vpop.xlane.xlu1 %1761  ;;  %v1792_v53 = vpop.xlane.xlu0 %1791 }
 0x67a   : > { %v1763_v56 = vmul.f32 %v1762_v31, %v6549_v50  ;;  %v1793_v13 = vmul.f32 %v1792_v53, %v6577_v4 }
 0x67d   : > { %v1768_v32 = vpop.xlane.xlu1 %1767  ;;  %v1381_v63 = vpop.xlane.xlu0 %1380 }
 0x67e   : > { %v1769_v54 = vmul.f32 %v1768_v32, %v6544_v43 }
 0x680   : > { %v1770_v61 = vadd.f32 %v1769_v54, %v1763_v56 }
 0x681   : > { %v1774_v35 = vpop.xlane.xlu1 %1773  ;;  %v1401_v14 = vpop.xlane.xlu0 %1400 }
 0x682   : > { %v1775_v57 = vmul.f32 %v1774_v35, %v6554_v51 }
 0x684   : > { %v1776_v0 = vadd.f32 %v1775_v57, %v1770_v61 }
 0x685   : > { %v1780_v41 = vpop.xlane.xlu1 %1779  ;;  %v1411_v28 = vpop.xlane.xlu0 %1410 }
 0x686   : > { %v1781_v62 = vmul.f32 %v1780_v41, %v6561_v55 }
 0x688   : > { %v1782_v5 = vadd.f32 %v1781_v62, %v1776_v0  ;;  %v1406_v62 = vmul.f32 %v6554_v51, %v1401_v14 }
 0x689   : > { %v1786_v49 = vpop.xlane.xlu1 %1785 }
 0x68a   : > { %v1787_v1 = vmul.f32 %v1786_v49, %v6568_v58  ;;  %v1421_v49 = vpop.xlane.xlu0 %1420 }
 0x68c   : > { %v1788_v10 = vadd.f32 %v1787_v1, %v1782_v5  ;;  %v1416_v1 = vmul.f32 %v6561_v55, %v1411_v28 }
 0x68d   : > { %v1798_v59 = vpop.xlane.xlu1 %1797 }
 0x68e   : > { %v1794_v22 = vadd.f32 %v1793_v13, %v1788_v10  ;;  %v1799_v23 = vmul.f32 %v1798_v59, %v6583_v12  ;;  %v1431_v16 = vpop.xlane.xlu0 %1430  ;;  %v1386_v59 = vmul.f32 %v6549_v50, %v1381_v63  ;;  %v1426_v10 = vmul.f32 %v6568_v58, %v1421_v49 }
 0x690   : > { %v1800_v30 = vadd.f32 %v1799_v23, %v1794_v22  ;;  %v1436_v22 = vmul.f32 %v6577_v4, %v1431_v16 }
 0x691   : > { %v1804_v8 = vpop.xlane.xlu1 %1803 }
 0x692   : > { %v1805_v26 = vmul.f32 %v1804_v8, %v6589_v21  ;;  %v1441_v56 = vpop.xlane.xlu0 %1440 }
 0x694   : > { %v1806_v32 = vadd.f32 %v1805_v26, %v1800_v30 }
 0x695   : > { %v1810_v25 = vpop.xlane.xlu1 %1809 }
 0x696   : > { %v1811_v31 = vmul.f32 %v1810_v25, %v6594_v24  ;;  %v1451_v8 = vpop.xlane.xlu0 %1450  ;;  %v1446_v25 = vmul.f32 %v6583_v12, %v1441_v56 }
 0x697   : > { %v1456_v63 = vmul.f32 %v6589_v21, %v1451_v8 }
 0x698   : > { %v1812_v35 = vadd.f32 %v1811_v31, %v1806_v32 }
 0x699   : > { %v2036_v54 = vpop.permute.xlu1 %2035 }
 0x69a   : > { %v1461_v30 = vpop.xlane.xlu0 %1460 }
 0x69b   : > { %v1466_v14 = vmul.f32 %v6594_v24, %v1461_v30 }
 0x6bd   : > { %v1885_v41 = vpop.f32.mrb[6].mxu1 }
 0x6be   : > { %v1886_v15 = vadd.f32 %v1885_v41, %v1812_v35  ;;  %v5486_v53 = vpop.f32.mrb[7].mxu1  ;;  %v2165_v41 = vpop.permute.xlu0 %2164 }
 0x6c0   : > { %5490 = vmatmul.mubr.msk.f32.vlgmr.msra.gmra.mrb[8].mxu0 %vm1158_vm2, %v1886_v15 }
 0x6c1   : > { %5704 = vmatpush3.bf16.xpose.msk.msra.mxu0 %vm6321_vm3, %v6315_v17  ;;  %5501 = vmatprep.mubr.msk.f32.mxu0 %vm6051_vm0, %v6052_v9 }
 0x6c2   : > { %5514 = vmatprep.subr.mxu0 %v6052_v9 }
 0x6c8   : > { %5502 = vmatmul.mubr.msk.f32.vlgmr.msra.gmra.mrb[10].mxu0 %vm1158_vm2, %v2036_v54 }
 0x6c9   : > { %5516 = vmatprep.mubr.msk.f32.mxu0 %vm6051_vm0, %v6052_v9 }
 0x6ca   : > { %v1391_v57 = vpop.xlane.xlu1 %1390 }
 0x6cb   : > { %v1396_v61 = vmul.f32 %v6544_v43, %v1391_v57 }
 0x6cd   : > { %v1397_v0 = vadd.f32 %v1396_v61, %v1386_v59 }
 0x6cf   : > { %v1407_v5 = vadd.f32 %v1406_v62, %v1397_v0 }
 0x6d1   : > { %v1417_v13 = vadd.f32 %v1416_v1, %v1407_v5 }
 0x6d3   : > { %v1427_v23 = vadd.f32 %v1426_v10, %v1417_v13 }
 0x6d5   : > { %v1437_v26 = vadd.f32 %v1436_v22, %v1427_v23 }
 0x6d7   : > { %v1447_v31 = vadd.f32 %v1446_v25, %v1437_v26 }
 0x6d9   : > { %v1457_v32 = vadd.f32 %v1456_v63, %v1447_v31 }
 0x6db   : > { %v1467_v35 = vadd.f32 %v1466_v14, %v1457_v32 }
 0x6dd   : > { %v1541_v28 = vadd.f32 %v6453_v7, %v1467_v35 }
 0x6df   : > { %5495 = vmatmul.mubr.msk.f32.vlgmr.msra.gmra.mrb[8].mxu1 %vm1158_vm2, %v1541_v28 }
 0x6e0   : > { %5505 = vmatpush3.xpose.msk.msra.mxu1 %vm1158_vm2, %v2165_v41  ;;  %5506 = vmatprep.mubr.msk.f32.mxu1 %vm6051_vm0, %v6052_v9 }
 0x6e1   : > { %5509 = vmatprep.subr.mxu1 %v6052_v9 }
 0x6e3   : > { %5507 = vmatmul.mubr.msk.f32.vlgmr.msra.gmra.mrb[10].mxu1 %vm1158_vm2, %v2036_v54 }
 0x6e4   : > { %5511 = vmatprep.mubr.msk.f32.mxu1 %vm6051_vm0, %v6052_v9 }
 0x793   : > { %v1958_v49 = vpop.f32.mrb[8].mxu0 }
 0x794   : > { %v5491_v15 = vpop.f32.mrb[9].mxu0 }
 0x79b   : > { %v2105_v53 = vpop.f32.mrb[10].mxu0 }
 0x79c   : > { %2117 = vperm.xlu0 %5864, %v2105_v53   ;;  %2111 = vperm.xlu1 %5863, %v2105_v53   ;;  %v5503_v7 = vpop.f32.mrb[11].mxu0 }
 0x7a0   : > { %5867 = vset.pattern.permute.xlu0 %v6057_v36  ;;  %5865 = vset.pattern.permute.xlu1 %v6053_v19 }
 0x7a1   : > { %2135 = vperm.xlu0 %5867, %v2105_v53   ;;  %2123 = vperm.xlu1 %5865, %v2105_v53  }
 0x7a5   : > { %5870 = vset.pattern.permute.xlu0 %v6061_v40  ;;  %5866 = vset.pattern.permute.xlu1 %v6055_v33 }
 0x7a6   : > { %2153 = vperm.xlu0 %5870, %v2105_v53   ;;  %2129 = vperm.xlu1 %5866, %v2105_v53  }
 0x7aa   : > { %5868 = vset.pattern.permute.xlu1 %v6058_v37  ;;  %5872 = vset.pattern.permute.xlu0 %v6054_v20 }
 0x7ab   : > { %2141 = vperm.xlu1 %5868, %v2105_v53  }
 0x7af   : > { %5869 = vset.pattern.permute.xlu1 %v6059_v38 }
 0x7b0   : > { %2147 = vperm.xlu1 %5869, %v2105_v53  }
 0x7b2   : > { %v2031_v16 = vpop.f32.mrb[8].mxu1 }
 0x7b3   : > { %v6633_v54 = vadd.f32 %v2031_v16, %v1958_v49  ;;  %v5496_v56 = vpop.f32.mrb[9].mxu1 }
 0x7b4   : > { %5871 = vset.pattern.permute.xlu1 %v6060_v39 }
 0x7b5   : > { %2159 = vperm.xlu1 %5871, %v2105_v53  }
 0x7b6   : > { %v2234_v57 = vpop.f32.mrb[10].mxu1 }
 0x7b7   : > { %v5508_v59 = vpop.f32.mrb[11].mxu1 }
 0x7b9   : > { %5873 = vset.pattern.permute.xlu1 %v6056_v34 }
 0x81b   : > { %v2112_v61 = vpop.permute.xlu1 %2111  ;;  %v2118_v62 = vpop.permute.xlu0 %2117 }
 0x81c   : > { %v2120_v0 = vsel %vm1148_vm7, %v2118_v62, 0.0  ;;  %v2114_v1 = vsel %vm1147_vm6, %v2112_v61, 0.0 }
 0x81d   : > { %v2121_v10 = vadd.f32 %v2120_v0, %v2114_v1 }
 0x820   : > { %v2124_v5 = vpop.permute.xlu1 %2123  ;;  %v2136_v25 = vpop.permute.xlu0 %2135 }
 0x821   : > { %v2126_v8 = vsel %vm1149_vm8, %v2124_v5, 0.0  ;;  %v2138_v30 = vsel %vm1151_vm10, %v2136_v25, 0.0 }
 0x822   : > { %v2127_v13 = vadd.f32 %v2126_v8, %v2121_v10 }
 0x825   : > { %v2130_v22 = vpop.permute.xlu1 %2129  ;;  %v2154_v32 = vpop.permute.xlu0 %2153 }
 0x826   : > { %v2132_v23 = vsel %vm1150_vm9, %v2130_v22, 0.0  ;;  %v2156_v15 = vsel %vm1154_vm13, %v2154_v32, 0.0 }
 0x827   : > { %v2133_v26 = vadd.f32 %v2132_v23, %v2127_v13 }
 0x829   : > { %v2139_v31 = vadd.f32 %v2138_v30, %v2133_v26 }
 0x82a   : > { %v2142_v63 = vpop.permute.xlu1 %2141 }
 0x82b   : > { %v2144_v14 = vsel %vm1152_vm11, %v2142_v63, 0.0 }
 0x82c   : > { %v2145_v35 = vadd.f32 %v2144_v14, %v2139_v31 }
 0x82f   : > { %v2148_v28 = vpop.permute.xlu1 %2147 }
 0x830   : > { %v2150_v41 = vsel %vm1153_vm12, %v2148_v28, 0.0 }
 0x831   : > { %v2151_v49 = vadd.f32 %v2150_v41, %v2145_v35 }
 0x833   : > { %v2157_v53 = vadd.f32 %v2156_v15, %v2151_v49 }
 0x834   : > { %v2160_v7 = vpop.permute.xlu1 %2159 }
 0x835   : > { %v2162_v16 = vsel %vm1155_vm14, %v2160_v7, 0.0 }
 0x836   : > { %v2163_v56 = vadd.f32 %v2162_v16, %v2157_v53 }
 0x838   : > { %v2235_v59 = vadd.f32 %v2234_v57, %v2163_v56 }
 0x83a   : > { %v2238_v61 = vsel %vm1156_vm15, -1e+10, %v2235_v59 }
 0x83b   : > { %v2239_v62 = vsel %vm1158_vm2, %v2238_v61, -inf }
 0x83c   : > { %2240 = vmax.xlane.f32.xlu1 %v2239_v62 }
 0x84d   : > { %2454 = vrot.lane.b32.xlu1 %v6335_v29, %s7396_s23 }
 0x8c9   : > { %v2241_v0 = vpop.xlane.xlu1 %2240 }
 0x8ca   : > { %v2242_v1 = vsub.f32 %v2238_v61, %v2241_v0  ;;  %v976_v61 = vld [vmem:[%s7422_s8 + $0x10] sm:$0xff] }
 0x8cb   : > { %5515 = vmatpush3.msra.mxu0 %v976_v61 }
 0x8cc   : > { %v2243_v5 = vmul.f32 1.442695, %v2242_v1  ;;  %5526 = vmatprep.subr.mxu0 %v6052_v9 }
 0x8cd   : > { %v2455_v28 = vpop.permute.xlu1 %2454 }
 0x8ce   : > { %5926 = vpow2.f32 %v2243_v5 }
 0x8d8   : > { %v5927_v8 = vpop.eup %5926 }
 0x8d9   : > { %v2245_v10 = vsel %vm1158_vm2, %v5927_v8, 0.0 }
 0x8da   : > { %2246 = vadd.xlane.f32.xlu0 %v2245_v10 }
 0x8f0   : > { %2304 = vrot.lane.b32.xlu0 %v6333_v27, %s7394_s3  ;;  %s7395_s3 = smov 72  }
 0x967   : > { %v2247_v57 = vpop.xlane.xlu0 %2246 }
 0x968   : > { %5928 = vrcp.f32 %v2247_v57 }
 0x96b   : > { %v2305_v13 = vpop.permute.xlu0 %2304 }
 0x96c   : > { %5510 = vmatpush3.msra.mxu1 %v2305_v13 }
 0x96d   : > { %5705 = vmatprep.subr.bf16.mxu1 %v6050_v3 }
 0x972   : > { %v5929_v22 = vpop.eup %5928 }
 0x973   : > { %v2249_v29 = vmul.f32 %v5929_v22, %v5927_v8 }
 0x975   : > { %5512 = vmatmul.mubr.msk.f32.vlgmr.msra.gmra.mrb[12].mxu1 %vm1158_vm2, %v2249_v29  ;;  %v2256_v23 = vsel %vm1148_vm7, %v2249_v29, 0.0  ;;  %v2250_v25 = vsel %vm1147_vm6, %v2249_v29, 0.0  ;;  %v2262_v63 = vsel %vm1149_vm8, %v2249_v29, 0.0  ;;  %v2268_v31 = vsel %vm1150_vm9, %v2249_v29, 0.0 }
 0x976   : > { %5708 = vmatpush3.bf16.xpose.msk.msra.mxu1 %vm6321_vm3, %v6315_v17  ;;  %v2257_v26 = vsel %vm1158_vm2, %v2256_v23, 0.0  ;;  %v2251_v30 = vsel %vm1158_vm2, %v2250_v25, 0.0  ;;  %5523 = vmatprep.mubr.msk.f32.mxu1 %vm6051_vm0, %v6052_v9  ;;  %v2263_v14 = vsel %vm1158_vm2, %v2262_v63, 0.0  ;;  %v2269_v17 = vsel %vm1158_vm2, %v2268_v31, 0.0 }
 0x977   : > { %2258 = vadd.xlane.f32.xlu0 %v2257_v26  ;;  %2252 = vadd.xlane.f32.xlu1 %v2251_v30  ;;  %v2274_v32 = vsel %vm1151_vm10, %v2249_v29, 0.0  ;;  %v2280_v35 = vsel %vm1152_vm11, %v2249_v29, 0.0  ;;  %v2286_v15 = vsel %vm1153_vm12, %v2249_v29, 0.0  ;;  %v2292_v53 = vsel %vm1154_vm13, %v2249_v29, 0.0 }
 0x978   : > { %5536 = vmatprep.subr.mxu1 %v6052_v9  ;;  %v2275_v41 = vsel %vm1158_vm2, %v2274_v32, 0.0  ;;  %v2281_v49 = vsel %vm1158_vm2, %v2280_v35, 0.0  ;;  %v2287_v7 = vsel %vm1158_vm2, %v2286_v15, 0.0  ;;  %v2293_v16 = vsel %vm1158_vm2, %v2292_v53, 0.0 }
 0x979   : > { %v2298_v56 = vsel %vm1155_vm14, %v2249_v29, 0.0 }
 0x97a   : > { %v2299_v59 = vsel %vm1158_vm2, %v2298_v56, 0.0 }
 0x97b   : > { %2264 = vadd.xlane.f32.xlu0 %v2263_v14  ;;  %2270 = vadd.xlane.f32.xlu1 %v2269_v17 }
 0x97d   : > { %5524 = vmatmul.mubr.msk.f32.vlgmr.msra.gmra.mrb[14].mxu1 %vm1158_vm2, %v2455_v28 }
 0x97e   : > { %5538 = vmatprep.mubr.msk.f32.mxu1 %vm6051_vm0, %v6052_v9 }
 0x97f   : > { %2276 = vadd.xlane.f32.xlu0 %v2275_v41  ;;  %2282 = vadd.xlane.f32.xlu1 %v2281_v49 }
 0x983   : > { %2288 = vadd.xlane.f32.xlu0 %v2287_v7  ;;  %2294 = vadd.xlane.f32.xlu1 %v2293_v16 }
 0x987   : > { %2300 = vadd.xlane.f32.xlu0 %v2299_v59 }
 0x994   : > { %2583 = vrot.lane.b32.xlu1 %v6333_v27, %s7396_s23  ;;  %s7433_s23 = sld [smem:[#allocation13_spill]] }
 0xa04   : > { %v2259_v62 = vpop.xlane.xlu0 %2258  ;;  %v2253_v0 = vpop.xlane.xlu1 %2252 }
 0xa05   : > { %v2260_v5 = vmul.f32 %v2259_v62, %v6544_v43  ;;  %v2254_v8 = vmul.f32 %v2253_v0, %v6549_v50 }
 0xa07   : > { %v2261_v57 = vadd.f32 %v2260_v5, %v2254_v8 }
 0xa08   : > { %v2265_v1 = vpop.xlane.xlu0 %2264  ;;  %v2271_v13 = vpop.xlane.xlu1 %2270 }
 0xa09   : > { %v2266_v10 = vmul.f32 %v2265_v1, %v6554_v51  ;;  %v2272_v23 = vmul.f32 %v2271_v13, %v6561_v55 }
 0xa0b   : > { %v2267_v22 = vadd.f32 %v2266_v10, %v2261_v57 }
 0xa0c   : > { %v2277_v29 = vpop.xlane.xlu0 %2276  ;;  %v2283_v30 = vpop.xlane.xlu1 %2282 }
 0xa0d   : > { %v2273_v25 = vadd.f32 %v2272_v23, %v2267_v22  ;;  %v2278_v26 = vmul.f32 %v2277_v29, %v6568_v58  ;;  %v2284_v14 = vmul.f32 %v2283_v30, %v6577_v4 }
 0xa0f   : > { %v2279_v63 = vadd.f32 %v2278_v26, %v2273_v25 }
 0xa10   : > { %v2289_v31 = vpop.xlane.xlu0 %2288  ;;  %v2295_v35 = vpop.xlane.xlu1 %2294 }
 0xa11   : > { %v2285_v17 = vadd.f32 %v2284_v14, %v2279_v63  ;;  %v2290_v32 = vmul.f32 %v2289_v31, %v6583_v12  ;;  %v2296_v15 = vmul.f32 %v2295_v35, %v6589_v21 }
 0xa13   : > { %v2291_v41 = vadd.f32 %v2290_v32, %v2285_v17 }
 0xa14   : > { %v2301_v49 = vpop.xlane.xlu0 %2300  ;;  %v2584_v62 = vpop.permute.xlu1 %2583 }
 0xa15   : > { %v2297_v53 = vadd.f32 %v2296_v15, %v2291_v41  ;;  %v2302_v7 = vmul.f32 %v2301_v49, %v6594_v24 }
 0xa17   : > { %v2303_v16 = vadd.f32 %v2302_v7, %v2297_v53 }
 0xa48   : > { %v2376_v56 = vpop.f32.mrb[12].mxu1 }
 0xa49   : > { %v2377_v59 = vadd.f32 %v2376_v56, %v2303_v16  ;;  %v5513_v61 = vpop.f32.mrb[13].mxu1 }
 0xa4b   : > { %5517 = vmatmul.mubr.msk.f32.vlgmr.msra.gmra.mrb[12].mxu0 %vm1158_vm2, %v2377_v59 }
 0xa4c   : > { %5527 = vmatpush3.xpose.msk.msra.mxu0 %vm1158_vm2, %v2584_v62  ;;  %5528 = vmatprep.mubr.msk.f32.mxu0 %vm6051_vm0, %v6052_v9 }
 0xa4d   : > { %5531 = vmatprep.subr.mxu0 %v6052_v9 }
 0xa4f   : > { %5529 = vmatmul.mubr.msk.f32.vlgmr.msra.gmra.mrb[14].mxu0 %vm1158_vm2, %v2455_v28 }
 0xa50   : > { %v2524_v0 = vpop.f32.mrb[14].mxu1  ;;  %5533 = vmatprep.mubr.msk.f32.mxu0 %vm6051_vm0, %v6052_v9 }
 0xa51   : > { %2536 = vperm.xlu1 %5873, %v2524_v0   ;;  %2530 = vperm.xlu0 %5872, %v2524_v0   ;;  %v5525_v1 = vpop.f32.mrb[15].mxu1 }
 0xa55   : > { %5874 = vset.pattern.permute.xlu1 %v6053_v19  ;;  %5882 = vset.pattern.permute.xlu0 %v6056_v34 }
 0xa56   : > { %2542 = vperm.xlu1 %5874, %v2524_v0  }
 0xa5a   : > { %5875 = vset.pattern.permute.xlu1 %v6055_v33 }
 0xa5b   : > { %2548 = vperm.xlu1 %5875, %v2524_v0  }
 0xa5f   : > { %5876 = vset.pattern.permute.xlu1 %v6057_v36 }
 0xa60   : > { %2554 = vperm.xlu1 %5876, %v2524_v0  }
 0xa64   : > { %5877 = vset.pattern.permute.xlu1 %v6058_v37 }
 0xa65   : > { %2560 = vperm.xlu1 %5877, %v2524_v0  }
 0xa69   : > { %5878 = vset.pattern.permute.xlu1 %v6059_v38 }
 0xa6a   : > { %2566 = vperm.xlu1 %5878, %v2524_v0  }
 0xa6e   : > { %5879 = vset.pattern.permute.xlu1 %v6061_v40 }
 0xa6f   : > { %2572 = vperm.xlu1 %5879, %v2524_v0  }
 0xa73   : > { %5880 = vset.pattern.permute.xlu1 %v6060_v39 }
 0xa74   : > { %2578 = vperm.xlu1 %5880, %v2524_v0  }
 0xa78   : > { %5881 = vset.pattern.permute.xlu1 %v6054_v20 }
 0xad0   : > { %v2537_v28 = vpop.permute.xlu1 %2536  ;;  %v2531_v13 = vpop.permute.xlu0 %2530 }
 0xad1   : > { %v2533_v29 = vsel %vm1147_vm6, %v2531_v13, 0.0  ;;  %v2539_v23 = vsel %vm1148_vm7, %v2537_v28, 0.0 }
 0xad2   : > { %v2540_v26 = vadd.f32 %v2539_v23, %v2533_v29 }
 0xad5   : > { %v2543_v5 = vpop.permute.xlu1 %2542 }
 0xad6   : > { %v2545_v25 = vsel %vm1149_vm8, %v2543_v5, 0.0 }
 0xad7   : > { %v2546_v63 = vadd.f32 %v2545_v25, %v2540_v26 }
 0xada   : > { %v2549_v8 = vpop.permute.xlu1 %2548 }
 0xadb   : > { %v2551_v30 = vsel %vm1150_vm9, %v2549_v8, 0.0 }
 0xadc   : > { %v2552_v17 = vadd.f32 %v2551_v30, %v2546_v63 }
 0xadf   : > { %v2555_v10 = vpop.permute.xlu1 %2554 }
 0xae0   : > { %v2557_v14 = vsel %vm1151_vm10, %v2555_v10, 0.0 }
 0xae1   : > { %v2558_v35 = vadd.f32 %v2557_v14, %v2552_v17 }
 0xae4   : > { %v2561_v57 = vpop.permute.xlu1 %2560 }
 0xae5   : > { %v2563_v32 = vsel %vm1152_vm11, %v2561_v57, 0.0 }
 0xae6   : > { %v2564_v49 = vadd.f32 %v2563_v32, %v2558_v35 }
 0xae9   : > { %v2567_v22 = vpop.permute.xlu1 %2566 }
 0xaea   : > { %v2569_v41 = vsel %vm1153_vm12, %v2567_v22, 0.0 }
 0xaeb   : > { %v2570_v7 = vadd.f32 %v2569_v41, %v2564_v49 }
 0xaee   : > { %v2573_v31 = vpop.permute.xlu1 %2572 }
 0xaef   : > { %v2575_v53 = vsel %vm1154_vm13, %v2573_v31, 0.0 }
 0xaf0   : > { %v2576_v59 = vadd.f32 %v2575_v53, %v2570_v7 }
 0xaf3   : > { %v2579_v15 = vpop.permute.xlu1 %2578 }
 0xaf4   : > { %v2581_v16 = vsel %vm1155_vm14, %v2579_v15, 0.0 }
 0xaf5   : > { %v2582_v0 = vadd.f32 %v2581_v16, %v2576_v59 }
 0xb1e   : > { %v2449_v56 = vpop.f32.mrb[12].mxu0 }
 0xb1f   : > { %v6750_v61 = vadd.f32 %v2449_v56, %v6633_v54  ;;  %v5518_v62 = vpop.f32.mrb[13].mxu0 }
 0xb22   : > { %v2653_v1 = vpop.f32.mrb[14].mxu0 }
 0xb23   : > { %v2654_v28 = vadd.f32 %v2653_v1, %v2582_v0  ;;  %v5530_v5 = vpop.f32.mrb[15].mxu0  ;;  %v977_v1 = vld [vmem:[%s7422_s8 + $0x18] sm:$0xff] }
 0xb24   : > { %5537 = vmatpush3.msra.mxu1 %v977_v1 }
 0xb25   : > { %v2657_v8 = vsel %vm1156_vm15, -1e+10, %v2654_v28  ;;  %5715 = vmatprep.subr.bf16.mxu1 %v6050_v3 }
 0xb26   : > { %v2658_v10 = vsel %vm1158_vm2, %v2657_v8, -inf }
 0xb27   : > { %2659 = vmax.xlane.f32.xlu0 %v2658_v10 }
 0xb3d   : > { %2723 = vrot.lane.b32.xlu0 %v6333_v27, %s7395_s3  ;;  %s7432_s3 = sld [smem:[#allocation10_spill]] }
 0xbb4   : > { %v2660_v57 = vpop.xlane.xlu0 %2659 }
 0xbb5   : > { %v2661_v13 = vsub.f32 %v2657_v8, %v2660_v57 }
 0xbb7   : > { %v2662_v22 = vmul.f32 1.442695, %v2661_v13 }
 0xbb8   : > { %v2724_v54 = vpop.permute.xlu0 %2723 }
 0xbb9   : > { %5930 = vpow2.f32 %v2662_v22  ;;  %5532 = vmatpush3.msra.mxu0 %v2724_v54 }
 0xbba   : > { %5709 = vmatprep.subr.bf16.mxu0 %v6050_v3 }
 0xbc3   : > { %v5931_v29 = vpop.eup %5930 }
 0xbc4   : > { %v2664_v23 = vsel %vm1158_vm2, %v5931_v29, 0.0 }
 0xbc5   : > { %2665 = vadd.xlane.f32.xlu1 %v2664_v23 }
 0xc52   : > { %v2666_v11 = vpop.xlane.xlu1 %2665 }
 0xc53   : > { %5932 = vrcp.f32 %v2666_v11 }
 0xc5d   : > { %v5933_v25 = vpop.eup %5932 }
 0xc5e   : > { %v2668_v26 = vmul.f32 %v5933_v25, %v5931_v29 }
 0xc60   : > { %5534 = vmatmul.mubr.msk.f32.vlgmr.msra.gmra.mrb[16].mxu0 %vm1158_vm2, %v2668_v26  ;;  %v2693_v27 = vsel %vm1151_vm10, %v2668_v26, 0.0  ;;  %v2669_v30 = vsel %vm1147_vm6, %v2668_v26, 0.0  ;;  %v2675_v14 = vsel %vm1148_vm7, %v2668_v26, 0.0  ;;  %v2681_v32 = vsel %vm1149_vm8, %v2668_v26, 0.0 }
 0xc61   : > { %v2694_v63 = vsel %vm1158_vm2, %v2693_v27, 0.0  ;;  %v2670_v31 = vsel %vm1158_vm2, %v2669_v30, 0.0  ;;  %5549 = vmatprep.mubr.msk.f32.mxu0 %vm6051_vm0, %v6052_v9  ;;  %v2676_v17 = vsel %vm1158_vm2, %v2675_v14, 0.0  ;;  %v2682_v35 = vsel %vm1158_vm2, %v2681_v32, 0.0 }
 0xc62   : > { %2695 = vadd.xlane.f32.xlu0 %v2694_v63  ;;  %2671 = vadd.xlane.f32.xlu1 %v2670_v31  ;;  %v2687_v41 = vsel %vm1150_vm9, %v2668_v26, 0.0  ;;  %v2699_v15 = vsel %vm1152_vm11, %v2668_v26, 0.0  ;;  %v2705_v7 = vsel %vm1153_vm12, %v2668_v26, 0.0  ;;  %v2711_v56 = vsel %vm1154_vm13, %v2668_v26, 0.0 }
 0xc63   : > { %v2688_v49 = vsel %vm1158_vm2, %v2687_v41, 0.0  ;;  %v2700_v53 = vsel %vm1158_vm2, %v2699_v15, 0.0  ;;  %v2706_v16 = vsel %vm1158_vm2, %v2705_v7, 0.0  ;;  %v2712_v59 = vsel %vm1158_vm2, %v2711_v56, 0.0  ;;  %v5956_v7 = vld [vmem:[%s6298_s22] sm:$0xff]  ;;  %s947_s22 = scalar_lea.vmem %s7431_s9, %s6294_s16 }
 0xc64   : > { %v2717_v62 = vsel %vm1155_vm14, %v2668_v26, 0.0 }
 0xc65   : > { %v2718_v0 = vsel %vm1158_vm2, %v2717_v62, 0.0 }
 0xc66   : > { %2677 = vadd.xlane.f32.xlu1 %v2676_v17 }
 0xc6a   : > { %2683 = vadd.xlane.f32.xlu1 %v2682_v35 }
 0xc6e   : > { %2689 = vadd.xlane.f32.xlu1 %v2688_v49 }
 0xc72   : > { %2701 = vadd.xlane.f32.xlu1 %v2700_v53 }
 0xc76   : > { %2707 = vadd.xlane.f32.xlu1 %v2706_v16 }
 0xc7a   : > { %2713 = vadd.xlane.f32.xlu1 %v2712_v59 }
 0xc7e   : > { %2719 = vadd.xlane.f32.xlu1 %v2718_v0 }
 0xcef   : > { %v2672_v28 = vpop.xlane.xlu1 %2671  ;;  %v2696_v26 = vpop.xlane.xlu0 %2695 }
 0xcf0   : > { %v2673_v22 = vmul.f32 %v2672_v28, %v6549_v50  ;;  %v2697_v63 = vmul.f32 %v2696_v26, %v6568_v58  ;;  %v5277_v58 = vld [vmem:[%s6126_s14] ss:$0 sm:$0xff] }
 0xcf1   : > { %v961_v26 = vld [vmem:[%s947_s22] sm:$0xff]  ;;  %s7434_s22 = sld [smem:[#allocation12_spill]] }
 0xcf3   : > { %v2678_v5 = vpop.xlane.xlu1 %2677 }
 0xcf4   : > { %v2679_v13 = vmul.f32 %v2678_v5, %v6544_v43  ;;  %v2917_v5 = vld [vmem:[%s6156_s20 + $0x8] sm:$0xff] }
 0xcf6   : > { %v2680_v23 = vadd.f32 %v2679_v13, %v2673_v22  ;;  %v2918_v13 = vld [vmem:[%s6156_s20 + $0x10] sm:$0xff] }
 0xcf7   : > { %v2684_v8 = vpop.xlane.xlu1 %2683 }
 0xcf8   : > { %v2685_v54 = vmul.f32 %v2684_v8, %v6554_v51 }
 0xcfa   : > { %v2686_v25 = vadd.f32 %v2685_v54, %v2680_v23  ;;  %v2919_v54 = vld [vmem:[%s6156_s20 + $0x18] sm:$0xff] }
 0xcfb   : > { %v2690_v10 = vpop.xlane.xlu1 %2689  ;;  %v2914_v23 = vld [vmem:[%s7423_s6 + $0x18] sm:$0xff] }
 0xcfc   : > { %v2691_v11 = vmul.f32 %v2690_v10, %v6561_v55  ;;  %v2911_v10 = vld [vmem:[%s7423_s6] sm:$0xff] }
 0xcfe   : > { %v2692_v27 = vadd.f32 %v2691_v11, %v2686_v25  ;;  %v5719_v11 = vpack.c.bf16 %v2919_v54, %v2918_v13 }
 0xcff   : > { %v2702_v57 = vpop.xlane.xlu1 %2701 }
 0xd00   : > { %v2698_v31 = vadd.f32 %v2697_v63, %v2692_v27  ;;  %v2703_v14 = vmul.f32 %v2702_v57, %v6577_v4  ;;  %v2912_v57 = vld [vmem:[%s7423_s6 + $0x8] sm:$0xff] }
 0xd01   : > { %v5710_v22 = vpack.c.bf16 %v2912_v57, %v2911_v10 }
 0xd02   : > { %v2704_v50 = vadd.f32 %v2703_v14, %v2698_v31  ;;  %v5278_v14 = vld [vmem:[%s6136_s24] ss:$0 sm:$0xff] }
 0xd03   : > { %v2708_v29 = vpop.xlane.xlu1 %2707  ;;  %5711 = vmatpush3.bf16.msra.mxu0 %v5710_v22 }
 0xd04   : > { %v2709_v43 = vmul.f32 %v2708_v29, %v6583_v12  ;;  %v2913_v29 = vld [vmem:[%s7423_s6 + $0x10] sm:$0xff]  ;;  %5712 = vmatprep.subr.bf16.mxu0 %v6050_v3  ;;  %s7449_s6 = sld [smem:[#allocation22_spill]] }
 0xd05   : > { %v5713_v25 = vpack.c.bf16 %v2914_v23, %v2913_v29 }
 0xd06   : > { %v2710_v32 = vadd.f32 %v2709_v43, %v2704_v50  ;;  %v6830_v50 = vld [vmem:[%s7421_s12 + $0x8] sm:$0x1] }
 0xd07   : > { %v2714_v30 = vpop.xlane.xlu1 %2713  ;;  %5714 = vmatpush3.bf16.msra.mxu0 %v5713_v25 }
 0xd08   : > { %v2715_v51 = vmul.f32 %v2714_v30, %v6589_v21  ;;  %5721 = vmatprep.subr.bf16.mxu0 %v6050_v3 }
 0xd0a   : > { %v2716_v35 = vadd.f32 %v2715_v51, %v2710_v32  ;;  %v5279_v51 = vld [vmem:[%s7432_s3] ss:$0 sm:$0xff]  ;;  %s7435_s3 = sld [smem:[#allocation7_spill]] }
 0xd0b   : > { %v2720_v17 = vpop.xlane.xlu1 %2719 }
 0xd0c   : > { %v2721_v55 = vmul.f32 %v2720_v17, %v6594_v24  ;;  %v6827_v17 = vld [vmem:[%s7421_s12] sm:$0xff] }
 0xd0e   : > { %v2722_v41 = vadd.f32 %v2721_v55, %v2716_v35  ;;  %v6835_v55 = vpack.c.bf16 %v6830_v50, %v6827_v17 }
 0xd33   : > { %v2795_v49 = vpop.f32.mrb[16].mxu0 }
 0xd34   : > { %v2796_v15 = vadd.f32 %v2795_v49, %v2722_v41  ;;  %v5535_v53 = vpop.f32.mrb[17].mxu0  ;;  %v5282_v41 = vld [vmem:[%s7433_s23] ss:$0 sm:$0xff]  ;;  %s955_s23 = scalar_lea.vmem %s7435_s3, %s6294_s16  ;;  %s7438_s3 = sld [smem:[#allocation14_spill]] }
 0xd36   : > { %5539 = vmatmul.mubr.msk.f32.vlgmr.msra.gmra.mrb[16].mxu1 %vm1158_vm2, %v2796_v15 }
 0xd37   : > { %5560 = vmatprep.mubr.msk.f32.mxu1 %vm6051_vm0, %v6052_v9 }
 0xe09   : > { %v2868_v4 = vpop.f32.mrb[16].mxu1 }
 0xe0a   : > { %v2872_v12 = vadd.f32 %v2868_v4, %v6750_v61  ;;  %v5540_v21 = vpop.f32.mrb[17].mxu1  ;;  %v2916_v61 = vld [vmem:[%s6156_s20] sm:$0xff] }
 0xe0b   : > { %v5716_v8 = vpack.c.bf16 %v2917_v5, %v2916_v61 }
 0xe0c   : > { %v2879_v24 = vadd.f32 %v5277_v58, %v2872_v12  ;;  %v5280_v58 = vld [vmem:[%s7434_s22] ss:$0 sm:$0xff]  ;;  %s7436_s22 = smov 96  }
 0xe0d   : > { %5717 = vmatpush3.bf16.msra.mxu1 %v5716_v8 }
 0xe0e   : > { %v2880_v16 = vadd.f32 %v5956_v7, %v2879_v24  ;;  %5718 = vmatprep.subr.bf16.mxu1 %v6050_v3 }
 0xe10   : > { %v2883_v56 = vsel %vm987_vm1, %v2880_v16, 0.0 }
 0xe11   : > { %2884 = vadd.xlane.f32.xlu1 %v2883_v56  ;;  %5720 = vmatpush3.bf16.msra.mxu1 %v5719_v11 }
 0xe12   : > { %5570 = vmatprep.subr.mxu1 %v6052_v9 }
 0xe14   : > { %5561 = vmatmul.mubr.msk.f32.vlgmr.msra.gmra.mrb[18].mxu1 %vm987_vm1, %v961_v26 }
 0xe15   : > { %5572 = vmatprep.mubr.msk.f32.mxu1 %vm6051_vm0, %v6052_v9 }
 0xe9e   : > { %v2885_v59 = vpop.xlane.xlu1 %2884 }
 0xe9f   : > { %v2887_v62 = vmul.f32 0.03125, %v2885_v59 }
 0xea1   : > { %v2888_v0 = vsub.f32 %v2880_v16, %v2887_v62 }
 0xea3   : > { %v2889_v1 = vmul.f32 %v2888_v0, %v2888_v0 }
 0xea5   : > { %v2890_v28 = vsel %vm987_vm1, %v2889_v1, 0.0 }
 0xea6   : > { %2891 = vadd.xlane.f32.xlu1 %v2890_v28 }
 0xee7   : > { %v3082_v49 = vpop.f32.mrb[18].mxu1 }
 0xee8   : > { %v6848_v15 = vadd.f32 %v5282_v41, %v3082_v49  ;;  %v5562_v53 = vpop.f32.mrb[19].mxu1  ;;  %v6903_v41 = vld [vmem:[%s955_s23] sm:$0xff]  ;;  %s7439_s23 = smov 112  }
 0xee9   : > { %vm3086_vm4 = vcmp.eq.f32.partialorder %v6903_v41, 0.0 }
 0xeea   : > { %5571 = vmatpush3.xpose.msk.msra.mxu1 %vm1158_vm2, %v6848_v15 }
 0xeeb   : > { %5575 = vmatprep.subr.mxu1 %v6052_v9 }
 0xf33   : > { %v2892_v27 = vpop.xlane.xlu1 %2891 }
 0xf34   : > { %v2893_v30 = vmul.f32 0.03125, %v2892_v27 }
 0xf36   : > { %v2894_v63 = vadd.f32 1e-05, %v2893_v30 }
 0xf38   : > { %5934 = vrsqrt.f32 %v2894_v63 }
 0xf42   : > { %v5935_v31 = vpop.eup %5934 }
 0xf43   : > { %v2896_v43 = vmul.f32 %v5935_v31, %v2888_v0 }
 0xf45   : > { %v2903_v32 = vmul.f32 %v5278_v14, %v2896_v43 }
 0xf47   : > { %v6837_v35 = vadd.f32 %v5279_v51, %v2903_v32 }
 0xf49   : > { %5550 = vmatmul.mubr.msk.f32.vlgmr.msra.gmra.mrb[18].mxu0 %vm987_vm1, %v6837_v35 }
 0xf4a   : > { %5724 = vmatpush3.bf16.xpose.msk.msra.mxu0 %vm6321_vm3, %v6835_v55  ;;  %5567 = vmatprep.mubr.msk.f32.mxu0 %vm6051_vm0, %v6052_v9 }
 0xf4b   : > { %5725 = vmatprep.subr.bf16.mxu0 %v6050_v3 }
0x101c   : > { %v3003_v4 = vpop.f32.mrb[18].mxu0 }
0x101d   : > { %v3004_v12 = vadd.f32 %v5280_v58, %v3003_v4  ;;  %v5551_v21 = vpop.f32.mrb[19].mxu0 }
0x101f   : > { %v6854_v24 = vmul.f32 0.35355338, %v3004_v12 }
0x1021   : > { %5568 = vmatmul.mubr.msk.f32.vlgmr.msra.gmra.mrb[20].mxu0 %vm1158_vm2, %v6854_v24  ;;  %5573 = vmatmul.mubr.msk.f32.vlgmr.msra.gmra.mrb[20].mxu1 %vm1158_vm2, %v6854_v24 }
0x1022   : > { %5728 = vmatpush3.bf16.xpose.msk.msra.mxu0 %vm6321_vm3, %v6835_v55  ;;  %5584 = vmatprep.mubr.msk.f32.mxu0 %vm6051_vm0, %v6052_v9 }
0x1023   : > { %5577 = vmatprep.mubr.msk.f32.mxu1 %vm6051_vm0, %v6052_v9  ;;  %5597 = vmatprep.subr.mxu0 %v6052_v9 }
0x10f4   : > { %v3163_v7 = vpop.f32.mrb[20].mxu0  ;;  %v3291_v16 = vpop.f32.mrb[20].mxu1 }
0x10f5   : > { %v5574_v56 = vpop.f32.mrb[21].mxu1  ;;  %3175 = vperm.xlu0 %5882, %v3163_v7   ;;  %3169 = vperm.xlu1 %5881, %v3163_v7   ;;  %v5569_v59 = vpop.f32.mrb[21].mxu0 }
0x10f9   : > { %3474 = vrot.lane.b32.xlu0 %v6854_v24, %s7430_s2  ;;  %5883 = vset.pattern.permute.xlu1 %v6053_v19 }
0x10fa   : > { %3181 = vperm.xlu1 %5883, %v3163_v7   ;;  %5893 = vset.pattern.permute.xlu0 %v6055_v33 }
0x10fe   : > { %5884 = vset.pattern.permute.xlu1 %v6055_v33 }
0x10ff   : > { %3187 = vperm.xlu1 %5884, %v3163_v7  }
0x1103   : > { %5885 = vset.pattern.permute.xlu1 %v6057_v36 }
0x1104   : > { %3193 = vperm.xlu1 %5885, %v3163_v7  }
0x1108   : > { %5886 = vset.pattern.permute.xlu1 %v6058_v37 }
0x1109   : > { %3199 = vperm.xlu1 %5886, %v3163_v7  }
0x110d   : > { %5887 = vset.pattern.permute.xlu1 %v6059_v38 }
0x110e   : > { %3205 = vperm.xlu1 %5887, %v3163_v7  }
0x1112   : > { %5888 = vset.pattern.permute.xlu1 %v6061_v40 }
0x1113   : > { %3211 = vperm.xlu1 %5888, %v3163_v7  }
0x1117   : > { %5889 = vset.pattern.permute.xlu1 %v6060_v39 }
0x1118   : > { %3217 = vperm.xlu1 %5889, %v3163_v7  }
0x111c   : > { %5890 = vset.pattern.permute.xlu1 %v6054_v20 }
0x1174   : > { %v3176_v62 = vpop.permute.xlu0 %3175  ;;  %v3170_v0 = vpop.permute.xlu1 %3169 }
0x1175   : > { %v3178_v8 = vsel %vm1148_vm7, %v3176_v62, 0.0  ;;  %v3172_v10 = vsel %vm1147_vm6, %v3170_v0, 0.0 }
0x1176   : > { %v3179_v22 = vadd.f32 %v3178_v8, %v3172_v10 }
0x1178   : > { %v6879_v1 = vpop.permute.xlu0 %3474 }
0x1179   : > { %5585 = vmatmul.mubr.msk.f32.vlgmr.msra.gmra.mrb[22].mxu0 %vm1158_vm2, %v6879_v1  ;;  %v3182_v28 = vpop.permute.xlu1 %3181 }
0x117a   : > { %5599 = vmatprep.mubr.msk.f32.mxu0 %vm6051_vm0, %v6052_v9  ;;  %v3184_v13 = vsel %vm1149_vm8, %v3182_v28, 0.0 }
0x117b   : > { %v3185_v29 = vadd.f32 %v3184_v13, %v3179_v22 }
0x117e   : > { %v3188_v61 = vpop.permute.xlu1 %3187 }
0x117f   : > { %v3190_v54 = vsel %vm1150_vm9, %v3188_v61, 0.0 }
0x1180   : > { %v3191_v25 = vadd.f32 %v3190_v54, %v3185_v29 }
0x1183   : > { %v3194_v5 = vpop.permute.xlu1 %3193 }
0x1184   : > { %v3196_v11 = vsel %vm1151_vm10, %v3194_v5, 0.0 }
0x1185   : > { %v3197_v27 = vadd.f32 %v3196_v11, %v3191_v25 }
0x1188   : > { %v3200_v57 = vpop.permute.xlu1 %3199 }
0x1189   : > { %v3202_v26 = vsel %vm1152_vm11, %v3200_v57, 0.0 }
0x118a   : > { %v3203_v31 = vadd.f32 %v3202_v26, %v3197_v27 }
0x118d   : > { %v3206_v23 = vpop.permute.xlu1 %3205 }
0x118e   : > { %v3208_v30 = vsel %vm1153_vm12, %v3206_v23, 0.0 }
0x118f   : > { %v3209_v43 = vadd.f32 %v3208_v30, %v3203_v31 }
0x1192   : > { %v3212_v63 = vpop.permute.xlu1 %3211 }
0x1193   : > { %v3214_v14 = vsel %vm1154_vm13, %v3212_v63, 0.0 }
0x1194   : > { %v3215_v51 = vadd.f32 %v3214_v14, %v3209_v43 }
0x1197   : > { %v3218_v32 = vpop.permute.xlu1 %3217 }
0x1198   : > { %v3220_v49 = vsel %vm1155_vm14, %v3218_v32, 0.0 }
0x1199   : > { %v3221_v53 = vadd.f32 %v3220_v49, %v3215_v51 }
0x119b   : > { %v3292_v58 = vadd.f32 %v3291_v16, %v3221_v53 }
0x119d   : > { %v3295_v4 = vsel %vm3086_vm4, -1e+10, %v3292_v58 }
0x119e   : > { %v3296_v12 = vsel %vm1158_vm2, %v3295_v4, -inf }
0x119f   : > { %3297 = vmax.xlane.f32.xlu1 %v3296_v12 }
0x11b0   : > { %3307 = vrot.lane.b32.xlu1 %v6848_v15, %s7436_s22  ;;  %s7440_s22 = smov 104  }
0x122c   : > { %v3298_v21 = vpop.xlane.xlu1 %3297 }
0x122d   : > { %v3299_v7 = vsub.f32 %v3295_v4, %v3298_v21 }
0x122f   : > { %v3300_v56 = vmul.f32 1.442695, %v3299_v7 }
0x1230   : > { %v3308_v59 = vpop.permute.xlu1 %3307 }
0x1231   : > { %5936 = vpow2.f32 %v3300_v56  ;;  %5576 = vmatpush3.msra.mxu1 %v3308_v59 }
0x1232   : > { %5587 = vmatprep.subr.mxu1 %v6052_v9 }
0x123b   : > { %v5937_v62 = vpop.eup %5936 }
0x123c   : > { %v3302_v16 = vsel %vm1158_vm2, %v5937_v62, 0.0 }
0x123d   : > { %3303 = vadd.xlane.f32.xlu0 %v3302_v16 }
0x124c   : > { %v3544_v0 = vpop.f32.mrb[22].mxu0 }
0x124d   : > { %3550 = vperm.xlu1 %5890, %v3544_v0   ;;  %v5586_v28 = vpop.f32.mrb[23].mxu0 }
0x1251   : > { %5891 = vset.pattern.permute.xlu1 %v6056_v34 }
0x1252   : > { %3556 = vperm.xlu1 %5891, %v3544_v0  }
0x1253   : > { %3603 = vrot.lane.b32.xlu0 %v6848_v15, %s7430_s2  ;;  %s7437_s2 = smov 88  }
0x1256   : > { %5892 = vset.pattern.permute.xlu1 %v6053_v19 }
0x1257   : > { %3568 = vperm.xlu0 %5893, %v3544_v0   ;;  %3562 = vperm.xlu1 %5892, %v3544_v0  }
0x125b   : > { %5896 = vset.pattern.permute.xlu0 %v6059_v38  ;;  %5894 = vset.pattern.permute.xlu1 %v6057_v36 }
0x125c   : > { %3586 = vperm.xlu0 %5896, %v3544_v0   ;;  %3574 = vperm.xlu1 %5894, %v3544_v0  }
0x1260   : > { %5895 = vset.pattern.permute.xlu1 %v6058_v37  ;;  %5900 = vset.pattern.permute.xlu0 %v6056_v34 }
0x1261   : > { %3580 = vperm.xlu1 %5895, %v3544_v0  }
0x1265   : > { %5897 = vset.pattern.permute.xlu1 %v6061_v40 }
0x1266   : > { %3592 = vperm.xlu1 %5897, %v3544_v0  }
0x126a   : > { %5898 = vset.pattern.permute.xlu1 %v6060_v39 }
0x126b   : > { %3598 = vperm.xlu1 %5898, %v3544_v0  }
0x126f   : > { %5899 = vset.pattern.permute.xlu1 %v6054_v20 }
0x12ca   : > { %v3304_v61 = vpop.xlane.xlu0 %3303 }
0x12cb   : > { %5938 = vrcp.f32 %v3304_v61 }
0x12cc   : > { %v3551_v57 = vpop.permute.xlu1 %3550 }
0x12cd   : > { %v3553_v23 = vsel %vm1147_vm6, %v3551_v57, 0.0 }
0x12ce   : > { %v3604_v10 = vpop.permute.xlu0 %3603 }
0x12d1   : > { %v3557_v13 = vpop.permute.xlu1 %3556 }
0x12d2   : > { %v3559_v54 = vsel %vm1148_vm7, %v3557_v13, 0.0 }
0x12d3   : > { %v3560_v25 = vadd.f32 %v3559_v54, %v3553_v23 }
0x12d5   : > { %v5939_v5 = vpop.eup %5938 }
0x12d6   : > { %v6926_v8 = vmul.f32 %v5939_v5, %v5937_v62  ;;  %v3563_v22 = vpop.permute.xlu1 %3562  ;;  %v3569_v26 = vpop.permute.xlu0 %3568 }
0x12d7   : > { %v3565_v11 = vsel %vm1149_vm8, %v3563_v22, 0.0  ;;  %v3571_v30 = vsel %vm1150_vm9, %v3569_v26, 0.0 }
0x12d8   : > { %5578 = vmatmul.mubr.msk.f32.vlgmr.msra.gmra.mrb[22].mxu1 %vm1158_vm2, %v6926_v8  ;;  %v3566_v27 = vadd.f32 %v3565_v11, %v3560_v25 }
0x12d9   : > { %5588 = vmatpush3.xpose.msk.msra.mxu1 %vm1158_vm2, %v3604_v10  ;;  %5589 = vmatprep.mubr.msk.f32.mxu1 %vm6051_vm0, %v6052_v9 }
0x12da   : > { %5592 = vmatprep.subr.mxu1 %v6052_v9  ;;  %v3572_v63 = vadd.f32 %v3571_v30, %v3566_v27 }
0x12db   : > { %v3575_v29 = vpop.permute.xlu1 %3574  ;;  %v3587_v32 = vpop.permute.xlu0 %3586 }
0x12dc   : > { %5590 = vmatmul.mubr.msk.f32.vlgmr.msra.gmra.mrb[24].mxu1 %vm1158_vm2, %v6879_v1  ;;  %v3577_v31 = vsel %vm1151_vm10, %v3575_v29, 0.0  ;;  %v3589_v53 = vsel %vm1153_vm12, %v3587_v32, 0.0 }
0x12dd   : > { %5594 = vmatprep.mubr.msk.f32.mxu1 %vm6051_vm0, %v6052_v9  ;;  %v3578_v43 = vadd.f32 %v3577_v31, %v3572_v63  ;;  %v3383_v63 = vsel %vm1147_vm6, %v6926_v8, 0.0 }
0x12e0   : > { %v3581_v1 = vpop.permute.xlu1 %3580 }
0x12e1   : > { %v3583_v14 = vsel %vm1152_vm11, %v3581_v1, 0.0 }
0x12e2   : > { %v3584_v49 = vadd.f32 %v3583_v14, %v3578_v43  ;;  %v3384_v14 = vsel %vm1158_vm2, %v3383_v63, 0.0  ;;  %v2921_v63 = vld [vmem:[%s7438_s3] sm:$0xff] }
0x12e4   : > { %v3590_v58 = vadd.f32 %v3589_v53, %v3584_v49 }
0x12e5   : > { %v3593_v51 = vpop.permute.xlu1 %3592 }
0x12e6   : > { %v3595_v12 = vsel %vm1154_vm13, %v3593_v51, 0.0  ;;  %v3393_v51 = vsel %vm1148_vm7, %v6926_v8, 0.0 }
0x12e7   : > { %v3596_v56 = vadd.f32 %v3595_v12, %v3590_v58  ;;  %v3394_v49 = vsel %vm1158_vm2, %v3393_v51, 0.0  ;;  %v3413_v58 = vsel %vm1150_vm9, %v6926_v8, 0.0 }
0x12e8   : > { %v3414_v12 = vsel %vm1158_vm2, %v3413_v58, 0.0  ;;  %v7051_v58 = vrot.slane %v6827_v17, %v1404_v46  ;;  %v7065_v46 = vrot.slane %v6827_v17, %v1424_v52 }
0x12ea   : > { %v3599_v4 = vpop.permute.xlu1 %3598 }
0x12eb   : > { %v3601_v21 = vsel %vm1155_vm14, %v3599_v4, 0.0 }
0x12ec   : > { %v3602_v62 = vadd.f32 %v3601_v21, %v3596_v56  ;;  %v3423_v56 = vsel %vm1151_vm10, %v6926_v8, 0.0 }
0x13ab   : > { %v6956_v7 = vpop.f32.mrb[22].mxu1 }
0x13ac   : > { %v5579_v59 = vpop.f32.mrb[23].mxu1 }
0x13af   : > { %v3673_v16 = vpop.f32.mrb[24].mxu1 }
0x13b0   : > { %v3674_v0 = vadd.f32 %v3673_v16, %v3602_v62  ;;  %v5591_v28 = vpop.f32.mrb[25].mxu1  ;;  %v3424_v62 = vsel %vm1158_vm2, %v3423_v56, 0.0 }
0x13b2   : > { %v3677_v61 = vsel %vm3086_vm4, -1e+10, %v3674_v0  ;;  %v3433_v0 = vsel %vm1152_vm11, %v6926_v8, 0.0 }
0x13b3   : > { %v3678_v5 = vsel %vm1158_vm2, %v3677_v61, -inf }
0x13b4   : > { %3679 = vmax.xlane.f32.xlu0 %v3678_v5 }
0x13ca   : > { %3689 = vrot.lane.b32.xlu0 %v6848_v15, %s7437_s2  ;;  %s7441_s2 = smov 80  }
0x1441   : > { %v3680_v10 = vpop.xlane.xlu0 %3679 }
0x1442   : > { %v3681_v57 = vsub.f32 %v3677_v61, %v3680_v10  ;;  %v3434_v61 = vsel %vm1158_vm2, %v3433_v0, 0.0  ;;  %v3443_v10 = vsel %vm1153_vm12, %v6926_v8, 0.0 }
0x1444   : > { %v3682_v13 = vmul.f32 1.442695, %v3681_v57 }
0x1445   : > { %v3690_v22 = vpop.permute.xlu0 %3689 }
0x1446   : > { %5940 = vpow2.f32 %v3682_v13  ;;  %5593 = vmatpush3.msra.mxu1 %v3690_v22  ;;  %v3444_v13 = vsel %vm1158_vm2, %v3443_v10, 0.0 }
0x1447   : > { %5602 = vmatprep.subr.mxu1 %v6052_v9 }
0x1450   : > { %v5941_v54 = vpop.eup %5940 }
0x1451   : > { %v3684_v29 = vsel %vm1158_vm2, %v5941_v54, 0.0 }
0x1452   : > { %3685 = vadd.xlane.f32.xlu1 %v3684_v29 }
0x14df   : > { %v3686_v23 = vpop.xlane.xlu1 %3685 }
0x14e0   : > { %5942 = vrcp.f32 %v3686_v23 }
0x14ea   : > { %v5943_v11 = vpop.eup %5942 }
0x14eb   : > { %v3688_v25 = vmul.f32 %v5943_v11, %v5941_v54  ;;  %v3453_v54 = vsel %vm1154_vm13, %v6926_v8, 0.0 }
0x14ec   : > { %v3454_v23 = vsel %vm1158_vm2, %v3453_v54, 0.0  ;;  %v7087_v54 = vrot.slane %v6830_v50, %v6538_v45 }
0x14ed   : > { %5595 = vmatmul.mubr.msk.f32.vlgmr.msra.gmra.mrb[26].mxu1 %vm1158_vm2, %v3688_v25  ;;  %v3789_v26 = vsel %vm1151_vm10, %v3688_v25, 0.0  ;;  %v3765_v27 = vsel %vm1147_vm6, %v3688_v25, 0.0  ;;  %v3771_v31 = vsel %vm1148_vm7, %v3688_v25, 0.0  ;;  %v3777_v32 = vsel %vm1149_vm8, %v3688_v25, 0.0 }
0x14ee   : > { %v3790_v1 = vsel %vm1158_vm2, %v3789_v26, 0.0  ;;  %v3766_v30 = vsel %vm1158_vm2, %v3765_v27, 0.0  ;;  %5604 = vmatprep.mubr.msk.f32.mxu1 %vm6051_vm0, %v6052_v9  ;;  %v3772_v43 = vsel %vm1158_vm2, %v3771_v31, 0.0  ;;  %v3778_v53 = vsel %vm1158_vm2, %v3777_v32, 0.0  ;;  %5603 = vmatpush3.msra.mxu1 %v2921_v63 }
0x14ef   : > { %3791 = vadd.xlane.f32.xlu0 %v3790_v1  ;;  %3767 = vadd.xlane.f32.xlu1 %v3766_v30  ;;  %v3783_v4 = vsel %vm1150_vm9, %v3688_v25, 0.0  ;;  %v3795_v59 = vsel %vm1152_vm11, %v3688_v25, 0.0  ;;  %v3801_v28 = vsel %vm1153_vm12, %v3688_v25, 0.0  ;;  %v3807_v57 = vsel %vm1154_vm13, %v3688_v25, 0.0  ;;  %v2922_v1 = vld [vmem:[%s7438_s3 + $0x8] sm:$0xff] }
0x14f0   : > { %v3784_v21 = vsel %vm1158_vm2, %v3783_v4, 0.0  ;;  %v3796_v16 = vsel %vm1158_vm2, %v3795_v59, 0.0  ;;  %v3802_v5 = vsel %vm1158_vm2, %v3801_v28, 0.0  ;;  %v3808_v22 = vsel %vm1158_vm2, %v3807_v57, 0.0  ;;  %5598 = vmatpush3.msra.mxu0 %v2922_v1  ;;  %5614 = vmatprep.subr.mxu1 %v6052_v9 }
0x14f1   : > { %v3813_v29 = vsel %vm1155_vm14, %v3688_v25, 0.0  ;;  %v3463_v26 = vsel %vm1155_vm14, %v6926_v8, 0.0  ;;  %5729 = vmatprep.subr.bf16.mxu0 %v6050_v3  ;;  %v3403_v25 = vsel %vm1149_vm8, %v6926_v8, 0.0  ;;  %v7042_v32 = vrot.slane %v6827_v17, %v1394_v44 }
0x14f2   : > { %v3814_v11 = vsel %vm1158_vm2, %v3813_v29, 0.0  ;;  %v3464_v27 = vsel %vm1158_vm2, %v3463_v26, 0.0  ;;  %v3404_v30 = vsel %vm1158_vm2, %v3403_v25, 0.0  ;;  %v7046_v8 = vrot.slane %v6827_v17, %v6538_v45 }
0x14f3   : > { %3385 = vadd.xlane.f32.xlu0 %v3384_v14  ;;  %3773 = vadd.xlane.f32.xlu1 %v3772_v43  ;;  %v7076_v57 = vrot.slane %v6827_v17, %v1444_v2 }
0x14f7   : > { %3395 = vadd.xlane.f32.xlu0 %v3394_v49  ;;  %3779 = vadd.xlane.f32.xlu1 %v3778_v53 }
0x14fb   : > { %3415 = vadd.xlane.f32.xlu0 %v3414_v12  ;;  %3785 = vadd.xlane.f32.xlu1 %v3784_v21  ;;  %v7057_v12 = vrot.slane %v6827_v17, %v1414_v48  ;;  %v7070_v48 = vrot.slane %v6827_v17, %v1434_v60 }
0x14ff   : > { %3425 = vadd.xlane.f32.xlu0 %v3424_v62  ;;  %3797 = vadd.xlane.f32.xlu1 %v3796_v16 }
0x1503   : > { %3435 = vadd.xlane.f32.xlu0 %v3434_v61  ;;  %3803 = vadd.xlane.f32.xlu1 %v3802_v5 }
0x1507   : > { %3445 = vadd.xlane.f32.xlu0 %v3444_v13  ;;  %3809 = vadd.xlane.f32.xlu1 %v3808_v22  ;;  %v7082_v22 = vrot.slane %v6827_v17, %v1454_v6 }
0x150b   : > { %3455 = vadd.xlane.f32.xlu0 %v3454_v23  ;;  %3815 = vadd.xlane.f32.xlu1 %v3814_v11 }
0x150f   : > { %3465 = vadd.xlane.f32.xlu0 %v3464_v27 }
0x151c   : > { %3966 = vrot.lane.b32.xlu1 %v6854_v24, %s7439_s23 }
0x1525   : > { %4095 = vrot.lane.b32.xlu0 %v6848_v15, %s7439_s23  ;;  %s7442_s23 = smov 72  }
0x1540   : > { %3405 = vadd.xlane.f32.xlu1 %v3404_v30 }
0x157c   : > { %v3768_v31 = vpop.xlane.xlu1 %3767  ;;  %v3792_v53 = vpop.xlane.xlu0 %3791 }
0x157d   : > { %v3769_v44 = vmul.f32 %v3768_v31, %v7046_v8  ;;  %v3793_v5 = vmul.f32 %v3792_v53, %v7065_v46 }
0x1580   : > { %v3774_v14 = vpop.xlane.xlu1 %3773  ;;  %v3386_v62 = vpop.xlane.xlu0 %3385 }
0x1581   : > { %v3775_v4 = vmul.f32 %v3774_v14, %v7042_v32  ;;  %v3391_v14 = vmul.f32 %v7046_v8, %v3386_v62 }
0x1583   : > { %v3776_v59 = vadd.f32 %v3775_v4, %v3769_v44 }
0x1584   : > { %v3780_v43 = vpop.xlane.xlu1 %3779  ;;  %v3396_v10 = vpop.xlane.xlu0 %3395 }
0x1585   : > { %v3781_v21 = vmul.f32 %v3780_v43, %v7051_v58  ;;  %v3401_v63 = vmul.f32 %v7042_v32, %v3396_v10 }
0x1587   : > { %v3782_v0 = vadd.f32 %v3781_v21, %v3776_v59 }
0x1588   : > { %v3786_v51 = vpop.xlane.xlu1 %3785  ;;  %v3416_v23 = vpop.xlane.xlu0 %3415 }
0x1589   : > { %v3787_v16 = vmul.f32 %v3786_v51, %v7057_v12  ;;  %v3402_v51 = vadd.f32 %v3401_v63, %v3391_v14  ;;  %v3421_v53 = vmul.f32 %v7057_v12, %v3416_v23 }
0x158b   : > { %v3788_v28 = vadd.f32 %v3787_v16, %v3782_v0 }
0x158c   : > { %v3798_v49 = vpop.xlane.xlu1 %3797  ;;  %v3426_v25 = vpop.xlane.xlu0 %3425 }
0x158d   : > { %v3794_v13 = vadd.f32 %v3793_v5, %v3788_v28  ;;  %v3799_v52 = vmul.f32 %v3798_v49, %v7070_v48  ;;  %v3431_v21 = vmul.f32 %v7065_v46, %v3426_v25 }
0x158f   : > { %v3800_v11 = vadd.f32 %v3799_v52, %v3794_v13 }
0x1590   : > { %v3804_v56 = vpop.xlane.xlu1 %3803  ;;  %v3436_v45 = vpop.xlane.xlu0 %3435 }
0x1591   : > { %v3805_v60 = vmul.f32 %v3804_v56, %v7076_v57  ;;  %v3441_v59 = vmul.f32 %v7070_v48, %v3436_v45 }
0x1593   : > { %v3806_v26 = vadd.f32 %v3805_v60, %v3800_v11 }
0x1594   : > { %v3810_v61 = vpop.xlane.xlu1 %3809  ;;  %v3446_v31 = vpop.xlane.xlu0 %3445 }
0x1595   : > { %v3811_v2 = vmul.f32 %v3810_v61, %v7082_v22  ;;  %v3451_v0 = vmul.f32 %v7076_v57, %v3446_v31 }
0x1597   : > { %v3812_v1 = vadd.f32 %v3811_v2, %v3806_v26 }
0x1598   : > { %v3816_v29 = vpop.xlane.xlu1 %3815  ;;  %v3456_v44 = vpop.xlane.xlu0 %3455 }
0x1599   : > { %v3817_v27 = vmul.f32 %v3816_v29, %v7087_v54  ;;  %v3461_v61 = vmul.f32 %v7082_v22, %v3456_v44 }
0x159b   : > { %v3818_v42 = vadd.f32 %v3817_v27, %v3812_v1 }
0x159c   : > { %v3967_v50 = vpop.permute.xlu1 %3966  ;;  %v3466_v28 = vpop.xlane.xlu0 %3465 }
0x159d   : > { %v3471_v10 = vmul.f32 %v7087_v54, %v3466_v28 }
0x15a0   : > { %v4096_v29 = vpop.permute.xlu0 %4095 }
0x15c0   : > { %v7091_v30 = vpop.f32.mrb[26].mxu1 }
0x15c1   : > { %v3819_v6 = vadd.f32 %v3818_v42, %v7091_v30  ;;  %v5596_v17 = vpop.f32.mrb[27].mxu1 }
0x15c3   : > { %5600 = vmatmul.mubr.msk.f32.vlgmr.msra.gmra.mrb[24].mxu0 %vm1158_vm2, %v3819_v6 }
0x15c4   : > { %5732 = vmatpush3.bf16.xpose.msk.msra.mxu0 %vm6321_vm3, %v6835_v55  ;;  %5611 = vmatprep.mubr.msk.f32.mxu0 %vm6051_vm0, %v6052_v9 }
0x15c5   : > { %5624 = vmatprep.subr.mxu0 %v6052_v9 }
0x15cb   : > { %5612 = vmatmul.mubr.msk.f32.vlgmr.msra.gmra.mrb[26].mxu0 %vm1158_vm2, %v3967_v50 }
0x15cc   : > { %5626 = vmatprep.mubr.msk.f32.mxu0 %vm6051_vm0, %v6052_v9 }
0x15cd   : > { %v3406_v43 = vpop.xlane.xlu1 %3405 }
0x15ce   : > { %v3411_v49 = vmul.f32 %v7051_v58, %v3406_v43 }
0x15d0   : > { %v3412_v4 = vadd.f32 %v3411_v49, %v3402_v51 }
0x15d2   : > { %v3422_v56 = vadd.f32 %v3421_v53, %v3412_v4 }
0x15d4   : > { %v3432_v16 = vadd.f32 %v3431_v21, %v3422_v56 }
0x15d6   : > { %v3442_v62 = vadd.f32 %v3441_v59, %v3432_v16 }
0x15d8   : > { %v3452_v5 = vadd.f32 %v3451_v0, %v3442_v62 }
0x15da   : > { %v3462_v13 = vadd.f32 %v3461_v61, %v3452_v5 }
0x15dc   : > { %v3472_v52 = vadd.f32 %v3471_v10, %v3462_v13 }
0x15de   : > { %v3473_v60 = vadd.f32 %v3472_v52, %v6956_v7 }
0x15e0   : > { %5605 = vmatmul.mubr.msk.f32.vlgmr.msra.gmra.mrb[28].mxu1 %vm1158_vm2, %v3473_v60 }
0x15e1   : > { %5615 = vmatpush3.xpose.msk.msra.mxu1 %vm1158_vm2, %v4096_v29  ;;  %5616 = vmatprep.mubr.msk.f32.mxu1 %vm6051_vm0, %v6052_v9 }
0x15e2   : > { %5619 = vmatprep.subr.mxu1 %v6052_v9 }
0x15e4   : > { %5617 = vmatmul.mubr.msk.f32.vlgmr.msra.gmra.mrb[30].mxu1 %vm1158_vm2, %v3967_v50 }
0x15e5   : > { %5621 = vmatprep.mubr.msk.f32.mxu1 %vm6051_vm0, %v6052_v9 }
0x1696   : > { %v3889_v23 = vpop.f32.mrb[24].mxu0 }
0x1697   : > { %v5601_v11 = vpop.f32.mrb[25].mxu0 }
0x169e   : > { %v4036_v2 = vpop.f32.mrb[26].mxu0 }
0x169f   : > { %4048 = vperm.xlu0 %5900, %v4036_v2   ;;  %4042 = vperm.xlu1 %5899, %v4036_v2   ;;  %v5613_v26 = vpop.f32.mrb[27].mxu0 }
0x16a3   : > { %5903 = vset.pattern.permute.xlu0 %v6057_v36  ;;  %5901 = vset.pattern.permute.xlu1 %v6053_v19 }
0x16a4   : > { %4066 = vperm.xlu0 %5903, %v4036_v2   ;;  %4054 = vperm.xlu1 %5901, %v4036_v2  }
0x16a8   : > { %5906 = vset.pattern.permute.xlu0 %v6061_v40  ;;  %5902 = vset.pattern.permute.xlu1 %v6055_v33 }
0x16a9   : > { %4084 = vperm.xlu0 %5906, %v4036_v2   ;;  %4060 = vperm.xlu1 %5902, %v4036_v2  }
0x16ad   : > { %5904 = vset.pattern.permute.xlu1 %v6058_v37  ;;  %5911 = vset.pattern.permute.xlu0 %v6055_v33 }
0x16ae   : > { %4072 = vperm.xlu1 %5904, %v4036_v2  }
0x16b2   : > { %5905 = vset.pattern.permute.xlu1 %v6059_v38 }
0x16b3   : > { %4078 = vperm.xlu1 %5905, %v4036_v2   ;;  %v3962_v27 = vpop.f32.mrb[28].mxu1 }
0x16b4   : > { %v7129_v1 = vadd.f32 %v3962_v27, %v3889_v23  ;;  %v5606_v25 = vpop.f32.mrb[29].mxu1 }
0x16b7   : > { %5907 = vset.pattern.permute.xlu1 %v6060_v39  ;;  %v4165_v42 = vpop.f32.mrb[30].mxu1 }
0x16b8   : > { %4090 = vperm.xlu1 %5907, %v4036_v2   ;;  %v5618_v6 = vpop.f32.mrb[31].mxu1 }
0x16bc   : > { %5908 = vset.pattern.permute.xlu1 %v6054_v20 }
0x171e   : > { %v4043_v17 = vpop.permute.xlu1 %4042  ;;  %v4049_v45 = vpop.permute.xlu0 %4048 }
0x171f   : > { %v4051_v33 = vsel %vm1148_vm7, %v4049_v45, 0.0  ;;  %v4045_v50 = vsel %vm1147_vm6, %v4043_v17, 0.0 }
0x1720   : > { %v4052_v14 = vadd.f32 %v4051_v33, %v4045_v50 }
0x1723   : > { %v4055_v63 = vpop.permute.xlu1 %4054  ;;  %v4067_v53 = vpop.permute.xlu0 %4066 }
0x1724   : > { %v4057_v31 = vsel %vm1149_vm8, %v4055_v63, 0.0  ;;  %v4069_v4 = vsel %vm1151_vm10, %v4067_v53, 0.0 }
0x1725   : > { %v4058_v43 = vadd.f32 %v4057_v31, %v4052_v14 }
0x1728   : > { %v4061_v51 = vpop.permute.xlu1 %4060  ;;  %v4085_v59 = vpop.permute.xlu0 %4084 }
0x1729   : > { %v4063_v49 = vsel %vm1150_vm9, %v4061_v51, 0.0  ;;  %v4087_v61 = vsel %vm1154_vm13, %v4085_v59, 0.0 }
0x172a   : > { %v4064_v20 = vadd.f32 %v4063_v49, %v4058_v43 }
0x172c   : > { %v4070_v21 = vadd.f32 %v4069_v4, %v4064_v20 }
0x172d   : > { %v4073_v44 = vpop.permute.xlu1 %4072 }
0x172e   : > { %v4075_v56 = vsel %vm1152_vm11, %v4073_v44, 0.0 }
0x172f   : > { %v4076_v16 = vadd.f32 %v4075_v56, %v4070_v21 }
0x1732   : > { %v4079_v0 = vpop.permute.xlu1 %4078 }
0x1733   : > { %v4081_v62 = vsel %vm1153_vm12, %v4079_v0, 0.0  ;;  %v2923_v0 = vld [vmem:[%s7438_s3 + $0x10] sm:$0xff] }
0x1734   : > { %v4082_v28 = vadd.f32 %v4081_v62, %v4076_v16  ;;  %5625 = vmatpush3.msra.mxu0 %v2923_v0 }
0x1735   : > { %5636 = vmatprep.subr.mxu0 %v6052_v9 }
0x1736   : > { %v4088_v5 = vadd.f32 %v4087_v61, %v4082_v28 }
0x1737   : > { %v4091_v10 = vpop.permute.xlu1 %4090 }
0x1738   : > { %v4093_v13 = vsel %vm1155_vm14, %v4091_v10, 0.0 }
0x1739   : > { %v4094_v52 = vadd.f32 %v4093_v13, %v4088_v5 }
0x173b   : > { %v4166_v60 = vadd.f32 %v4165_v42, %v4094_v52 }
0x173d   : > { %v4169_v29 = vsel %vm3086_vm4, -1e+10, %v4166_v60 }
0x173e   : > { %v4170_v23 = vsel %vm1158_vm2, %v4169_v29, -inf }
0x173f   : > { %4171 = vmax.xlane.f32.xlu1 %v4170_v23 }
0x1750   : > { %4386 = vrot.lane.b32.xlu1 %v6854_v24, %s7440_s22 }
0x17cc   : > { %v4172_v11 = vpop.xlane.xlu1 %4171 }
0x17cd   : > { %v4173_v2 = vsub.f32 %v4169_v29, %v4172_v11 }
0x17cf   : > { %v4174_v26 = vmul.f32 1.442695, %v4173_v2 }
0x17d0   : > { %v4387_v49 = vpop.permute.xlu1 %4386 }
0x17d1   : > { %5944 = vpow2.f32 %v4174_v26 }
0x17db   : > { %v5945_v27 = vpop.eup %5944 }
0x17dc   : > { %v4176_v25 = vsel %vm1158_vm2, %v5945_v27, 0.0 }
0x17dd   : > { %4177 = vadd.xlane.f32.xlu0 %v4176_v25 }
0x17f3   : > { %4181 = vrot.lane.b32.xlu0 %v6848_v15, %s7441_s2  ;;  %s7443_s2 = sld [smem:[#allocation15_spill]] }
0x186a   : > { %v4178_v42 = vpop.xlane.xlu0 %4177 }
0x186b   : > { %5946 = vrcp.f32 %v4178_v42 }
0x186e   : > { %v4182_v6 = vpop.permute.xlu0 %4181 }
0x186f   : > { %5620 = vmatpush3.msra.mxu1 %v4182_v6 }
0x1870   : > { %5733 = vmatprep.subr.bf16.mxu1 %v6050_v3 }
0x1875   : > { %v5947_v17 = vpop.eup %5946 }
0x1876   : > { %v4180_v45 = vmul.f32 %v5947_v17, %v5945_v27 }
0x1878   : > { %5622 = vmatmul.mubr.msk.f32.vlgmr.msra.gmra.mrb[32].mxu1 %vm1158_vm2, %v4180_v45  ;;  %v4263_v24 = vsel %vm1148_vm7, %v4180_v45, 0.0  ;;  %v4257_v33 = vsel %vm1147_vm6, %v4180_v45, 0.0  ;;  %v4269_v31 = vsel %vm1149_vm8, %v4180_v45, 0.0  ;;  %v4281_v14 = vsel %vm1151_vm10, %v4180_v45, 0.0 }
0x1879   : > { %5736 = vmatpush3.bf16.xpose.msk.msra.mxu1 %vm6321_vm3, %v6835_v55  ;;  %v4264_v50 = vsel %vm1158_vm2, %v4263_v24, 0.0  ;;  %v4258_v63 = vsel %vm1158_vm2, %v4257_v33, 0.0  ;;  %5633 = vmatprep.mubr.msk.f32.mxu1 %vm6051_vm0, %v6052_v9  ;;  %v4270_v18 = vsel %vm1158_vm2, %v4269_v31, 0.0  ;;  %v4282_v55 = vsel %vm1158_vm2, %v4281_v14, 0.0 }
0x187a   : > { %4265 = vadd.xlane.f32.xlu0 %v4264_v50  ;;  %4259 = vadd.xlane.f32.xlu1 %v4258_v63  ;;  %v4275_v43 = vsel %vm1150_vm9, %v4180_v45, 0.0  ;;  %v4293_v51 = vsel %vm1153_vm12, %v4180_v45, 0.0  ;;  %v4287_v4 = vsel %vm1152_vm11, %v4180_v45, 0.0  ;;  %v4305_v44 = vsel %vm1155_vm14, %v4180_v45, 0.0 }
0x187b   : > { %5646 = vmatprep.subr.mxu1 %v6052_v9  ;;  %v4276_v53 = vsel %vm1158_vm2, %v4275_v43, 0.0  ;;  %v4294_v20 = vsel %vm1158_vm2, %v4293_v51, 0.0  ;;  %v4288_v21 = vsel %vm1158_vm2, %v4287_v4, 0.0  ;;  %v4306_v56 = vsel %vm1158_vm2, %v4305_v44, 0.0 }
0x187c   : > { %v4299_v59 = vsel %vm1154_vm13, %v4180_v45, 0.0  ;;  %vm4826_vm3 = vcmask 130048  }
0x187d   : > { %v4300_v16 = vsel %vm1158_vm2, %v4299_v59, 0.0 }
0x187e   : > { %4271 = vadd.xlane.f32.xlu0 %v4270_v18  ;;  %4283 = vadd.xlane.f32.xlu1 %v4282_v55 }
0x1880   : > { %5634 = vmatmul.mubr.msk.f32.vlgmr.msra.gmra.mrb[34].mxu1 %vm1158_vm2, %v4387_v49 }
0x1881   : > { %5648 = vmatprep.mubr.msk.f32.mxu1 %vm6051_vm0, %v6052_v9 }
0x1882   : > { %4277 = vadd.xlane.f32.xlu0 %v4276_v53  ;;  %4295 = vadd.xlane.f32.xlu1 %v4294_v20 }
0x1886   : > { %4289 = vadd.xlane.f32.xlu0 %v4288_v21  ;;  %4307 = vadd.xlane.f32.xlu1 %v4306_v56 }
0x188a   : > { %4301 = vadd.xlane.f32.xlu0 %v4300_v16 }
0x18a0   : > { %4515 = vrot.lane.b32.xlu0 %v6848_v15, %s7440_s22  ;;  %s6069_s22 = smov 8  }
0x1907   : > { %v4266_v62 = vpop.xlane.xlu0 %4265  ;;  %v4260_v61 = vpop.xlane.xlu1 %4259 }
0x1908   : > { %v4267_v5 = vmul.f32 %v4266_v62, %v7042_v32  ;;  %v4261_v10 = vmul.f32 %v4260_v61, %v7046_v8 }
0x190a   : > { %v4268_v60 = vadd.f32 %v4267_v5, %v4261_v10 }
0x190b   : > { %v4272_v28 = vpop.xlane.xlu0 %4271  ;;  %v4284_v11 = vpop.xlane.xlu1 %4283 }
0x190c   : > { %v4273_v52 = vmul.f32 %v4272_v28, %v7051_v58  ;;  %v4285_v27 = vmul.f32 %v4284_v11, %v7065_v46 }
0x190e   : > { %v4274_v23 = vadd.f32 %v4273_v52, %v4268_v60 }
0x190f   : > { %v4278_v13 = vpop.xlane.xlu0 %4277  ;;  %v4296_v6 = vpop.xlane.xlu1 %4295 }
0x1910   : > { %v4279_v29 = vmul.f32 %v4278_v13, %v7057_v12  ;;  %v4297_v24 = vmul.f32 %v4296_v6, %v7076_v57 }
0x1912   : > { %v4280_v2 = vadd.f32 %v4279_v29, %v4274_v23 }
0x1913   : > { %v4290_v26 = vpop.xlane.xlu0 %4289  ;;  %v4308_v63 = vpop.xlane.xlu1 %4307 }
0x1914   : > { %v4286_v25 = vadd.f32 %v4285_v27, %v4280_v2  ;;  %v4291_v42 = vmul.f32 %v4290_v26, %v7070_v48  ;;  %v4309_v14 = vmul.f32 %v4308_v63, %v7087_v54 }
0x1916   : > { %v4292_v17 = vadd.f32 %v4291_v42, %v4286_v25 }
0x1917   : > { %v4302_v45 = vpop.xlane.xlu0 %4301 }
0x1918   : > { %v4298_v33 = vadd.f32 %v4297_v24, %v4292_v17  ;;  %v4303_v50 = vmul.f32 %v4302_v45, %v7082_v22 }
0x191a   : > { %v4304_v31 = vadd.f32 %v4303_v50, %v4298_v33 }
0x191b   : > { %v4516_v53 = vpop.permute.xlu0 %4515 }
0x191c   : > { %v4310_v18 = vadd.f32 %v4309_v14, %v4304_v31 }
0x194b   : > { %v7210_v55 = vpop.f32.mrb[32].mxu1 }
0x194c   : > { %v4311_v43 = vadd.f32 %v4310_v18, %v7210_v55  ;;  %v5623_v51 = vpop.f32.mrb[33].mxu1 }
0x194e   : > { %5627 = vmatmul.mubr.msk.f32.vlgmr.msra.gmra.mrb[28].mxu0 %vm1158_vm2, %v4311_v43 }
0x194f   : > { %5637 = vmatpush3.xpose.msk.msra.mxu0 %vm1158_vm2, %v4516_v53  ;;  %5638 = vmatprep.mubr.msk.f32.mxu0 %vm6051_vm0, %v6052_v9 }
0x1950   : > { %5641 = vmatprep.subr.mxu0 %v6052_v9 }
0x1952   : > { %5639 = vmatmul.mubr.msk.f32.vlgmr.msra.gmra.mrb[30].mxu0 %vm1158_vm2, %v4387_v49 }
0x1953   : > { %v4456_v20 = vpop.f32.mrb[34].mxu1  ;;  %5643 = vmatprep.mubr.msk.f32.mxu0 %vm6051_vm0, %v6052_v9 }
0x1954   : > { %4480 = vperm.xlu0 %5911, %v4456_v20   ;;  %4462 = vperm.xlu1 %5908, %v4456_v20   ;;  %v5635_v4 = vpop.f32.mrb[35].mxu1 }
0x1958   : > { %5914 = vset.pattern.permute.xlu0 %v6059_v38  ;;  %5909 = vset.pattern.permute.xlu1 %v6056_v34 }
0x1959   : > { %4498 = vperm.xlu0 %5914, %v4456_v20   ;;  %4468 = vperm.xlu1 %5909, %v4456_v20  }
0x195d   : > { %5910 = vset.pattern.permute.xlu1 %v6053_v19  ;;  %5917 = vset.pattern.permute.xlu0 %v6060_v39 }
0x195e   : > { %4474 = vperm.xlu1 %5910, %v4456_v20  }
0x1962   : > { %5912 = vset.pattern.permute.xlu1 %v6057_v36 }
0x1963   : > { %4486 = vperm.xlu1 %5912, %v4456_v20  }
0x1967   : > { %5913 = vset.pattern.permute.xlu1 %v6058_v37 }
0x1968   : > { %4492 = vperm.xlu1 %5913, %v4456_v20  }
0x196c   : > { %5915 = vset.pattern.permute.xlu1 %v6061_v40 }
0x196d   : > { %4504 = vperm.xlu1 %5915, %v4456_v20  }
0x1971   : > { %5916 = vset.pattern.permute.xlu1 %v6060_v39 }
0x1972   : > { %4510 = vperm.xlu1 %5916, %v4456_v20  }
0x19d3   : > { %v4463_v34 = vpop.permute.xlu1 %4462  ;;  %v4481_v56 = vpop.permute.xlu0 %4480 }
0x19d4   : > { %v4465_v36 = vsel %vm1147_vm6, %v4463_v34, 0.0  ;;  %v4483_v39 = vsel %vm1150_vm9, %v4481_v56, 0.0 }
0x19d8   : > { %v4469_v38 = vpop.permute.xlu1 %4468  ;;  %v4499_v5 = vpop.permute.xlu0 %4498 }
0x19d9   : > { %v4471_v19 = vsel %vm1148_vm7, %v4469_v38, 0.0  ;;  %v4501_v13 = vsel %vm1153_vm12, %v4499_v5, 0.0 }
0x19da   : > { %v4472_v21 = vadd.f32 %v4471_v19, %v4465_v36 }
0x19dd   : > { %v4475_v49 = vpop.permute.xlu1 %4474 }
0x19de   : > { %v4477_v37 = vsel %vm1149_vm8, %v4475_v49, 0.0 }
0x19df   : > { %v4478_v40 = vadd.f32 %v4477_v37, %v4472_v21 }
0x19e1   : > { %v4484_v16 = vadd.f32 %v4483_v39, %v4478_v40 }
0x19e2   : > { %v4487_v44 = vpop.permute.xlu1 %4486 }
0x19e3   : > { %v4489_v0 = vsel %vm1151_vm10, %v4487_v44, 0.0 }
0x19e4   : > { %v4490_v28 = vadd.f32 %v4489_v0, %v4484_v16  ;;  %v2924_v0 = vld [vmem:[%s7438_s3 + $0x18] sm:$0xff]  ;;  %s7447_s3 = sld [smem:[#allocation18_spill]] }
0x19e5   : > { %5647 = vmatpush3.msra.mxu1 %v2924_v0 }
0x19e6   : > { %5743 = vmatprep.subr.bf16.mxu1 %v6050_v3 }
0x19e7   : > { %v4493_v59 = vpop.permute.xlu1 %4492 }
0x19e8   : > { %v4495_v62 = vsel %vm1152_vm11, %v4493_v59, 0.0 }
0x19e9   : > { %v4496_v10 = vadd.f32 %v4495_v62, %v4490_v28 }
0x19eb   : > { %v4502_v52 = vadd.f32 %v4501_v13, %v4496_v10 }
0x19ec   : > { %v4505_v61 = vpop.permute.xlu1 %4504 }
0x19ed   : > { %v4507_v29 = vsel %vm1154_vm13, %v4505_v61, 0.0 }
0x19ee   : > { %v4508_v2 = vadd.f32 %v4507_v29, %v4502_v52 }
0x19f1   : > { %v4511_v60 = vpop.permute.xlu1 %4510 }
0x19f2   : > { %v4513_v23 = vsel %vm1155_vm14, %v4511_v60, 0.0 }
0x19f3   : > { %v4514_v25 = vadd.f32 %v4513_v23, %v4508_v2 }
0x1a21   : > { %v4381_v11 = vpop.f32.mrb[28].mxu0 }
0x1a22   : > { %v7248_v26 = vadd.f32 %v4381_v11, %v7129_v1  ;;  %v5628_v27 = vpop.f32.mrb[29].mxu0 }
0x1a25   : > { %v4585_v42 = vpop.f32.mrb[30].mxu0 }
0x1a26   : > { %v4586_v6 = vadd.f32 %v4585_v42, %v4514_v25  ;;  %v5640_v17 = vpop.f32.mrb[31].mxu0 }
0x1a28   : > { %v4589_v45 = vsel %vm3086_vm4, -1e+10, %v4586_v6 }
0x1a29   : > { %v4590_v24 = vsel %vm1158_vm2, %v4589_v45, -inf }
0x1a2a   : > { %4591 = vmax.xlane.f32.xlu0 %v4590_v24 }
0x1a40   : > { %4601 = vrot.lane.b32.xlu0 %v6848_v15, %s7442_s23  ;;  %s7444_s23 = sld [smem:[#allocation19_spill]] }
0x1ab7   : > { %v4592_v33 = vpop.xlane.xlu0 %4591 }
0x1ab8   : > { %v4593_v50 = vsub.f32 %v4589_v45, %v4592_v33 }
0x1aba   : > { %v4594_v63 = vmul.f32 1.442695, %v4593_v50 }
0x1abb   : > { %v4602_v31 = vpop.permute.xlu0 %4601 }
0x1abc   : > { %5948 = vpow2.f32 %v4594_v63  ;;  %5642 = vmatpush3.msra.mxu0 %v4602_v31 }
0x1abd   : > { %5737 = vmatprep.subr.bf16.mxu0 %v6050_v3 }
0x1ac6   : > { %v5949_v1 = vpop.eup %5948 }
0x1ac7   : > { %v4596_v14 = vsel %vm1158_vm2, %v5949_v1, 0.0 }
0x1ac8   : > { %4597 = vadd.xlane.f32.xlu1 %v4596_v14 }
0x1b55   : > { %v4598_v41 = vpop.xlane.xlu1 %4597 }
0x1b56   : > { %5950 = vrcp.f32 %v4598_v41 }
0x1b60   : > { %v5951_v18 = vpop.eup %5950 }
0x1b61   : > { %v4600_v43 = vmul.f32 %v5951_v18, %v5949_v1 }
0x1b63   : > { %5644 = vmatmul.mubr.msk.f32.vlgmr.msra.gmra.mrb[32].mxu0 %vm1158_vm2, %v4600_v43  ;;  %v4701_v15 = vsel %vm1151_vm10, %v4600_v43, 0.0  ;;  %v4677_v51 = vsel %vm1147_vm6, %v4600_v43, 0.0  ;;  %v4683_v4 = vsel %vm1148_vm7, %v4600_v43, 0.0  ;;  %v4689_v38 = vsel %vm1149_vm8, %v4600_v43, 0.0 }
0x1b64   : > { %v4702_v53 = vsel %vm1158_vm2, %v4701_v15, 0.0  ;;  %v4678_v20 = vsel %vm1158_vm2, %v4677_v51, 0.0  ;;  %5659 = vmatprep.mubr.msk.f32.mxu0 %vm6051_vm0, %v6052_v9  ;;  %v4684_v34 = vsel %vm1158_vm2, %v4683_v4, 0.0  ;;  %v4690_v49 = vsel %vm1158_vm2, %v4689_v38, 0.0  ;;  %v4862_v51 = vld [vmem:[%s7444_s23 + $0x8] sm:$0xff] }
0x1b65   : > { %4703 = vadd.xlane.f32.xlu0 %v4702_v53  ;;  %4679 = vadd.xlane.f32.xlu1 %v4678_v20  ;;  %v4695_v19 = vsel %vm1150_vm9, %v4600_v43, 0.0  ;;  %v4707_v36 = vsel %vm1152_vm11, %v4600_v43, 0.0  ;;  %v4713_v21 = vsel %vm1153_vm12, %v4600_v43, 0.0  ;;  %v4719_v40 = vsel %vm1154_vm13, %v4600_v43, 0.0  ;;  %v4863_v53 = vld [vmem:[%s7444_s23 + $0x10] sm:$0xff]  ;;  %v4864_v20 = vld [vmem:[%s7444_s23 + $0x18] sm:$0xff] }
0x1b66   : > { %v4696_v44 = vsel %vm1158_vm2, %v4695_v19, 0.0  ;;  %v4708_v37 = vsel %vm1158_vm2, %v4707_v36, 0.0  ;;  %v4714_v56 = vsel %vm1158_vm2, %v4713_v21, 0.0  ;;  %v4720_v59 = vsel %vm1158_vm2, %v4719_v40, 0.0 }
0x1b67   : > { %v4725_v39 = vsel %vm1155_vm14, %v4600_v43, 0.0  ;;  %v5741_v4 = vpack.c.bf16 %v4864_v20, %v4863_v53 }
0x1b68   : > { %v4726_v16 = vsel %vm1158_vm2, %v4725_v39, 0.0 }
0x1b69   : > { %4685 = vadd.xlane.f32.xlu1 %v4684_v34 }
0x1b6d   : > { %4691 = vadd.xlane.f32.xlu1 %v4690_v49 }
0x1b71   : > { %4697 = vadd.xlane.f32.xlu1 %v4696_v44 }
0x1b75   : > { %4709 = vadd.xlane.f32.xlu1 %v4708_v37 }
0x1b79   : > { %4715 = vadd.xlane.f32.xlu1 %v4714_v56 }
0x1b7b   : > { %4814 = vrot.lane.b32.xlu0 %v7091_v30, %s6069_s22  ;;  %s7445_s22 = sld [smem:[#allocation21_spill]] }
0x1b7d   : > { %4721 = vadd.xlane.f32.xlu1 %v4720_v59 }
0x1b81   : > { %4727 = vadd.xlane.f32.xlu1 %v4726_v16  ;;  %v4946_v34 = vld [vmem:[%s7445_s22] sm:$0xff]  ;;  %v4947_v38 = vld [vmem:[%s7445_s22 + $0x8] sm:$0xff]  ;;  %v4948_v49 = vld [vmem:[%s7445_s22 + $0x10] sm:$0xff] }
0x1b82   : > { %v5744_v19 = vpack.c.bf16 %v4947_v38, %v4946_v34  ;;  %v4949_v44 = vld [vmem:[%s7445_s22 + $0x18] sm:$0xff]  ;;  %v4950_v37 = vld [vmem:[%s7445_s22 + $0x20] sm:$0xff]  ;;  %v4951_v21 = vld [vmem:[%s7445_s22 + $0x28] sm:$0xff] }
0x1b83   : > { %v5747_v36 = vpack.c.bf16 %v4949_v44, %v4948_v49  ;;  %v5750_v56 = vpack.c.bf16 %v4951_v21, %v4950_v37 }
0x1bf2   : > { %v4680_v62 = vpop.xlane.xlu1 %4679  ;;  %v4704_v11 = vpop.xlane.xlu0 %4703 }
0x1bf3   : > { %v4681_v13 = vmul.f32 %v4680_v62, %v7046_v8  ;;  %v4705_v25 = vmul.f32 %v4704_v11, %v7065_v46 }
0x1bf6   : > { %v4686_v28 = vpop.xlane.xlu1 %4685 }
0x1bf7   : > { %v4687_v30 = vmul.f32 %v4686_v28, %v7042_v32  ;;  %v5314_v28 = vld [vmem:[%s7447_s3] ss:$0 sm:$0xff]  ;;  %s6070_s3 = smov 16  }
0x1bf9   : > { %v4688_v60 = vadd.f32 %v4687_v30, %v4681_v13  ;;  %v4953_v30 = vld [vmem:[%s7445_s22 + $0x38] sm:$0xff] }
0x1bfa   : > { %v4692_v61 = vpop.xlane.xlu1 %4691 }
0x1bfb   : > { %v4693_v52 = vmul.f32 %v4692_v61, %v7051_v58 }
0x1bfd   : > { %v4694_v23 = vadd.f32 %v4693_v52, %v4688_v60  ;;  %v5315_v52 = vld [vmem:[%s7448_s5] ss:$0 sm:$0xff]  ;;  %s6071_s5 = smov 24  }
0x1bfe   : > { %v4698_v5 = vpop.xlane.xlu1 %4697 }
0x1bff   : > { %v4699_v29 = vmul.f32 %v4698_v5, %v7057_v12 }
0x1c01   : > { %v4700_v2 = vadd.f32 %v4699_v29, %v4694_v23  ;;  %v5317_v23 = vld [vmem:[%s7449_s6] ss:$0 sm:$0xff]  ;;  %s959_s6 = scalar_lea.vmem %s7450_s4, %s6294_s16 }
0x1c02   : > { %v4710_v10 = vpop.xlane.xlu1 %4709 }
0x1c03   : > { %v4706_v42 = vadd.f32 %v4705_v25, %v4700_v2  ;;  %v4711_v6 = vmul.f32 %v4710_v10, %v7070_v48  ;;  %v5312_v48 = vld [vmem:[%s7443_s2] ss:$0 sm:$0xff]  ;;  %s7446_s2 = sld [smem:[#allocation17_spill]]  ;;  %v4952_v10 = vld [vmem:[%s7445_s22 + $0x30] sm:$0xff] }
0x1c04   : > { %v5753_v13 = vpack.c.bf16 %v4953_v30, %v4952_v10 }
0x1c05   : > { %v4712_v8 = vadd.f32 %v4711_v6, %v4706_v42 }
0x1c06   : > { %v4716_v47 = vpop.xlane.xlu1 %4715 }
0x1c07   : > { %v4717_v32 = vmul.f32 %v4716_v47, %v7076_v57 }
0x1c09   : > { %v4718_v45 = vadd.f32 %v4717_v32, %v4712_v8  ;;  %v5313_v0 = vld [vmem:[%s7446_s2] ss:$0 sm:$0xff]  ;;  %s931_s2 = sand.u32 1, %s6011_s10  }
0x1c0a   : > { %v4722_v27 = vpop.xlane.xlu1 %4721 }
0x1c0b   : > { %v4723_v58 = vmul.f32 %v4722_v27, %v7082_v22 }
0x1c0d   : > { %v4724_v12 = vadd.f32 %v4723_v58, %v4718_v45 }
0x1c0e   : > { %v4728_v17 = vpop.xlane.xlu1 %4727 }
0x1c0f   : > { %v4729_v24 = vmul.f32 %v4728_v17, %v7087_v54 }
0x1c11   : > { %v4730_v33 = vadd.f32 %v4729_v24, %v4724_v12  ;;  %v4815_v24 = vpop.permute.xlu0 %4814 }
0x1c36   : > { %v7299_v50 = vpop.f32.mrb[32].mxu0 }
0x1c37   : > { %v4731_v63 = vadd.f32 %v4730_v33, %v7299_v50  ;;  %v5645_v46 = vpop.f32.mrb[33].mxu0  ;;  %v4825_v33 = vsel %vm1158_vm2, %v6956_v7, %v4815_v24 }
0x1c39   : > { %5649 = vmatmul.mubr.msk.f32.vlgmr.msra.gmra.mrb[36].mxu1 %vm1158_vm2, %v4731_v63 }
0x1c3a   : > { %5678 = vmatprep.mubr.msk.f32.mxu1 %vm6051_vm0, %v6052_v9  ;;  %5745 = vmatpush3.bf16.msra.mxu1 %v5744_v19  ;;  %vm4961_vm0 = vcmask 523264  }
0x1c3b   : > { %5746 = vmatprep.subr.bf16.mxu1 %v6050_v3 }
0x1c3e   : > { %5748 = vmatpush3.bf16.msra.mxu1 %v5747_v36 }
0x1c3f   : > { %5749 = vmatprep.subr.bf16.mxu1 %v6050_v3 }
0x1c42   : > { %5751 = vmatpush3.bf16.msra.mxu1 %v5750_v56 }
0x1c43   : > { %5752 = vmatprep.subr.bf16.mxu1 %v6050_v3 }
0x1c46   : > { %5754 = vmatpush3.bf16.msra.mxu1 %v5753_v13 }
0x1d0c   : > { %v4801_v57 = vpop.f32.mrb[36].mxu1 }
0x1d0d   : > { %v4805_v22 = vadd.f32 %v4801_v57, %v7248_v26  ;;  %v5650_v54 = vpop.f32.mrb[37].mxu1  ;;  %v4861_v26 = vld [vmem:[%s7444_s23] sm:$0xff] }
0x1d0f   : > { %v4812_v31 = vadd.f32 %v5312_v48, %v4805_v22  ;;  %v5319_v22 = vld [vmem:[%s6211_s17] ss:$0 sm:$0xff] }
0x1d11   : > { %v4831_v1 = vadd.f32 %v4812_v31, %v6837_v35  ;;  %v5738_v35 = vpack.c.bf16 %v4862_v51, %v4861_v26  ;;  %v5320_v31 = vld [vmem:[%s6216_s30] ss:$0 sm:$0xff] }
0x1d13   : > { %v4834_v14 = vsel %vm987_vm1, %v4831_v1, 0.0  ;;  %5739 = vmatpush3.bf16.msra.mxu0 %v5738_v35 }
0x1d14   : > { %4835 = vadd.xlane.f32.xlu1 %v4834_v14  ;;  %5740 = vmatprep.subr.bf16.mxu0 %v6050_v3 }
0x1d17   : > { %5742 = vmatpush3.bf16.msra.mxu0 %v5741_v4 }
0x1da1   : > { %v4836_v41 = vpop.xlane.xlu1 %4835 }
0x1da2   : > { %v4837_v18 = vmul.f32 0.03125, %v4836_v41 }
0x1da4   : > { %v4838_v9 = vsub.f32 %v4831_v1, %v4837_v18 }
0x1da6   : > { %v4839_v43 = vmul.f32 %v4838_v9, %v4838_v9 }
0x1da8   : > { %v4840_v15 = vsel %vm987_vm1, %v4839_v43, 0.0 }
0x1da9   : > { %4841 = vadd.xlane.f32.xlu1 %v4840_v15 }
0x1e36   : > { %v4842_v40 = vpop.xlane.xlu1 %4841 }
0x1e37   : > { %v4843_v59 = vmul.f32 0.03125, %v4842_v40 }
0x1e39   : > { %v4844_v39 = vadd.f32 1e-05, %v4843_v59 }
0x1e3b   : > { %5952 = vrsqrt.f32 %v4844_v39 }
0x1e45   : > { %v5953_v16 = vpop.eup %5952 }
0x1e46   : > { %v4846_v62 = vmul.f32 %v5953_v16, %v4838_v9 }
0x1e48   : > { %v4853_v61 = vmul.f32 %v5313_v0, %v4846_v62 }
0x1e4a   : > { %v4860_v5 = vadd.f32 %v5314_v28, %v4853_v61 }
0x1e4c   : > { %5660 = vmatmul.mubr.msk.f32.vlgmr.msra.gmra.mrb[34].mxu0 %vm987_vm1, %v4860_v5 }
0x1f1f   : > { %v4941_v3 = vpop.f32.mrb[34].mxu0 }
0x1f20   : > { %v4942_v47 = vadd.f32 %v5315_v52, %v4941_v3  ;;  %v5661_v60 = vpop.f32.mrb[35].mxu0 }
0x1f22   : > { %v4945_v29 = vmax.f32 %v4942_v47, 0.0 }
0x1f24   : > { %5679 = vmatmul.mubr.msk.f32.vlgmr.msra.gmra.mrb[38].mxu1 %vm4961_vm0, %v4945_v29 }
0x1ff7   : > { %v5031_v11 = vpop.f32.mrb[38].mxu1 }
0x1ff8   : > { %v5032_v2 = vadd.f32 %v5317_v23, %v5031_v11  ;;  %v5680_v27 = vpop.f32.mrb[39].mxu1 }
0x1ffa   : > { %v5035_v25 = vadd.f32 %v5032_v2, %v4860_v5 }
0x1ffc   : > { %v5038_v42 = vsel %vm987_vm1, %v5035_v25, 0.0 }
0x1ffd   : > { %5039 = vadd.xlane.f32.xlu1 %v5038_v42 }
0x200e   : > { %4818 = vrot.lane.b32.xlu1 %v7210_v55, %s6070_s3  ;;  %s5239_s3 = sshll.u32 %s931_s2, 3 }
0x200f   : > { %s933_s8 = scalar_lea.vmem [#allocation2], %s5239_s3 }
0x2010   : > { %s5084_s9 = sshll.u32 %s933_s8, 4  ;;  %s7347_s9 = int_to_ptr.vmem [resolvable:$true] %s5084_s9 }
0x2011   : > { %s5957_s4 = scalar_lea.vmem %s7347_s9, 128 }
0x2012   : > { %p5958_p11 = scmp.ne.s32.totalorder %s7347_s9, %s5957_s4 }
0x2014   : > { %p5959_p12 = pnand %p5958_p11, %p6266_p5 }
0x2016   : > { %p5960_p13 = pneg %p5959_p12 }
0x208a   : > { %v5040_v6 = vpop.xlane.xlu1 %5039 }
0x208b   : > { %v5041_v32 = vmul.f32 0.03125, %v5040_v6 }
0x208d   : > { %v5042_v17 = vsub.f32 %v5035_v25, %v5041_v32 }
0x208e   : > { %v4819_v45 = vpop.permute.xlu1 %4818 }
0x208f   : > { %v5043_v8 = vmul.f32 %v5042_v17, %v5042_v17  ;;  %v4827_v46 = vsel %vm4826_vm3, %v4825_v33, %v4819_v45 }
0x2091   : > { %v5044_v58 = vsel %vm987_vm1, %v5043_v8, 0.0 }
0x2092   : > { %5045 = vadd.xlane.f32.xlu1 %v5044_v58 }
0x20a3   : > { %4822 = vrot.lane.b32.xlu1 %v7299_v50, %s6071_s5  ;;  %s5322_s5 = sshll.u32 %s6249_s0, 7  ;;  %s6072_s0 = smov [#allocation2]  }
0x20a4   : > { %s7345_s16 = scalar_lea.hbm %s6221_s27, %s5322_s5  ;;  %s5961_s3 = sshll.u32 %s6072_s0, 4  ;;  %s5962_s3 = int_to_ptr.vmem [resolvable:$false] %s5961_s3 }
0x20a5   : > { %s5963_s12 = scalar_lea.vmem %s5962_s3, 256  ;;  %p5964_p0 = scmp.lt.s32.totalorder %s7347_s9, %s5962_s3 }
0x20a6   : > { %p5965_p1 = scmp.lt.s32.totalorder %s5963_s12, %s5957_s4 }
0x20a8   : > { %p5966_p2 = por %p5965_p1, %p5964_p0 }
0x20aa   : > { %p5967_p3 = pnand %p5966_p2, %p5960_p13 }
0x211f   : > { %v5046_v12 = vpop.xlane.xlu1 %5045 }
0x2120   : > { %v5047_v55 = vmul.f32 0.03125, %v5046_v12 }
0x2122   : > { %v5048_v63 = vadd.f32 1e-05, %v5047_v55 }
0x2123   : > { %v4823_v48 = vpop.permute.xlu1 %4822 }
0x2124   : > { %5954 = vrsqrt.f32 %v5048_v63  ;;  %v4829_v57 = vsel %vm4828_vm5, %v4827_v46, %v4823_v48 }
0x2125   : > { %4830 = vst.msk [vmem:[%s959_s6] sm:$0xff] %vm987_vm1, %v4829_v57  ;;  %s5067_s6 = scalar_lea.sflag [#allocation3], %s931_s2 }
0x212e   : > { %v5955_v50 = vpop.eup %5954 }
0x212f   : > { %v5050_v54 = vmul.f32 %v5955_v50, %v5042_v17 }
0x2131   : > { %v5057_v7 = vmul.f32 %v5319_v22, %v5050_v54 }
0x2133   : > { %v5064_v1 = vadd.f32 %v5320_v31, %v5057_v7 }
0x2135   : > { %5065 = vst.msk [vmem:[%s933_s8] sm:$0xff] %vm987_vm1, %v5064_v1 }
0x2136   : > { %5970 = shalt.err (!%p5967_p3)
}
0x2137   : > { %s5971_s8 = scalar_lea.hbm %s7345_s16, 128  ;;  %s5975_s2 = scalar_lea.hbm %s6221_s27, 256 }
0x2138   : > { %p5972_p4 = scmp.ne.s32.totalorder %s7345_s16, %s5971_s8  ;;  %p5976_p9 = scmp.lt.u32.totalorder %s7345_s16, %s6221_s27 }
0x2139   : > { %p5977_p10 = scmp.lt.u32.totalorder %s5975_s2, %s5971_s8  ;;  %p5979_p12 = scmp.lt.u32.totalorder %s5971_s8, %s7345_s16 }
0x213a   : > { %p5973_p7 = pnand %p5972_p4, %p6266_p5 }
0x213b   : > { %p5978_p11 = por %p5977_p10, %p5976_p9 }
0x213c   : > { %p5974_p8 = pneg %p5973_p7 }
0x213d   : > { %p5980_p0 = por %p5979_p12, %p5978_p11 }
0x213f   : > { %p5981_p13 = pnand %p5980_p0, %p5974_p8 }
0x2141   : > { %5984 = shalt.err (!%p5981_p13)
}
0x2142   : > { %5755 = dma.vmem_to_hbm [thread:$0]  (%p6266_p5), %s7347_s9, 128, %s7345_s16, %s5067_s6  }
0x2143 PF: > { %p5761_p1 = scmp.ge.s32.totalorder %s6019_s15, 2  ;;  %s5099_s12 = sand.u32 1, %s6007_s7  }
0x2144   : > { %s5100_s4 = scalar_lea.sflag [#allocation3], %s5099_s12 }
0x2145   : > { %p5758_p2 = pnand %p5761_p1, %p6270_p6 }
0x2147   : > { %6002 = dma.done.wait (!%p5758_p2), %s5100_s4, 128  }
0x2148   : > { %6004 = vsyncadd (!%p5758_p2), %s5100_s4, 4294967168  ;;  %p70_p3 = scmp.ge.s32.totalorder %s6253_s18, 4   ;;  %s7451_s7 = smov %s6011_s10 }
0x2149   : > { %s7452_s10 = smov %s6015_s11  ;;  %s7453_s11 = smov %s6264_s26 }
0x214a   : > { %s7454_s15 = smov %s6253_s18  ;;  %72 = sbr.rel (!%p70_p3) target bundleno = 58 (0x3a), region = 217 }
0x2151   :  { %5112 = vsyncpa [#allocation3], 1 }
0x2152   :  { %5114 = vsyncpa [#allocation3 + $0x1], 1 }

</bundles_post_ra>
